<compile_context>
chip_gen: v5e
topology: v5e:2x2
jax: 0.10.0
libtpu: 0.0.40
codegen_flags: <defaults>
</compile_context>

<pallas_src>
from functools import partial

import jax
import jax.numpy as jnp
from jax.experimental import pallas as pl
from jax.experimental.pallas import tpu as pltpu

# ----------------------------- model config ---------------------------------
C = 3                     # image channels
PATCH = 8                 # patch size
IMAGE_SIZE = (32, 16)     # (H, W); H > W -> concat box_image/image along dim=2
GH, GW = IMAGE_SIZE[0] // PATCH, IMAGE_SIZE[1] // PATCH
N_PATCH = GH * GW
N_TOK = N_PATCH + 1       # +1 class token
VWIDTH = 32
V_HEADS = 2
V_LAYERS = 2

CONTEXT = 8               # text sequence length
VOCAB = 64
TWIDTH = 32
T_HEADS = 2
T_LAYERS = 2

EMBED_DIM = 32            # shared embedding dim
LN_EPS = 1e-5
NEG_INF = -1e9

# order in which stacked per-layer weights are passed to the fused tower kernels
BLOCK_ORDER = ("ln1_g", "ln1_b", "q_w", "k_w", "v_w", "q_b", "k_b", "v_b",
               "out_w", "out_b", "ln2_g", "ln2_b", "fc1_w", "fc1_b", "fc2_w", "fc2_b")


# ----------------------------- in-kernel math --------------------------------
def _ln(x, g, b):
    mu = jnp.mean(x, axis=-1, keepdims=True)
    var = jnp.mean((x - mu) ** 2, axis=-1, keepdims=True)
    return (x - mu) * jax.lax.rsqrt(var + LN_EPS) * g + b


def _l2_normalize(x):
    return x * jax.lax.rsqrt(jnp.sum(x * x, axis=-1, keepdims=True))


def _encoder_block(x, l, refs, num_heads, attn_bias):
    """One pre-LN transformer block on a single sequence x: (S, D), all f32 in VMEM."""
    (ln1_g, ln1_b, q_w, k_w, v_w, q_b, k_b, v_b,
     out_w, out_b, ln2_g, ln2_b, fc1_w, fc1_b, fc2_w, fc2_b) = refs
    head_dim = q_w.shape[-1]
    scale = 1.0 / float(head_dim) ** 0.5

    h = _ln(x, ln1_g[l], ln1_b[l])
    attn_out = None
    for hh in range(num_heads):                      # static unroll; weights pre-split per head
        q = jnp.dot(h, q_w[l, hh], preferred_element_type=jnp.float32) + q_b[l, hh]
        k = jnp.dot(h, k_w[l, hh], preferred_element_type=jnp.float32) + k_b[l, hh]
        v = jnp.dot(h, v_w[l, hh], preferred_element_type=jnp.float32) + v_b[l, hh]
        s = jnp.dot(q, k.T, preferred_element_type=jnp.float32) * scale
        if attn_bias is not None:
            s = s + attn_bias
        s = s - jnp.max(s, axis=-1, keepdims=True)
        p = jnp.exp(s)
        p = p / jnp.sum(p, axis=-1, keepdims=True)
        o = jnp.dot(p, v, preferred_element_type=jnp.float32)
        # concat(o_0..o_{H-1}) @ W_out  ==  sum_h o_h @ W_out[h*Dh:(h+1)*Dh, :]
        c = jnp.dot(o, out_w[l, hh], preferred_element_type=jnp.float32)
        attn_out = c if attn_out is None else attn_out + c
    x = x + attn_out + out_b[l]

    h2 = _ln(x, ln2_g[l], ln2_b[l])
    m = jnp.dot(h2, fc1_w[l], preferred_element_type=jnp.float32) + fc1_b[l]
    m = m * jax.nn.sigmoid(1.702 * m)                # QuickGELU (f32 VPU/EUP math)
    m = jnp.dot(m, fc2_w[l], preferred_element_type=jnp.float32) + fc2_b[l]
    return x + m


# ----------------------------- fused tower kernels ---------------------------
def _vision_tower_kernel(xp_ref, conv_w_ref, cls_pos_ref, ln_pre_g_ref, ln_pre_b_ref,
                         ln1_g, ln1_b, q_w, k_w, v_w, q_b, k_b, v_b,
                         out_w, out_b, ln2_g, ln2_b, fc1_w, fc1_b, fc2_w, fc2_b,
                         ln_post_g_ref, ln_post_b_ref, proj_ref,
                         o_ref, *, num_layers, num_heads):
    block_refs = (ln1_g, ln1_b, q_w, k_w, v_w, q_b, k_b, v_b,
                  out_w, out_b, ln2_g, ln2_b, fc1_w, fc1_b, fc2_w, fc2_b)

    # Patch embedding: im2col patches @ conv weight (stride==kernel Conv2d, bias=False).
    patches = jnp.dot(xp_ref[...].astype(jnp.float32), conv_w_ref[...],
                      preferred_element_type=jnp.float32)          # (N_PATCH, D)
    n_patch = patches.shape[0]
    n_tok = n_patch + 1
    # Place patches into rows 1..N_PATCH (row 0 = class token) via a shift matrix,
    # avoiding an unaligned sublane concat.  cls_pos already holds cls+pos[0] in row 0.
    rows = jax.lax.broadcasted_iota(jnp.int32, (n_tok, n_patch), 0)
    cols = jax.lax.broadcasted_iota(jnp.int32, (n_tok, n_patch), 1)
    shift = jnp.where(rows == cols + 1, 1.0, 0.0).astype(jnp.float32)
    x = jnp.dot(shift, patches, preferred_element_type=jnp.float32) + cls_pos_ref[...]

    x = _ln(x, ln_pre_g_ref[...], ln_pre_b_ref[...])
    for l in range(num_layers):
        x = _encoder_block(x, l, block_refs, num_heads, attn_bias=None)

    pooled = _ln(x[0:1, :], ln_post_g_ref[...], ln_post_b_ref[...])  # class-token pooling
    feat = jnp.dot(pooled, proj_ref[...], preferred_element_type=jnp.float32)
    o_ref[...] = _l2_normalize(feat).astype(o_ref.dtype)


def _text_tower_kernel(x_ref, onehot_ref,
                       ln1_g, ln1_b, q_w, k_w, v_w, q_b, k_b, v_b,
                       out_w, out_b, ln2_g, ln2_b, fc1_w, fc1_b, fc2_w, fc2_b,
                       ln_f_g_ref, ln_f_b_ref, proj_ref,
                       o_ref, *, num_layers, num_heads):
    block_refs = (ln1_g, ln1_b, q_w, k_w, v_w, q_b, k_b, v_b,
                  out_w, out_b, ln2_g, ln2_b, fc1_w, fc1_b, fc2_w, fc2_b)

    x = x_ref[...].astype(jnp.float32)               # (S, D): token emb + pos (from glue)
    s_len = x.shape[0]
    rows = jax.lax.broadcasted_iota(jnp.int32, (s_len, s_len), 0)
    cols = jax.lax.broadcasted_iota(jnp.int32, (s_len, s_len), 1)
    causal = jnp.where(cols <= rows, 0.0, NEG_INF).astype(jnp.float32)  # in-kernel mask

    for l in range(num_layers):
        x = _encoder_block(x, l, block_refs, num_heads, attn_bias=causal)

    x = _ln(x, ln_f_g_ref[...], ln_f_b_ref[...])
    pooled = jnp.dot(onehot_ref[...], x, preferred_element_type=jnp.float32)  # EOT pooling
    feat = jnp.dot(pooled, proj_ref[...], preferred_element_type=jnp.float32)
    o_ref[...] = _l2_normalize(feat).astype(o_ref.dtype)


# ----------------------------- wrappers / glue --------------------------------
def _whole_spec(arr):
    """Whole-array VMEM block; constant block index -> fetched once across the grid."""
    nd = arr.ndim
    return pl.BlockSpec(arr.shape, lambda *_: (0,) * nd)


def _stack_block_params(blocks, width, heads):
    """Stack per-layer weights and pre-split QKV / out-proj per head (glue-side, tiny)."""
    num_layers = len(blocks)
    dh = width // heads

    def st(name):
        return jnp.stack([blk[name] for blk in blocks], axis=0)

    # NOTE: qkv_w stored as (D, 3D) applied as x @ W; when loading a real
    # nn.MultiheadAttention checkpoint, transpose in_proj_weight accordingly.
    qkv_w = st("qkv_w")                                   # (L, D, 3D)
    qkv_b = st("qkv_b")                                   # (L, 3D)

    def w_part(i):                                        # -> (L, H, D, Dh)
        w = qkv_w[:, :, i * width:(i + 1) * width]
        return w.reshape(num_layers, width, heads, dh).transpose(0, 2, 1, 3)

    def b_part(i):                                        # -> (L, H, 1, Dh)
        return qkv_b[:, i * width:(i + 1) * width].reshape(num_layers, heads, 1, dh)

    return dict(
        ln1_g=st("ln1_g").reshape(num_layers, 1, width),
        ln1_b=st("ln1_b").reshape(num_layers, 1, width),
        q_w=w_part(0), k_w=w_part(1), v_w=w_part(2),
        q_b=b_part(0), k_b=b_part(1), v_b=b_part(2),
        out_w=st("out_w").reshape(num_layers, heads, dh, width),   # (L, H, Dh, D)
        out_b=st("out_b").reshape(num_layers, 1, width),
        ln2_g=st("ln2_g").reshape(num_layers, 1, width),
        ln2_b=st("ln2_b").reshape(num_layers, 1, width),
        fc1_w=st("fc1_w"), fc1_b=st("fc1_b").reshape(num_layers, 1, 4 * width),
        fc2_w=st("fc2_w"), fc2_b=st("fc2_b").reshape(num_layers, 1, width),
    )


def encode_image(params, merged):
    """merged: (B, C, 32, 16) NCHW -> (B, EMBED_DIM) L2-normalized features."""
    B = merged.shape[0]
    cpp = C * PATCH * PATCH
    # im2col: Conv2d(patch, stride=patch, bias=False) == patch matmul
    xp = (merged.reshape(B, C, GH, PATCH, GW, PATCH)
                .transpose(0, 2, 4, 1, 3, 5)
                .reshape(B, N_PATCH, cpp))
    cls_pos = params["v_pos"].at[0].add(params["v_cls"])   # row 0 = cls + pos[0]
    bw = _stack_block_params(params["v_blocks"], VWIDTH, V_HEADS)

    weights = ([params["v_conv_w"], cls_pos,
                params["v_ln_pre_g"].reshape(1, VWIDTH), params["v_ln_pre_b"].reshape(1, VWIDTH)]
               + [bw[n] for n in BLOCK_ORDER]
               + [params["v_ln_post_g"].reshape(1, VWIDTH), params["v_ln_post_b"].reshape(1, VWIDTH),
                  params["v_proj"]])

    out = pl.pallas_call(
        partial(_vision_tower_kernel, num_layers=V_LAYERS, num_heads=V_HEADS),
        grid=(B,),
        in_specs=([pl.BlockSpec((None, N_PATCH, cpp), lambda b: (b, 0, 0))]
                  + [_whole_spec(w) for w in weights]),
        out_specs=pl.BlockSpec((None, 1, EMBED_DIM), lambda b: (b, 0, 0)),
        out_shape=jax.ShapeDtypeStruct((B, 1, EMBED_DIM), jnp.float32),
        compiler_params=pltpu.CompilerParams(dimension_semantics=("arbitrary",)),
    )(xp, *weights)
    return out.reshape(B, EMBED_DIM)


def encode_text(params, text):
    """text: (B, S) int32 token ids -> (B, EMBED_DIM) L2-normalized features."""
    B, S = text.shape
    x_emb = jnp.take(params["t_tok_emb"], text, axis=0) + params["t_pos"][None]  # (B, S, D)
    eot = jnp.argmax(text, axis=-1)                       # open_clip EOT = max token id
    onehot = jax.nn.one_hot(eot, S, dtype=jnp.float32).reshape(B, 1, S)
    bw = _stack_block_params(params["t_blocks"], TWIDTH, T_HEADS)

    weights = ([bw[n] for n in BLOCK_ORDER]
               + [params["t_ln_g"].reshape(1, TWIDTH), params["t_ln_b"].reshape(1, TWIDTH),
                  params["t_proj"]])

    out = pl.pallas_call(
        partial(_text_tower_kernel, num_layers=T_LAYERS, num_heads=T_HEADS),
        grid=(B,),
        in_specs=([pl.BlockSpec((None, S, TWIDTH), lambda b: (b, 0, 0)),
                   pl.BlockSpec((None, 1, S), lambda b: (b, 0, 0))]
                  + [_whole_spec(w) for w in weights]),
        out_specs=pl.BlockSpec((None, 1, EMBED_DIM), lambda b: (b, 0, 0)),
        out_shape=jax.ShapeDtypeStruct((B, 1, EMBED_DIM), jnp.float32),
        compiler_params=pltpu.CompilerParams(dimension_semantics=("arbitrary",)),
    )(x_emb, onehot, *weights)
    return out.reshape(B, EMBED_DIM)


def clip_extractor_forward(params, box_image, image, text):
    # visual.image_size[0] (32) > image_size[1] (16) -> concat along dim=2 (height)
    merged = jnp.concatenate([box_image, image], axis=2)
    return encode_image(params, merged), encode_text(params, text)


# ----------------------------- pure-JAX reference -----------------------------
def _ref_ln(x, g, b):
    mu = x.mean(-1, keepdims=True)
    var = ((x - mu) ** 2).mean(-1, keepdims=True)
    return (x - mu) / jnp.sqrt(var + LN_EPS) * g + b


def _ref_block(x, p, mask, heads):
    B, S, D = x.shape
    dh = D // heads
    h = _ref_ln(x, p["ln1_g"], p["ln1_b"])
    qkv = (h @ p["qkv_w"] + p["qkv_b"]).reshape(B, S, 3, heads, dh)
    q, k, v = (qkv[:, :, i].transpose(0, 2, 1, 3) for i in range(3))
    s = jnp.einsum("bhqd,bhkd->bhqk", q, k) / (dh ** 0.5) + mask
    a = jax.nn.softmax(s, axis=-1)
    o = jnp.einsum("bhqk,bhkd->bhqd", a, v).transpose(0, 2, 1, 3).reshape(B, S, D)
    x = x + o @ p["out_w"] + p["out_b"]
    h2 = _ref_ln(x, p["ln2_g"], p["ln2_b"])
    m = h2 @ p["fc1_w"] + p["fc1_b"]
    m = m * jax.nn.sigmoid(1.702 * m)
    return x + m @ p["fc2_w"] + p["fc2_b"]


def reference_forward(params, box_image, image, text):
    merged = jnp.concatenate([box_image, image], axis=2)
    B = merged.shape[0]
    xp = (merged.reshape(B, C, GH, PATCH, GW, PATCH)
                .transpose(0, 2, 4, 1, 3, 5).reshape(B, N_PATCH, -1))
    tok = xp @ params["v_conv_w"]
    cls = jnp.broadcast_to(params["v_cls"][None, None], (B, 1, VWIDTH))
    x = jnp.concatenate([cls, tok], axis=1) + params["v_pos"][None]
    x = _ref_ln(x, params["v_ln_pre_g"], params["v_ln_pre_b"])
    zeros = jnp.zeros((N_TOK, N_TOK), jnp.float32)
    for blk in params["v_blocks"]:
        x = _ref_block(x, blk, zeros, V_HEADS)
    pooled = _ref_ln(x[:, 0], params["v_ln_post_g"], params["v_ln_post_b"])
    img = pooled @ params["v_proj"]
    img = img / jnp.linalg.norm(img, axis=-1, keepdims=True)

    t = jnp.take(params["t_tok_emb"], text, axis=0) + params["t_pos"][None]
    causal = jnp.where(jnp.tril(jnp.ones((CONTEXT, CONTEXT), bool)), 0.0, NEG_INF)
    causal = causal.astype(jnp.float32)
    for blk in params["t_blocks"]:
        t = _ref_block(t, blk, causal, T_HEADS)
    t = _ref_ln(t, params["t_ln_g"], params["t_ln_b"])
    pooled_t = t[jnp.arange(text.shape[0]), jnp.argmax(text, axis=-1)]
    txt = pooled_t @ params["t_proj"]
    txt = txt / jnp.linalg.norm(txt, axis=-1, keepdims=True)
    return img, txt


# ----------------------------- parameter init ---------------------------------
def init_block_params(nrm, width):
    return dict(
        ln1_g=1.0 + nrm((width,)), ln1_b=nrm((width,)),
        qkv_w=nrm((width, 3 * width)), qkv_b=nrm((3 * width,)),
        out_w=nrm((width, width)), out_b=nrm((width,)),
        ln2_g=1.0 + nrm((width,)), ln2_b=nrm((width,)),
        fc1_w=nrm((width, 4 * width)), fc1_b=nrm((4 * width,)),
        fc2_w=nrm((4 * width, width)), fc2_b=nrm((width,)),
    )


def init_params(key):
    keys = iter(jax.random.split(key, 256))

    def nrm(shape, scale=0.02):
        return (scale * jax.random.normal(next(keys), shape)).astype(jnp.float32)

    p = {}
    # vision tower
    p["v_conv_w"] = nrm((C * PATCH * PATCH, VWIDTH))      # Conv2d(bias=False)
    p["v_cls"] = nrm((VWIDTH,))
    p["v_pos"] = nrm((N_TOK, VWIDTH))
    p["v_ln_pre_g"] = 1.0 + nrm((VWIDTH,)); p["v_ln_pre_b"] = nrm((VWIDTH,))
    p["v_blocks"] = [init_block_params(nrm, VWIDTH) for _ in range(V_LAYERS)]
    p["v_ln_post_g"] = 1.0 + nrm((VWIDTH,)); p["v_ln_post_b"] = nrm((VWIDTH,))
    p["v_proj"] = nrm((VWIDTH, EMBED_DIM))
    # text tower
    p["t_tok_emb"] = nrm((VOCAB, TWIDTH))
    p["t_pos"] = nrm((CONTEXT, TWIDTH))
    p["t_blocks"] = [init_block_params(nrm, TWIDTH) for _ in range(T_LAYERS)]
    p["t_ln_g"] = 1.0 + nrm((TWIDTH,)); p["t_ln_b"] = nrm((TWIDTH,))
    p["t_proj"] = nrm((TWIDTH, EMBED_DIM))
    return p


# ----------------------------- main --------------------------------------------
if __name__ == "__main__":
    key = jax.random.PRNGKey(0)
    kp, kb, ki, kt = jax.random.split(key, 4)
    params = init_params(kp)

    # box_image / image each (B, C, 16, 16); merged image is (B, C, 32, 16)
    box_image = jax.random.normal(kb, (2, C, 16, 16), jnp.float32)
    image = jax.random.normal(ki, (2, C, 16, 16), jnp.float32)
    text = jax.random.randint(kt, (2, CONTEXT), 0, VOCAB, dtype=jnp.int32)

    fwd = jax.jit(lambda b, i, t: clip_extractor_forward(params, b, i, t))
    img_f, txt_f = fwd(box_image, image, text)
    jax.block_until_ready((img_f, txt_f))

    assert img_f.shape == (2, EMBED_DIM) and txt_f.shape == (2, EMBED_DIM)
    # features are L2-normalized
    assert jnp.allclose(jnp.linalg.norm(img_f, axis=-1), 1.0, atol=1e-4)
    assert jnp.allclose(jnp.linalg.norm(txt_f, axis=-1), 1.0, atol=1e-4)

    # pure-JAX reference check (generous tolerance: default XLA matmul precision)
    img_ref, txt_ref = reference_forward(params, box_image, image, text)
    assert float(jnp.max(jnp.abs(img_f - img_ref))) < 2e-2
    assert float(jnp.max(jnp.abs(txt_f - txt_ref))) < 2e-2

    print("KERNEL_OK")
</pallas_src>

<mosaic_0001>
module attributes {stable_mosaic.version = 11 : i64} {
  func.func @_vision_tower_kernel(%arg0: i32, %arg1: memref<1x8x192xf32, #tpu.memory_space<vmem>>, %arg2: memref<192x32xf32, #tpu.memory_space<vmem>>, %arg3: memref<9x32xf32, #tpu.memory_space<vmem>>, %arg4: memref<1x32xf32, #tpu.memory_space<vmem>>, %arg5: memref<1x32xf32, #tpu.memory_space<vmem>>, %arg6: memref<2x1x32xf32, #tpu.memory_space<vmem>>, %arg7: memref<2x1x32xf32, #tpu.memory_space<vmem>>, %arg8: memref<2x2x32x16xf32, #tpu.memory_space<vmem>>, %arg9: memref<2x2x32x16xf32, #tpu.memory_space<vmem>>, %arg10: memref<2x2x32x16xf32, #tpu.memory_space<vmem>>, %arg11: memref<2x2x1x16xf32, #tpu.memory_space<vmem>>, %arg12: memref<2x2x1x16xf32, #tpu.memory_space<vmem>>, %arg13: memref<2x2x1x16xf32, #tpu.memory_space<vmem>>, %arg14: memref<2x2x16x32xf32, #tpu.memory_space<vmem>>, %arg15: memref<2x1x32xf32, #tpu.memory_space<vmem>>, %arg16: memref<2x1x32xf32, #tpu.memory_space<vmem>>, %arg17: memref<2x1x32xf32, #tpu.memory_space<vmem>>, %arg18: memref<2x32x128xf32, #tpu.memory_space<vmem>>, %arg19: memref<2x1x128xf32, #tpu.memory_space<vmem>>, %arg20: memref<2x128x32xf32, #tpu.memory_space<vmem>>, %arg21: memref<2x1x32xf32, #tpu.memory_space<vmem>>, %arg22: memref<1x32xf32, #tpu.memory_space<vmem>>, %arg23: memref<1x32xf32, #tpu.memory_space<vmem>>, %arg24: memref<32x32xf32, #tpu.memory_space<vmem>>, %arg25: memref<1x1x32xf32, #tpu.memory_space<vmem>>) attributes {dimension_semantics = [#tpu.dimension_semantics<arbitrary>], iteration_bounds = array<i64: 2>, scalar_prefetch = 0 : i64, scratch_operands = 0 : i64, tpu.core_type = #tpu.core_type<tc>, window_params = [{transform_indices = @transform_0, window_bounds = array<i64: 1, 8, 192>}, {pipeline_mode = #tpu.pipeline_mode<synchronous>, transform_indices = @transform_1, window_bounds = array<i64: 192, 32>}, {pipeline_mode = #tpu.pipeline_mode<synchronous>, transform_indices = @transform_2, window_bounds = array<i64: 9, 32>}, {pipeline_mode = #tpu.pipeline_mode<synchronous>, transform_indices = @transform_3, window_bounds = array<i64: 1, 32>}, {pipeline_mode = #tpu.pipeline_mode<synchronous>, transform_indices = @transform_4, window_bounds = array<i64: 1, 32>}, {pipeline_mode = #tpu.pipeline_mode<synchronous>, transform_indices = @transform_5, window_bounds = array<i64: 2, 1, 32>}, {pipeline_mode = #tpu.pipeline_mode<synchronous>, transform_indices = @transform_6, window_bounds = array<i64: 2, 1, 32>}, {pipeline_mode = #tpu.pipeline_mode<synchronous>, transform_indices = @transform_7, window_bounds = array<i64: 2, 2, 32, 16>}, {pipeline_mode = #tpu.pipeline_mode<synchronous>, transform_indices = @transform_8, window_bounds = array<i64: 2, 2, 32, 16>}, {pipeline_mode = #tpu.pipeline_mode<synchronous>, transform_indices = @transform_9, window_bounds = array<i64: 2, 2, 32, 16>}, {pipeline_mode = #tpu.pipeline_mode<synchronous>, transform_indices = @transform_10, window_bounds = array<i64: 2, 2, 1, 16>}, {pipeline_mode = #tpu.pipeline_mode<synchronous>, transform_indices = @transform_11, window_bounds = array<i64: 2, 2, 1, 16>}, {pipeline_mode = #tpu.pipeline_mode<synchronous>, transform_indices = @transform_12, window_bounds = array<i64: 2, 2, 1, 16>}, {pipeline_mode = #tpu.pipeline_mode<synchronous>, transform_indices = @transform_13, window_bounds = array<i64: 2, 2, 16, 32>}, {pipeline_mode = #tpu.pipeline_mode<synchronous>, transform_indices = @transform_14, window_bounds = array<i64: 2, 1, 32>}, {pipeline_mode = #tpu.pipeline_mode<synchronous>, transform_indices = @transform_15, window_bounds = array<i64: 2, 1, 32>}, {pipeline_mode = #tpu.pipeline_mode<synchronous>, transform_indices = @transform_16, window_bounds = array<i64: 2, 1, 32>}, {pipeline_mode = #tpu.pipeline_mode<synchronous>, transform_indices = @transform_17, window_bounds = array<i64: 2, 32, 128>}, {pipeline_mode = #tpu.pipeline_mode<synchronous>, transform_indices = @transform_18, window_bounds = array<i64: 2, 1, 128>}, {pipeline_mode = #tpu.pipeline_mode<synchronous>, transform_indices = @transform_19, window_bounds = array<i64: 2, 128, 32>}, {pipeline_mode = #tpu.pipeline_mode<synchronous>, transform_indices = @transform_20, window_bounds = array<i64: 2, 1, 32>}, {pipeline_mode = #tpu.pipeline_mode<synchronous>, transform_indices = @transform_21, window_bounds = array<i64: 1, 32>}, {pipeline_mode = #tpu.pipeline_mode<synchronous>, transform_indices = @transform_22, window_bounds = array<i64: 1, 32>}, {pipeline_mode = #tpu.pipeline_mode<synchronous>, transform_indices = @transform_23, window_bounds = array<i64: 32, 32>}, {transform_indices = @transform_24, window_bounds = array<i64: 1, 1, 32>}]} {
    %c0 = arith.constant 0 : index
    %c0_0 = arith.constant 0 : index
    %c0_1 = arith.constant 0 : index
    %0 = vector.load %arg1[%c0, %c0_0, %c0_1] : memref<1x8x192xf32, #tpu.memory_space<vmem>>, vector<1x8x192xf32>
    %1 = vector.shape_cast %0 : vector<1x8x192xf32> to vector<8x192xf32>
    %c0_2 = arith.constant 0 : index
    %c0_3 = arith.constant 0 : index
    %2 = vector.load %arg2[%c0_2, %c0_3] : memref<192x32xf32, #tpu.memory_space<vmem>>, vector<192x32xf32>
    %cst = arith.constant dense<0.000000e+00> : vector<8x32xf32>
    %3 = tpu.matmul %1, %2, %cst {dimension_numbers = #tpu.dot_dimension_numbers<[1], [0], [0], [1], [0, 0, 1, 1], [], []>} : vector<8x192xf32>, vector<192x32xf32>, vector<8x32xf32> -> vector<8x32xf32>
    %4 = tpu.iota {dimensions = array<i32: 0>} : vector<9x8xi32>
    %5 = tpu.iota {dimensions = array<i32: 1>} : vector<9x8xi32>
    %c1_i32 = arith.constant 1 : i32
    %6 = vector.broadcast %c1_i32 : i32 to vector<9x8xi32>
    %7 = arith.addi %5, %6 : vector<9x8xi32>
    %8 = arith.cmpi eq, %4, %7 : vector<9x8xi32>
    %cst_4 = arith.constant 1.000000e+00 : f32
    %cst_5 = arith.constant 0.000000e+00 : f32
    %9 = vector.broadcast %cst_4 : f32 to vector<9x8xf32>
    %10 = vector.broadcast %cst_5 : f32 to vector<9x8xf32>
    %11 = arith.select %8, %9, %10 : vector<9x8xi1>, vector<9x8xf32>
    %cst_6 = arith.constant dense<0.000000e+00> : vector<9x32xf32>
    %12 = tpu.matmul %11, %3, %cst_6 {dimension_numbers = #tpu.dot_dimension_numbers<[1], [0], [0], [1], [0, 0, 1, 1], [], []>} : vector<9x8xf32>, vector<8x32xf32>, vector<9x32xf32> -> vector<9x32xf32>
    %c0_7 = arith.constant 0 : index
    %c0_8 = arith.constant 0 : index
    %13 = vector.load %arg3[%c0_7, %c0_8] : memref<9x32xf32, #tpu.memory_space<vmem>>, vector<9x32xf32>
    %14 = arith.addf %12, %13 : vector<9x32xf32>
    %c0_9 = arith.constant 0 : index
    %c0_10 = arith.constant 0 : index
    %15 = vector.load %arg4[%c0_9, %c0_10] : memref<1x32xf32, #tpu.memory_space<vmem>>, vector<1x32xf32>
    %c0_11 = arith.constant 0 : index
    %c0_12 = arith.constant 0 : index
    %16 = vector.load %arg5[%c0_11, %c0_12] : memref<1x32xf32, #tpu.memory_space<vmem>>, vector<1x32xf32>
    %cst_13 = arith.constant dense<0.000000e+00> : vector<9xf32>
    %17 = vector.multi_reduction <add>, %14, %cst_13 [1] : vector<9x32xf32> to vector<9xf32>
    %18 = vector.shape_cast %17 : vector<9xf32> to vector<9x1xf32>
    %cst_14 = arith.constant 3.200000e+01 : f32
    %19 = vector.broadcast %cst_14 : f32 to vector<9x1xf32>
    %20 = arith.divf %18, %19 : vector<9x1xf32>
    %21 = vector.broadcast %20 : vector<9x1xf32> to vector<9x32xf32>
    %22 = arith.subf %14, %21 : vector<9x32xf32>
    %23 = arith.mulf %22, %22 : vector<9x32xf32>
    %cst_15 = arith.constant dense<0.000000e+00> : vector<9xf32>
    %24 = vector.multi_reduction <add>, %23, %cst_15 [1] : vector<9x32xf32> to vector<9xf32>
    %25 = vector.shape_cast %24 : vector<9xf32> to vector<9x1xf32>
    %cst_16 = arith.constant 3.200000e+01 : f32
    %26 = vector.broadcast %cst_16 : f32 to vector<9x1xf32>
    %27 = arith.divf %25, %26 : vector<9x1xf32>
    %28 = vector.broadcast %20 : vector<9x1xf32> to vector<9x32xf32>
    %29 = arith.subf %14, %28 : vector<9x32xf32>
    %cst_17 = arith.constant 9.99999974E-6 : f32
    %30 = vector.broadcast %cst_17 : f32 to vector<9x1xf32>
    %31 = arith.addf %27, %30 : vector<9x1xf32>
    %32 = math.rsqrt %31 : vector<9x1xf32>
    %33 = vector.broadcast %32 : vector<9x1xf32> to vector<9x32xf32>
    %34 = arith.mulf %29, %33 : vector<9x32xf32>
    %35 = vector.broadcast %15 : vector<1x32xf32> to vector<9x32xf32>
    %36 = arith.mulf %34, %35 : vector<9x32xf32>
    %37 = vector.broadcast %16 : vector<1x32xf32> to vector<9x32xf32>
    %38 = arith.addf %36, %37 : vector<9x32xf32>
    %c0_18 = arith.constant 0 : index
    %c0_19 = arith.constant 0 : index
    %c0_20 = arith.constant 0 : index
    %39 = vector.load %arg6[%c0_18, %c0_19, %c0_20] : memref<2x1x32xf32, #tpu.memory_space<vmem>>, vector<1x1x32xf32>
    %40 = vector.shape_cast %39 : vector<1x1x32xf32> to vector<1x32xf32>
    %c0_21 = arith.constant 0 : index
    %c0_22 = arith.constant 0 : index
    %c0_23 = arith.constant 0 : index
    %41 = vector.load %arg7[%c0_21, %c0_22, %c0_23] : memref<2x1x32xf32, #tpu.memory_space<vmem>>, vector<1x1x32xf32>
    %42 = vector.shape_cast %41 : vector<1x1x32xf32> to vector<1x32xf32>
    %cst_24 = arith.constant dense<0.000000e+00> : vector<9xf32>
    %43 = vector.multi_reduction <add>, %38, %cst_24 [1] : vector<9x32xf32> to vector<9xf32>
    %44 = vector.shape_cast %43 : vector<9xf32> to vector<9x1xf32>
    %cst_25 = arith.constant 3.200000e+01 : f32
    %45 = vector.broadcast %cst_25 : f32 to vector<9x1xf32>
    %46 = arith.divf %44, %45 : vector<9x1xf32>
    %47 = vector.broadcast %46 : vector<9x1xf32> to vector<9x32xf32>
    %48 = arith.subf %38, %47 : vector<9x32xf32>
    %49 = arith.mulf %48, %48 : vector<9x32xf32>
    %cst_26 = arith.constant dense<0.000000e+00> : vector<9xf32>
    %50 = vector.multi_reduction <add>, %49, %cst_26 [1] : vector<9x32xf32> to vector<9xf32>
    %51 = vector.shape_cast %50 : vector<9xf32> to vector<9x1xf32>
    %cst_27 = arith.constant 3.200000e+01 : f32
    %52 = vector.broadcast %cst_27 : f32 to vector<9x1xf32>
    %53 = arith.divf %51, %52 : vector<9x1xf32>
    %54 = vector.broadcast %46 : vector<9x1xf32> to vector<9x32xf32>
    %55 = arith.subf %38, %54 : vector<9x32xf32>
    %cst_28 = arith.constant 9.99999974E-6 : f32
    %56 = vector.broadcast %cst_28 : f32 to vector<9x1xf32>
    %57 = arith.addf %53, %56 : vector<9x1xf32>
    %58 = math.rsqrt %57 : vector<9x1xf32>
    %59 = vector.broadcast %58 : vector<9x1xf32> to vector<9x32xf32>
    %60 = arith.mulf %55, %59 : vector<9x32xf32>
    %61 = vector.broadcast %40 : vector<1x32xf32> to vector<9x32xf32>
    %62 = arith.mulf %60, %61 : vector<9x32xf32>
    %63 = vector.broadcast %42 : vector<1x32xf32> to vector<9x32xf32>
    %64 = arith.addf %62, %63 : vector<9x32xf32>
    %c0_29 = arith.constant 0 : index
    %c0_30 = arith.constant 0 : index
    %c0_31 = arith.constant 0 : index
    %c0_32 = arith.constant 0 : index
    %65 = vector.load %arg8[%c0_29, %c0_30, %c0_31, %c0_32] : memref<2x2x32x16xf32, #tpu.memory_space<vmem>>, vector<1x1x32x16xf32>
    %66 = vector.shape_cast %65 : vector<1x1x32x16xf32> to vector<32x16xf32>
    %cst_33 = arith.constant dense<0.000000e+00> : vector<9x16xf32>
    %67 = tpu.matmul %64, %66, %cst_33 {dimension_numbers = #tpu.dot_dimension_numbers<[1], [0], [0], [1], [0, 0, 1, 1], [], []>} : vector<9x32xf32>, vector<32x16xf32>, vector<9x16xf32> -> vector<9x16xf32>
    %c0_34 = arith.constant 0 : index
    %c0_35 = arith.constant 0 : index
    %c0_36 = arith.constant 0 : index
    %c0_37 = arith.constant 0 : index
    %68 = vector.load %arg11[%c0_34, %c0_35, %c0_36, %c0_37] : memref<2x2x1x16xf32, #tpu.memory_space<vmem>>, vector<1x1x1x16xf32>
    %69 = vector.shape_cast %68 : vector<1x1x1x16xf32> to vector<1x16xf32>
    %70 = vector.broadcast %69 : vector<1x16xf32> to vector<9x16xf32>
    %71 = arith.addf %67, %70 : vector<9x16xf32>
    %c0_38 = arith.constant 0 : index
    %c0_39 = arith.constant 0 : index
    %c0_40 = arith.constant 0 : index
    %c0_41 = arith.constant 0 : index
    %72 = vector.load %arg9[%c0_38, %c0_39, %c0_40, %c0_41] : memref<2x2x32x16xf32, #tpu.memory_space<vmem>>, vector<1x1x32x16xf32>
    %73 = vector.shape_cast %72 : vector<1x1x32x16xf32> to vector<32x16xf32>
    %cst_42 = arith.constant dense<0.000000e+00> : vector<9x16xf32>
    %74 = tpu.matmul %64, %73, %cst_42 {dimension_numbers = #tpu.dot_dimension_numbers<[1], [0], [0], [1], [0, 0, 1, 1], [], []>} : vector<9x32xf32>, vector<32x16xf32>, vector<9x16xf32> -> vector<9x16xf32>
    %c0_43 = arith.constant 0 : index
    %c0_44 = arith.constant 0 : index
    %c0_45 = arith.constant 0 : index
    %c0_46 = arith.constant 0 : index
    %75 = vector.load %arg12[%c0_43, %c0_44, %c0_45, %c0_46] : memref<2x2x1x16xf32, #tpu.memory_space<vmem>>, vector<1x1x1x16xf32>
    %76 = vector.shape_cast %75 : vector<1x1x1x16xf32> to vector<1x16xf32>
    %77 = vector.broadcast %76 : vector<1x16xf32> to vector<9x16xf32>
    %78 = arith.addf %74, %77 : vector<9x16xf32>
    %c0_47 = arith.constant 0 : index
    %c0_48 = arith.constant 0 : index
    %c0_49 = arith.constant 0 : index
    %c0_50 = arith.constant 0 : index
    %79 = vector.load %arg10[%c0_47, %c0_48, %c0_49, %c0_50] : memref<2x2x32x16xf32, #tpu.memory_space<vmem>>, vector<1x1x32x16xf32>
    %80 = vector.shape_cast %79 : vector<1x1x32x16xf32> to vector<32x16xf32>
    %cst_51 = arith.constant dense<0.000000e+00> : vector<9x16xf32>
    %81 = tpu.matmul %64, %80, %cst_51 {dimension_numbers = #tpu.dot_dimension_numbers<[1], [0], [0], [1], [0, 0, 1, 1], [], []>} : vector<9x32xf32>, vector<32x16xf32>, vector<9x16xf32> -> vector<9x16xf32>
    %c0_52 = arith.constant 0 : index
    %c0_53 = arith.constant 0 : index
    %c0_54 = arith.constant 0 : index
    %c0_55 = arith.constant 0 : index
    %82 = vector.load %arg13[%c0_52, %c0_53, %c0_54, %c0_55] : memref<2x2x1x16xf32, #tpu.memory_space<vmem>>, vector<1x1x1x16xf32>
    %83 = vector.shape_cast %82 : vector<1x1x1x16xf32> to vector<1x16xf32>
    %84 = vector.broadcast %83 : vector<1x16xf32> to vector<9x16xf32>
    %85 = arith.addf %81, %84 : vector<9x16xf32>
    %86 = tpu.transpose %78, [1, 0] : vector<9x16xf32> -> vector<16x9xf32>
    %cst_56 = arith.constant dense<0.000000e+00> : vector<9x9xf32>
    %87 = tpu.matmul %71, %86, %cst_56 {dimension_numbers = #tpu.dot_dimension_numbers<[1], [0], [0], [1], [0, 0, 1, 1], [], []>} : vector<9x16xf32>, vector<16x9xf32>, vector<9x9xf32> -> vector<9x9xf32>
    %cst_57 = arith.constant 2.500000e-01 : f32
    %88 = vector.broadcast %cst_57 : f32 to vector<9x9xf32>
    %89 = arith.mulf %87, %88 : vector<9x9xf32>
    %cst_58 = arith.constant dense<0xFF800000> : vector<9xf32>
    %90 = vector.multi_reduction <maximumf>, %89, %cst_58 [1] : vector<9x9xf32> to vector<9xf32>
    %91 = vector.shape_cast %90 : vector<9xf32> to vector<9x1xf32>
    %92 = vector.broadcast %91 : vector<9x1xf32> to vector<9x9xf32>
    %93 = arith.subf %89, %92 : vector<9x9xf32>
    %94 = math.exp %93 : vector<9x9xf32>
    %cst_59 = arith.constant dense<0.000000e+00> : vector<9xf32>
    %95 = vector.multi_reduction <add>, %94, %cst_59 [1] : vector<9x9xf32> to vector<9xf32>
    %96 = vector.shape_cast %95 : vector<9xf32> to vector<9x1xf32>
    %97 = vector.broadcast %96 : vector<9x1xf32> to vector<9x9xf32>
    %98 = arith.divf %94, %97 : vector<9x9xf32>
    %cst_60 = arith.constant dense<0.000000e+00> : vector<9x16xf32>
    %99 = tpu.matmul %98, %85, %cst_60 {dimension_numbers = #tpu.dot_dimension_numbers<[1], [0], [0], [1], [0, 0, 1, 1], [], []>} : vector<9x9xf32>, vector<9x16xf32>, vector<9x16xf32> -> vector<9x16xf32>
    %c0_61 = arith.constant 0 : index
    %c0_62 = arith.constant 0 : index
    %c0_63 = arith.constant 0 : index
    %c0_64 = arith.constant 0 : index
    %100 = vector.load %arg14[%c0_61, %c0_62, %c0_63, %c0_64] : memref<2x2x16x32xf32, #tpu.memory_space<vmem>>, vector<1x1x16x32xf32>
    %101 = vector.shape_cast %100 : vector<1x1x16x32xf32> to vector<16x32xf32>
    %cst_65 = arith.constant dense<0.000000e+00> : vector<9x32xf32>
    %102 = tpu.matmul %99, %101, %cst_65 {dimension_numbers = #tpu.dot_dimension_numbers<[1], [0], [0], [1], [0, 0, 1, 1], [], []>} : vector<9x16xf32>, vector<16x32xf32>, vector<9x32xf32> -> vector<9x32xf32>
    %c0_66 = arith.constant 0 : index
    %c1 = arith.constant 1 : index
    %c0_67 = arith.constant 0 : index
    %c0_68 = arith.constant 0 : index
    %103 = vector.load %arg8[%c0_66, %c1, %c0_67, %c0_68] : memref<2x2x32x16xf32, #tpu.memory_space<vmem>>, vector<1x1x32x16xf32>
    %104 = vector.shape_cast %103 : vector<1x1x32x16xf32> to vector<32x16xf32>
    %cst_69 = arith.constant dense<0.000000e+00> : vector<9x16xf32>
    %105 = tpu.matmul %64, %104, %cst_69 {dimension_numbers = #tpu.dot_dimension_numbers<[1], [0], [0], [1], [0, 0, 1, 1], [], []>} : vector<9x32xf32>, vector<32x16xf32>, vector<9x16xf32> -> vector<9x16xf32>
    %c0_70 = arith.constant 0 : index
    %c1_71 = arith.constant 1 : index
    %c0_72 = arith.constant 0 : index
    %c0_73 = arith.constant 0 : index
    %106 = vector.load %arg11[%c0_70, %c1_71, %c0_72, %c0_73] : memref<2x2x1x16xf32, #tpu.memory_space<vmem>>, vector<1x1x1x16xf32>
    %107 = vector.shape_cast %106 : vector<1x1x1x16xf32> to vector<1x16xf32>
    %108 = vector.broadcast %107 : vector<1x16xf32> to vector<9x16xf32>
    %109 = arith.addf %105, %108 : vector<9x16xf32>
    %c0_74 = arith.constant 0 : index
    %c1_75 = arith.constant 1 : index
    %c0_76 = arith.constant 0 : index
    %c0_77 = arith.constant 0 : index
    %110 = vector.load %arg9[%c0_74, %c1_75, %c0_76, %c0_77] : memref<2x2x32x16xf32, #tpu.memory_space<vmem>>, vector<1x1x32x16xf32>
    %111 = vector.shape_cast %110 : vector<1x1x32x16xf32> to vector<32x16xf32>
    %cst_78 = arith.constant dense<0.000000e+00> : vector<9x16xf32>
    %112 = tpu.matmul %64, %111, %cst_78 {dimension_numbers = #tpu.dot_dimension_numbers<[1], [0], [0], [1], [0, 0, 1, 1], [], []>} : vector<9x32xf32>, vector<32x16xf32>, vector<9x16xf32> -> vector<9x16xf32>
    %c0_79 = arith.constant 0 : index
    %c1_80 = arith.constant 1 : index
    %c0_81 = arith.constant 0 : index
    %c0_82 = arith.constant 0 : index
    %113 = vector.load %arg12[%c0_79, %c1_80, %c0_81, %c0_82] : memref<2x2x1x16xf32, #tpu.memory_space<vmem>>, vector<1x1x1x16xf32>
    %114 = vector.shape_cast %113 : vector<1x1x1x16xf32> to vector<1x16xf32>
    %115 = vector.broadcast %114 : vector<1x16xf32> to vector<9x16xf32>
    %116 = arith.addf %112, %115 : vector<9x16xf32>
    %c0_83 = arith.constant 0 : index
    %c1_84 = arith.constant 1 : index
    %c0_85 = arith.constant 0 : index
    %c0_86 = arith.constant 0 : index
    %117 = vector.load %arg10[%c0_83, %c1_84, %c0_85, %c0_86] : memref<2x2x32x16xf32, #tpu.memory_space<vmem>>, vector<1x1x32x16xf32>
    %118 = vector.shape_cast %117 : vector<1x1x32x16xf32> to vector<32x16xf32>
    %cst_87 = arith.constant dense<0.000000e+00> : vector<9x16xf32>
    %119 = tpu.matmul %64, %118, %cst_87 {dimension_numbers = #tpu.dot_dimension_numbers<[1], [0], [0], [1], [0, 0, 1, 1], [], []>} : vector<9x32xf32>, vector<32x16xf32>, vector<9x16xf32> -> vector<9x16xf32>
    %c0_88 = arith.constant 0 : index
    %c1_89 = arith.constant 1 : index
    %c0_90 = arith.constant 0 : index
    %c0_91 = arith.constant 0 : index
    %120 = vector.load %arg13[%c0_88, %c1_89, %c0_90, %c0_91] : memref<2x2x1x16xf32, #tpu.memory_space<vmem>>, vector<1x1x1x16xf32>
    %121 = vector.shape_cast %120 : vector<1x1x1x16xf32> to vector<1x16xf32>
    %122 = vector.broadcast %121 : vector<1x16xf32> to vector<9x16xf32>
    %123 = arith.addf %119, %122 : vector<9x16xf32>
    %124 = tpu.transpose %116, [1, 0] : vector<9x16xf32> -> vector<16x9xf32>
    %cst_92 = arith.constant dense<0.000000e+00> : vector<9x9xf32>
    %125 = tpu.matmul %109, %124, %cst_92 {dimension_numbers = #tpu.dot_dimension_numbers<[1], [0], [0], [1], [0, 0, 1, 1], [], []>} : vector<9x16xf32>, vector<16x9xf32>, vector<9x9xf32> -> vector<9x9xf32>
    %cst_93 = arith.constant 2.500000e-01 : f32
    %126 = vector.broadcast %cst_93 : f32 to vector<9x9xf32>
    %127 = arith.mulf %125, %126 : vector<9x9xf32>
    %cst_94 = arith.constant dense<0xFF800000> : vector<9xf32>
    %128 = vector.multi_reduction <maximumf>, %127, %cst_94 [1] : vector<9x9xf32> to vector<9xf32>
    %129 = vector.shape_cast %128 : vector<9xf32> to vector<9x1xf32>
    %130 = vector.broadcast %129 : vector<9x1xf32> to vector<9x9xf32>
    %131 = arith.subf %127, %130 : vector<9x9xf32>
    %132 = math.exp %131 : vector<9x9xf32>
    %cst_95 = arith.constant dense<0.000000e+00> : vector<9xf32>
    %133 = vector.multi_reduction <add>, %132, %cst_95 [1] : vector<9x9xf32> to vector<9xf32>
    %134 = vector.shape_cast %133 : vector<9xf32> to vector<9x1xf32>
    %135 = vector.broadcast %134 : vector<9x1xf32> to vector<9x9xf32>
    %136 = arith.divf %132, %135 : vector<9x9xf32>
    %cst_96 = arith.constant dense<0.000000e+00> : vector<9x16xf32>
    %137 = tpu.matmul %136, %123, %cst_96 {dimension_numbers = #tpu.dot_dimension_numbers<[1], [0], [0], [1], [0, 0, 1, 1], [], []>} : vector<9x9xf32>, vector<9x16xf32>, vector<9x16xf32> -> vector<9x16xf32>
    %c0_97 = arith.constant 0 : index
    %c1_98 = arith.constant 1 : index
    %c0_99 = arith.constant 0 : index
    %c0_100 = arith.constant 0 : index
    %138 = vector.load %arg14[%c0_97, %c1_98, %c0_99, %c0_100] : memref<2x2x16x32xf32, #tpu.memory_space<vmem>>, vector<1x1x16x32xf32>
    %139 = vector.shape_cast %138 : vector<1x1x16x32xf32> to vector<16x32xf32>
    %cst_101 = arith.constant dense<0.000000e+00> : vector<9x32xf32>
    %140 = tpu.matmul %137, %139, %cst_101 {dimension_numbers = #tpu.dot_dimension_numbers<[1], [0], [0], [1], [0, 0, 1, 1], [], []>} : vector<9x16xf32>, vector<16x32xf32>, vector<9x32xf32> -> vector<9x32xf32>
    %141 = arith.addf %102, %140 : vector<9x32xf32>
    %142 = arith.addf %38, %141 : vector<9x32xf32>
    %c0_102 = arith.constant 0 : index
    %c0_103 = arith.constant 0 : index
    %c0_104 = arith.constant 0 : index
    %143 = vector.load %arg15[%c0_102, %c0_103, %c0_104] : memref<2x1x32xf32, #tpu.memory_space<vmem>>, vector<1x1x32xf32>
    %144 = vector.shape_cast %143 : vector<1x1x32xf32> to vector<1x32xf32>
    %145 = vector.broadcast %144 : vector<1x32xf32> to vector<9x32xf32>
    %146 = arith.addf %142, %145 : vector<9x32xf32>
    %c0_105 = arith.constant 0 : index
    %c0_106 = arith.constant 0 : index
    %c0_107 = arith.constant 0 : index
    %147 = vector.load %arg16[%c0_105, %c0_106, %c0_107] : memref<2x1x32xf32, #tpu.memory_space<vmem>>, vector<1x1x32xf32>
    %148 = vector.shape_cast %147 : vector<1x1x32xf32> to vector<1x32xf32>
    %c0_108 = arith.constant 0 : index
    %c0_109 = arith.constant 0 : index
    %c0_110 = arith.constant 0 : index
    %149 = vector.load %arg17[%c0_108, %c0_109, %c0_110] : memref<2x1x32xf32, #tpu.memory_space<vmem>>, vector<1x1x32xf32>
    %150 = vector.shape_cast %149 : vector<1x1x32xf32> to vector<1x32xf32>
    %cst_111 = arith.constant dense<0.000000e+00> : vector<9xf32>
    %151 = vector.multi_reduction <add>, %146, %cst_111 [1] : vector<9x32xf32> to vector<9xf32>
    %152 = vector.shape_cast %151 : vector<9xf32> to vector<9x1xf32>
    %cst_112 = arith.constant 3.200000e+01 : f32
    %153 = vector.broadcast %cst_112 : f32 to vector<9x1xf32>
    %154 = arith.divf %152, %153 : vector<9x1xf32>
    %155 = vector.broadcast %154 : vector<9x1xf32> to vector<9x32xf32>
    %156 = arith.subf %146, %155 : vector<9x32xf32>
    %157 = arith.mulf %156, %156 : vector<9x32xf32>
    %cst_113 = arith.constant dense<0.000000e+00> : vector<9xf32>
    %158 = vector.multi_reduction <add>, %157, %cst_113 [1] : vector<9x32xf32> to vector<9xf32>
    %159 = vector.shape_cast %158 : vector<9xf32> to vector<9x1xf32>
    %cst_114 = arith.constant 3.200000e+01 : f32
    %160 = vector.broadcast %cst_114 : f32 to vector<9x1xf32>
    %161 = arith.divf %159, %160 : vector<9x1xf32>
    %162 = vector.broadcast %154 : vector<9x1xf32> to vector<9x32xf32>
    %163 = arith.subf %146, %162 : vector<9x32xf32>
    %cst_115 = arith.constant 9.99999974E-6 : f32
    %164 = vector.broadcast %cst_115 : f32 to vector<9x1xf32>
    %165 = arith.addf %161, %164 : vector<9x1xf32>
    %166 = math.rsqrt %165 : vector<9x1xf32>
    %167 = vector.broadcast %166 : vector<9x1xf32> to vector<9x32xf32>
    %168 = arith.mulf %163, %167 : vector<9x32xf32>
    %169 = vector.broadcast %148 : vector<1x32xf32> to vector<9x32xf32>
    %170 = arith.mulf %168, %169 : vector<9x32xf32>
    %171 = vector.broadcast %150 : vector<1x32xf32> to vector<9x32xf32>
    %172 = arith.addf %170, %171 : vector<9x32xf32>
    %c0_116 = arith.constant 0 : index
    %c0_117 = arith.constant 0 : index
    %c0_118 = arith.constant 0 : index
    %173 = vector.load %arg18[%c0_116, %c0_117, %c0_118] : memref<2x32x128xf32, #tpu.memory_space<vmem>>, vector<1x32x128xf32>
    %174 = vector.shape_cast %173 : vector<1x32x128xf32> to vector<32x128xf32>
    %cst_119 = arith.constant dense<0.000000e+00> : vector<9x128xf32>
    %175 = tpu.matmul %172, %174, %cst_119 {dimension_numbers = #tpu.dot_dimension_numbers<[1], [0], [0], [1], [0, 0, 1, 1], [], []>} : vector<9x32xf32>, vector<32x128xf32>, vector<9x128xf32> -> vector<9x128xf32>
    %c0_120 = arith.constant 0 : index
    %c0_121 = arith.constant 0 : index
    %c0_122 = arith.constant 0 : index
    %176 = vector.load %arg19[%c0_120, %c0_121, %c0_122] : memref<2x1x128xf32, #tpu.memory_space<vmem>>, vector<1x1x128xf32>
    %177 = vector.shape_cast %176 : vector<1x1x128xf32> to vector<1x128xf32>
    %178 = vector.broadcast %177 : vector<1x128xf32> to vector<9x128xf32>
    %179 = arith.addf %175, %178 : vector<9x128xf32>
    %cst_123 = arith.constant 1.702000e+00 : f32
    %180 = vector.broadcast %cst_123 : f32 to vector<9x128xf32>
    %181 = arith.mulf %180, %179 : vector<9x128xf32>
    %182 = arith.negf %181 : vector<9x128xf32>
    %183 = math.exp %182 : vector<9x128xf32>
    %cst_124 = arith.constant 1.000000e+00 : f32
    %184 = vector.broadcast %cst_124 : f32 to vector<9x128xf32>
    %185 = arith.addf %184, %183 : vector<9x128xf32>
    %186 = arith.divf %184, %185 : vector<9x128xf32>
    %187 = arith.mulf %179, %186 : vector<9x128xf32>
    %c0_125 = arith.constant 0 : index
    %c0_126 = arith.constant 0 : index
    %c0_127 = arith.constant 0 : index
    %188 = vector.load %arg20[%c0_125, %c0_126, %c0_127] : memref<2x128x32xf32, #tpu.memory_space<vmem>>, vector<1x128x32xf32>
    %189 = vector.shape_cast %188 : vector<1x128x32xf32> to vector<128x32xf32>
    %cst_128 = arith.constant dense<0.000000e+00> : vector<9x32xf32>
    %190 = tpu.matmul %187, %189, %cst_128 {dimension_numbers = #tpu.dot_dimension_numbers<[1], [0], [0], [1], [0, 0, 1, 1], [], []>} : vector<9x128xf32>, vector<128x32xf32>, vector<9x32xf32> -> vector<9x32xf32>
    %c0_129 = arith.constant 0 : index
    %c0_130 = arith.constant 0 : index
    %c0_131 = arith.constant 0 : index
    %191 = vector.load %arg21[%c0_129, %c0_130, %c0_131] : memref<2x1x32xf32, #tpu.memory_space<vmem>>, vector<1x1x32xf32>
    %192 = vector.shape_cast %191 : vector<1x1x32xf32> to vector<1x32xf32>
    %193 = vector.broadcast %192 : vector<1x32xf32> to vector<9x32xf32>
    %194 = arith.addf %190, %193 : vector<9x32xf32>
    %195 = arith.addf %146, %194 : vector<9x32xf32>
    %c1_132 = arith.constant 1 : index
    %c0_133 = arith.constant 0 : index
    %c0_134 = arith.constant 0 : index
    %196 = vector.load %arg6[%c1_132, %c0_133, %c0_134] : memref<2x1x32xf32, #tpu.memory_space<vmem>>, vector<1x1x32xf32>
    %197 = vector.shape_cast %196 : vector<1x1x32xf32> to vector<1x32xf32>
    %c1_135 = arith.constant 1 : index
    %c0_136 = arith.constant 0 : index
    %c0_137 = arith.constant 0 : index
    %198 = vector.load %arg7[%c1_135, %c0_136, %c0_137] : memref<2x1x32xf32, #tpu.memory_space<vmem>>, vector<1x1x32xf32>
    %199 = vector.shape_cast %198 : vector<1x1x32xf32> to vector<1x32xf32>
    %cst_138 = arith.constant dense<0.000000e+00> : vector<9xf32>
    %200 = vector.multi_reduction <add>, %195, %cst_138 [1] : vector<9x32xf32> to vector<9xf32>
    %201 = vector.shape_cast %200 : vector<9xf32> to vector<9x1xf32>
    %cst_139 = arith.constant 3.200000e+01 : f32
    %202 = vector.broadcast %cst_139 : f32 to vector<9x1xf32>
    %203 = arith.divf %201, %202 : vector<9x1xf32>
    %204 = vector.broadcast %203 : vector<9x1xf32> to vector<9x32xf32>
    %205 = arith.subf %195, %204 : vector<9x32xf32>
    %206 = arith.mulf %205, %205 : vector<9x32xf32>
    %cst_140 = arith.constant dense<0.000000e+00> : vector<9xf32>
    %207 = vector.multi_reduction <add>, %206, %cst_140 [1] : vector<9x32xf32> to vector<9xf32>
    %208 = vector.shape_cast %207 : vector<9xf32> to vector<9x1xf32>
    %cst_141 = arith.constant 3.200000e+01 : f32
    %209 = vector.broadcast %cst_141 : f32 to vector<9x1xf32>
    %210 = arith.divf %208, %209 : vector<9x1xf32>
    %211 = vector.broadcast %203 : vector<9x1xf32> to vector<9x32xf32>
    %212 = arith.subf %195, %211 : vector<9x32xf32>
    %cst_142 = arith.constant 9.99999974E-6 : f32
    %213 = vector.broadcast %cst_142 : f32 to vector<9x1xf32>
    %214 = arith.addf %210, %213 : vector<9x1xf32>
    %215 = math.rsqrt %214 : vector<9x1xf32>
    %216 = vector.broadcast %215 : vector<9x1xf32> to vector<9x32xf32>
    %217 = arith.mulf %212, %216 : vector<9x32xf32>
    %218 = vector.broadcast %197 : vector<1x32xf32> to vector<9x32xf32>
    %219 = arith.mulf %217, %218 : vector<9x32xf32>
    %220 = vector.broadcast %199 : vector<1x32xf32> to vector<9x32xf32>
    %221 = arith.addf %219, %220 : vector<9x32xf32>
    %c1_143 = arith.constant 1 : index
    %c0_144 = arith.constant 0 : index
    %c0_145 = arith.constant 0 : index
    %c0_146 = arith.constant 0 : index
    %222 = vector.load %arg8[%c1_143, %c0_144, %c0_145, %c0_146] : memref<2x2x32x16xf32, #tpu.memory_space<vmem>>, vector<1x1x32x16xf32>
    %223 = vector.shape_cast %222 : vector<1x1x32x16xf32> to vector<32x16xf32>
    %cst_147 = arith.constant dense<0.000000e+00> : vector<9x16xf32>
    %224 = tpu.matmul %221, %223, %cst_147 {dimension_numbers = #tpu.dot_dimension_numbers<[1], [0], [0], [1], [0, 0, 1, 1], [], []>} : vector<9x32xf32>, vector<32x16xf32>, vector<9x16xf32> -> vector<9x16xf32>
    %c1_148 = arith.constant 1 : index
    %c0_149 = arith.constant 0 : index
    %c0_150 = arith.constant 0 : index
    %c0_151 = arith.constant 0 : index
    %225 = vector.load %arg11[%c1_148, %c0_149, %c0_150, %c0_151] : memref<2x2x1x16xf32, #tpu.memory_space<vmem>>, vector<1x1x1x16xf32>
    %226 = vector.shape_cast %225 : vector<1x1x1x16xf32> to vector<1x16xf32>
    %227 = vector.broadcast %226 : vector<1x16xf32> to vector<9x16xf32>
    %228 = arith.addf %224, %227 : vector<9x16xf32>
    %c1_152 = arith.constant 1 : index
    %c0_153 = arith.constant 0 : index
    %c0_154 = arith.constant 0 : index
    %c0_155 = arith.constant 0 : index
    %229 = vector.load %arg9[%c1_152, %c0_153, %c0_154, %c0_155] : memref<2x2x32x16xf32, #tpu.memory_space<vmem>>, vector<1x1x32x16xf32>
    %230 = vector.shape_cast %229 : vector<1x1x32x16xf32> to vector<32x16xf32>
    %cst_156 = arith.constant dense<0.000000e+00> : vector<9x16xf32>
    %231 = tpu.matmul %221, %230, %cst_156 {dimension_numbers = #tpu.dot_dimension_numbers<[1], [0], [0], [1], [0, 0, 1, 1], [], []>} : vector<9x32xf32>, vector<32x16xf32>, vector<9x16xf32> -> vector<9x16xf32>
    %c1_157 = arith.constant 1 : index
    %c0_158 = arith.constant 0 : index
    %c0_159 = arith.constant 0 : index
    %c0_160 = arith.constant 0 : index
    %232 = vector.load %arg12[%c1_157, %c0_158, %c0_159, %c0_160] : memref<2x2x1x16xf32, #tpu.memory_space<vmem>>, vector<1x1x1x16xf32>
    %233 = vector.shape_cast %232 : vector<1x1x1x16xf32> to vector<1x16xf32>
    %234 = vector.broadcast %233 : vector<1x16xf32> to vector<9x16xf32>
    %235 = arith.addf %231, %234 : vector<9x16xf32>
    %c1_161 = arith.constant 1 : index
    %c0_162 = arith.constant 0 : index
    %c0_163 = arith.constant 0 : index
    %c0_164 = arith.constant 0 : index
    %236 = vector.load %arg10[%c1_161, %c0_162, %c0_163, %c0_164] : memref<2x2x32x16xf32, #tpu.memory_space<vmem>>, vector<1x1x32x16xf32>
    %237 = vector.shape_cast %236 : vector<1x1x32x16xf32> to vector<32x16xf32>
    %cst_165 = arith.constant dense<0.000000e+00> : vector<9x16xf32>
    %238 = tpu.matmul %221, %237, %cst_165 {dimension_numbers = #tpu.dot_dimension_numbers<[1], [0], [0], [1], [0, 0, 1, 1], [], []>} : vector<9x32xf32>, vector<32x16xf32>, vector<9x16xf32> -> vector<9x16xf32>
    %c1_166 = arith.constant 1 : index
    %c0_167 = arith.constant 0 : index
    %c0_168 = arith.constant 0 : index
    %c0_169 = arith.constant 0 : index
    %239 = vector.load %arg13[%c1_166, %c0_167, %c0_168, %c0_169] : memref<2x2x1x16xf32, #tpu.memory_space<vmem>>, vector<1x1x1x16xf32>
    %240 = vector.shape_cast %239 : vector<1x1x1x16xf32> to vector<1x16xf32>
    %241 = vector.broadcast %240 : vector<1x16xf32> to vector<9x16xf32>
    %242 = arith.addf %238, %241 : vector<9x16xf32>
    %243 = tpu.transpose %235, [1, 0] : vector<9x16xf32> -> vector<16x9xf32>
    %cst_170 = arith.constant dense<0.000000e+00> : vector<9x9xf32>
    %244 = tpu.matmul %228, %243, %cst_170 {dimension_numbers = #tpu.dot_dimension_numbers<[1], [0], [0], [1], [0, 0, 1, 1], [], []>} : vector<9x16xf32>, vector<16x9xf32>, vector<9x9xf32> -> vector<9x9xf32>
    %cst_171 = arith.constant 2.500000e-01 : f32
    %245 = vector.broadcast %cst_171 : f32 to vector<9x9xf32>
    %246 = arith.mulf %244, %245 : vector<9x9xf32>
    %cst_172 = arith.constant dense<0xFF800000> : vector<9xf32>
    %247 = vector.multi_reduction <maximumf>, %246, %cst_172 [1] : vector<9x9xf32> to vector<9xf32>
    %248 = vector.shape_cast %247 : vector<9xf32> to vector<9x1xf32>
    %249 = vector.broadcast %248 : vector<9x1xf32> to vector<9x9xf32>
    %250 = arith.subf %246, %249 : vector<9x9xf32>
    %251 = math.exp %250 : vector<9x9xf32>
    %cst_173 = arith.constant dense<0.000000e+00> : vector<9xf32>
    %252 = vector.multi_reduction <add>, %251, %cst_173 [1] : vector<9x9xf32> to vector<9xf32>
    %253 = vector.shape_cast %252 : vector<9xf32> to vector<9x1xf32>
    %254 = vector.broadcast %253 : vector<9x1xf32> to vector<9x9xf32>
    %255 = arith.divf %251, %254 : vector<9x9xf32>
    %cst_174 = arith.constant dense<0.000000e+00> : vector<9x16xf32>
    %256 = tpu.matmul %255, %242, %cst_174 {dimension_numbers = #tpu.dot_dimension_numbers<[1], [0], [0], [1], [0, 0, 1, 1], [], []>} : vector<9x9xf32>, vector<9x16xf32>, vector<9x16xf32> -> vector<9x16xf32>
    %c1_175 = arith.constant 1 : index
    %c0_176 = arith.constant 0 : index
    %c0_177 = arith.constant 0 : index
    %c0_178 = arith.constant 0 : index
    %257 = vector.load %arg14[%c1_175, %c0_176, %c0_177, %c0_178] : memref<2x2x16x32xf32, #tpu.memory_space<vmem>>, vector<1x1x16x32xf32>
    %258 = vector.shape_cast %257 : vector<1x1x16x32xf32> to vector<16x32xf32>
    %cst_179 = arith.constant dense<0.000000e+00> : vector<9x32xf32>
    %259 = tpu.matmul %256, %258, %cst_179 {dimension_numbers = #tpu.dot_dimension_numbers<[1], [0], [0], [1], [0, 0, 1, 1], [], []>} : vector<9x16xf32>, vector<16x32xf32>, vector<9x32xf32> -> vector<9x32xf32>
    %c1_180 = arith.constant 1 : index
    %c1_181 = arith.constant 1 : index
    %c0_182 = arith.constant 0 : index
    %c0_183 = arith.constant 0 : index
    %260 = vector.load %arg8[%c1_180, %c1_181, %c0_182, %c0_183] : memref<2x2x32x16xf32, #tpu.memory_space<vmem>>, vector<1x1x32x16xf32>
    %261 = vector.shape_cast %260 : vector<1x1x32x16xf32> to vector<32x16xf32>
    %cst_184 = arith.constant dense<0.000000e+00> : vector<9x16xf32>
    %262 = tpu.matmul %221, %261, %cst_184 {dimension_numbers = #tpu.dot_dimension_numbers<[1], [0], [0], [1], [0, 0, 1, 1], [], []>} : vector<9x32xf32>, vector<32x16xf32>, vector<9x16xf32> -> vector<9x16xf32>
    %c1_185 = arith.constant 1 : index
    %c1_186 = arith.constant 1 : index
    %c0_187 = arith.constant 0 : index
    %c0_188 = arith.constant 0 : index
    %263 = vector.load %arg11[%c1_185, %c1_186, %c0_187, %c0_188] : memref<2x2x1x16xf32, #tpu.memory_space<vmem>>, vector<1x1x1x16xf32>
    %264 = vector.shape_cast %263 : vector<1x1x1x16xf32> to vector<1x16xf32>
    %265 = vector.broadcast %264 : vector<1x16xf32> to vector<9x16xf32>
    %266 = arith.addf %262, %265 : vector<9x16xf32>
    %c1_189 = arith.constant 1 : index
    %c1_190 = arith.constant 1 : index
    %c0_191 = arith.constant 0 : index
    %c0_192 = arith.constant 0 : index
    %267 = vector.load %arg9[%c1_189, %c1_190, %c0_191, %c0_192] : memref<2x2x32x16xf32, #tpu.memory_space<vmem>>, vector<1x1x32x16xf32>
    %268 = vector.shape_cast %267 : vector<1x1x32x16xf32> to vector<32x16xf32>
    %cst_193 = arith.constant dense<0.000000e+00> : vector<9x16xf32>
    %269 = tpu.matmul %221, %268, %cst_193 {dimension_numbers = #tpu.dot_dimension_numbers<[1], [0], [0], [1], [0, 0, 1, 1], [], []>} : vector<9x32xf32>, vector<32x16xf32>, vector<9x16xf32> -> vector<9x16xf32>
    %c1_194 = arith.constant 1 : index
    %c1_195 = arith.constant 1 : index
    %c0_196 = arith.constant 0 : index
    %c0_197 = arith.constant 0 : index
    %270 = vector.load %arg12[%c1_194, %c1_195, %c0_196, %c0_197] : memref<2x2x1x16xf32, #tpu.memory_space<vmem>>, vector<1x1x1x16xf32>
    %271 = vector.shape_cast %270 : vector<1x1x1x16xf32> to vector<1x16xf32>
    %272 = vector.broadcast %271 : vector<1x16xf32> to vector<9x16xf32>
    %273 = arith.addf %269, %272 : vector<9x16xf32>
    %c1_198 = arith.constant 1 : index
    %c1_199 = arith.constant 1 : index
    %c0_200 = arith.constant 0 : index
    %c0_201 = arith.constant 0 : index
    %274 = vector.load %arg10[%c1_198, %c1_199, %c0_200, %c0_201] : memref<2x2x32x16xf32, #tpu.memory_space<vmem>>, vector<1x1x32x16xf32>
    %275 = vector.shape_cast %274 : vector<1x1x32x16xf32> to vector<32x16xf32>
    %cst_202 = arith.constant dense<0.000000e+00> : vector<9x16xf32>
    %276 = tpu.matmul %221, %275, %cst_202 {dimension_numbers = #tpu.dot_dimension_numbers<[1], [0], [0], [1], [0, 0, 1, 1], [], []>} : vector<9x32xf32>, vector<32x16xf32>, vector<9x16xf32> -> vector<9x16xf32>
    %c1_203 = arith.constant 1 : index
    %c1_204 = arith.constant 1 : index
    %c0_205 = arith.constant 0 : index
    %c0_206 = arith.constant 0 : index
    %277 = vector.load %arg13[%c1_203, %c1_204, %c0_205, %c0_206] : memref<2x2x1x16xf32, #tpu.memory_space<vmem>>, vector<1x1x1x16xf32>
    %278 = vector.shape_cast %277 : vector<1x1x1x16xf32> to vector<1x16xf32>
    %279 = vector.broadcast %278 : vector<1x16xf32> to vector<9x16xf32>
    %280 = arith.addf %276, %279 : vector<9x16xf32>
    %281 = tpu.transpose %273, [1, 0] : vector<9x16xf32> -> vector<16x9xf32>
    %cst_207 = arith.constant dense<0.000000e+00> : vector<9x9xf32>
    %282 = tpu.matmul %266, %281, %cst_207 {dimension_numbers = #tpu.dot_dimension_numbers<[1], [0], [0], [1], [0, 0, 1, 1], [], []>} : vector<9x16xf32>, vector<16x9xf32>, vector<9x9xf32> -> vector<9x9xf32>
    %cst_208 = arith.constant 2.500000e-01 : f32
    %283 = vector.broadcast %cst_208 : f32 to vector<9x9xf32>
    %284 = arith.mulf %282, %283 : vector<9x9xf32>
    %cst_209 = arith.constant dense<0xFF800000> : vector<9xf32>
    %285 = vector.multi_reduction <maximumf>, %284, %cst_209 [1] : vector<9x9xf32> to vector<9xf32>
    %286 = vector.shape_cast %285 : vector<9xf32> to vector<9x1xf32>
    %287 = vector.broadcast %286 : vector<9x1xf32> to vector<9x9xf32>
    %288 = arith.subf %284, %287 : vector<9x9xf32>
    %289 = math.exp %288 : vector<9x9xf32>
    %cst_210 = arith.constant dense<0.000000e+00> : vector<9xf32>
    %290 = vector.multi_reduction <add>, %289, %cst_210 [1] : vector<9x9xf32> to vector<9xf32>
    %291 = vector.shape_cast %290 : vector<9xf32> to vector<9x1xf32>
    %292 = vector.broadcast %291 : vector<9x1xf32> to vector<9x9xf32>
    %293 = arith.divf %289, %292 : vector<9x9xf32>
    %cst_211 = arith.constant dense<0.000000e+00> : vector<9x16xf32>
    %294 = tpu.matmul %293, %280, %cst_211 {dimension_numbers = #tpu.dot_dimension_numbers<[1], [0], [0], [1], [0, 0, 1, 1], [], []>} : vector<9x9xf32>, vector<9x16xf32>, vector<9x16xf32> -> vector<9x16xf32>
    %c1_212 = arith.constant 1 : index
    %c1_213 = arith.constant 1 : index
    %c0_214 = arith.constant 0 : index
    %c0_215 = arith.constant 0 : index
    %295 = vector.load %arg14[%c1_212, %c1_213, %c0_214, %c0_215] : memref<2x2x16x32xf32, #tpu.memory_space<vmem>>, vector<1x1x16x32xf32>
    %296 = vector.shape_cast %295 : vector<1x1x16x32xf32> to vector<16x32xf32>
    %cst_216 = arith.constant dense<0.000000e+00> : vector<9x32xf32>
    %297 = tpu.matmul %294, %296, %cst_216 {dimension_numbers = #tpu.dot_dimension_numbers<[1], [0], [0], [1], [0, 0, 1, 1], [], []>} : vector<9x16xf32>, vector<16x32xf32>, vector<9x32xf32> -> vector<9x32xf32>
    %298 = arith.addf %259, %297 : vector<9x32xf32>
    %299 = arith.addf %195, %298 : vector<9x32xf32>
    %c1_217 = arith.constant 1 : index
    %c0_218 = arith.constant 0 : index
    %c0_219 = arith.constant 0 : index
    %300 = vector.load %arg15[%c1_217, %c0_218, %c0_219] : memref<2x1x32xf32, #tpu.memory_space<vmem>>, vector<1x1x32xf32>
    %301 = vector.shape_cast %300 : vector<1x1x32xf32> to vector<1x32xf32>
    %302 = vector.broadcast %301 : vector<1x32xf32> to vector<9x32xf32>
    %303 = arith.addf %299, %302 : vector<9x32xf32>
    %c1_220 = arith.constant 1 : index
    %c0_221 = arith.constant 0 : index
    %c0_222 = arith.constant 0 : index
    %304 = vector.load %arg16[%c1_220, %c0_221, %c0_222] : memref<2x1x32xf32, #tpu.memory_space<vmem>>, vector<1x1x32xf32>
    %305 = vector.shape_cast %304 : vector<1x1x32xf32> to vector<1x32xf32>
    %c1_223 = arith.constant 1 : index
    %c0_224 = arith.constant 0 : index
    %c0_225 = arith.constant 0 : index
    %306 = vector.load %arg17[%c1_223, %c0_224, %c0_225] : memref<2x1x32xf32, #tpu.memory_space<vmem>>, vector<1x1x32xf32>
    %307 = vector.shape_cast %306 : vector<1x1x32xf32> to vector<1x32xf32>
    %cst_226 = arith.constant dense<0.000000e+00> : vector<9xf32>
    %308 = vector.multi_reduction <add>, %303, %cst_226 [1] : vector<9x32xf32> to vector<9xf32>
    %309 = vector.shape_cast %308 : vector<9xf32> to vector<9x1xf32>
    %cst_227 = arith.constant 3.200000e+01 : f32
    %310 = vector.broadcast %cst_227 : f32 to vector<9x1xf32>
    %311 = arith.divf %309, %310 : vector<9x1xf32>
    %312 = vector.broadcast %311 : vector<9x1xf32> to vector<9x32xf32>
    %313 = arith.subf %303, %312 : vector<9x32xf32>
    %314 = arith.mulf %313, %313 : vector<9x32xf32>
    %cst_228 = arith.constant dense<0.000000e+00> : vector<9xf32>
    %315 = vector.multi_reduction <add>, %314, %cst_228 [1] : vector<9x32xf32> to vector<9xf32>
    %316 = vector.shape_cast %315 : vector<9xf32> to vector<9x1xf32>
    %cst_229 = arith.constant 3.200000e+01 : f32
    %317 = vector.broadcast %cst_229 : f32 to vector<9x1xf32>
    %318 = arith.divf %316, %317 : vector<9x1xf32>
    %319 = vector.broadcast %311 : vector<9x1xf32> to vector<9x32xf32>
    %320 = arith.subf %303, %319 : vector<9x32xf32>
    %cst_230 = arith.constant 9.99999974E-6 : f32
    %321 = vector.broadcast %cst_230 : f32 to vector<9x1xf32>
    %322 = arith.addf %318, %321 : vector<9x1xf32>
    %323 = math.rsqrt %322 : vector<9x1xf32>
    %324 = vector.broadcast %323 : vector<9x1xf32> to vector<9x32xf32>
    %325 = arith.mulf %320, %324 : vector<9x32xf32>
    %326 = vector.broadcast %305 : vector<1x32xf32> to vector<9x32xf32>
    %327 = arith.mulf %325, %326 : vector<9x32xf32>
    %328 = vector.broadcast %307 : vector<1x32xf32> to vector<9x32xf32>
    %329 = arith.addf %327, %328 : vector<9x32xf32>
    %c1_231 = arith.constant 1 : index
    %c0_232 = arith.constant 0 : index
    %c0_233 = arith.constant 0 : index
    %330 = vector.load %arg18[%c1_231, %c0_232, %c0_233] : memref<2x32x128xf32, #tpu.memory_space<vmem>>, vector<1x32x128xf32>
    %331 = vector.shape_cast %330 : vector<1x32x128xf32> to vector<32x128xf32>
    %cst_234 = arith.constant dense<0.000000e+00> : vector<9x128xf32>
    %332 = tpu.matmul %329, %331, %cst_234 {dimension_numbers = #tpu.dot_dimension_numbers<[1], [0], [0], [1], [0, 0, 1, 1], [], []>} : vector<9x32xf32>, vector<32x128xf32>, vector<9x128xf32> -> vector<9x128xf32>
    %c1_235 = arith.constant 1 : index
    %c0_236 = arith.constant 0 : index
    %c0_237 = arith.constant 0 : index
    %333 = vector.load %arg19[%c1_235, %c0_236, %c0_237] : memref<2x1x128xf32, #tpu.memory_space<vmem>>, vector<1x1x128xf32>
    %334 = vector.shape_cast %333 : vector<1x1x128xf32> to vector<1x128xf32>
    %335 = vector.broadcast %334 : vector<1x128xf32> to vector<9x128xf32>
    %336 = arith.addf %332, %335 : vector<9x128xf32>
    %cst_238 = arith.constant 1.702000e+00 : f32
    %337 = vector.broadcast %cst_238 : f32 to vector<9x128xf32>
    %338 = arith.mulf %337, %336 : vector<9x128xf32>
    %339 = arith.negf %338 : vector<9x128xf32>
    %340 = math.exp %339 : vector<9x128xf32>
    %cst_239 = arith.constant 1.000000e+00 : f32
    %341 = vector.broadcast %cst_239 : f32 to vector<9x128xf32>
    %342 = arith.addf %341, %340 : vector<9x128xf32>
    %343 = arith.divf %341, %342 : vector<9x128xf32>
    %344 = arith.mulf %336, %343 : vector<9x128xf32>
    %c1_240 = arith.constant 1 : index
    %c0_241 = arith.constant 0 : index
    %c0_242 = arith.constant 0 : index
    %345 = vector.load %arg20[%c1_240, %c0_241, %c0_242] : memref<2x128x32xf32, #tpu.memory_space<vmem>>, vector<1x128x32xf32>
    %346 = vector.shape_cast %345 : vector<1x128x32xf32> to vector<128x32xf32>
    %cst_243 = arith.constant dense<0.000000e+00> : vector<9x32xf32>
    %347 = tpu.matmul %344, %346, %cst_243 {dimension_numbers = #tpu.dot_dimension_numbers<[1], [0], [0], [1], [0, 0, 1, 1], [], []>} : vector<9x128xf32>, vector<128x32xf32>, vector<9x32xf32> -> vector<9x32xf32>
    %c1_244 = arith.constant 1 : index
    %c0_245 = arith.constant 0 : index
    %c0_246 = arith.constant 0 : index
    %348 = vector.load %arg21[%c1_244, %c0_245, %c0_246] : memref<2x1x32xf32, #tpu.memory_space<vmem>>, vector<1x1x32xf32>
    %349 = vector.shape_cast %348 : vector<1x1x32xf32> to vector<1x32xf32>
    %350 = vector.broadcast %349 : vector<1x32xf32> to vector<9x32xf32>
    %351 = arith.addf %347, %350 : vector<9x32xf32>
    %352 = arith.addf %303, %351 : vector<9x32xf32>
    %353 = vector.extract_strided_slice %352 {offsets = [0, 0], sizes = [1, 32], strides = [1, 1]} : vector<9x32xf32> to vector<1x32xf32>
    %c0_247 = arith.constant 0 : index
    %c0_248 = arith.constant 0 : index
    %354 = vector.load %arg22[%c0_247, %c0_248] : memref<1x32xf32, #tpu.memory_space<vmem>>, vector<1x32xf32>
    %c0_249 = arith.constant 0 : index
    %c0_250 = arith.constant 0 : index
    %355 = vector.load %arg23[%c0_249, %c0_250] : memref<1x32xf32, #tpu.memory_space<vmem>>, vector<1x32xf32>
    %cst_251 = arith.constant dense<0.000000e+00> : vector<1xf32>
    %356 = vector.multi_reduction <add>, %353, %cst_251 [1] : vector<1x32xf32> to vector<1xf32>
    %357 = vector.shape_cast %356 : vector<1xf32> to vector<1x1xf32>
    %cst_252 = arith.constant 3.200000e+01 : f32
    %358 = vector.broadcast %cst_252 : f32 to vector<1x1xf32>
    %359 = arith.divf %357, %358 : vector<1x1xf32>
    %360 = vector.broadcast %359 : vector<1x1xf32> to vector<1x32xf32>
    %361 = arith.subf %353, %360 : vector<1x32xf32>
    %362 = arith.mulf %361, %361 : vector<1x32xf32>
    %cst_253 = arith.constant dense<0.000000e+00> : vector<1xf32>
    %363 = vector.multi_reduction <add>, %362, %cst_253 [1] : vector<1x32xf32> to vector<1xf32>
    %364 = vector.shape_cast %363 : vector<1xf32> to vector<1x1xf32>
    %cst_254 = arith.constant 3.200000e+01 : f32
    %365 = vector.broadcast %cst_254 : f32 to vector<1x1xf32>
    %366 = arith.divf %364, %365 : vector<1x1xf32>
    %367 = vector.broadcast %359 : vector<1x1xf32> to vector<1x32xf32>
    %368 = arith.subf %353, %367 : vector<1x32xf32>
    %cst_255 = arith.constant 9.99999974E-6 : f32
    %369 = vector.broadcast %cst_255 : f32 to vector<1x1xf32>
    %370 = arith.addf %366, %369 : vector<1x1xf32>
    %371 = math.rsqrt %370 : vector<1x1xf32>
    %372 = vector.broadcast %371 : vector<1x1xf32> to vector<1x32xf32>
    %373 = arith.mulf %368, %372 : vector<1x32xf32>
    %374 = arith.mulf %373, %354 : vector<1x32xf32>
    %375 = arith.addf %374, %355 : vector<1x32xf32>
    %c0_256 = arith.constant 0 : index
    %c0_257 = arith.constant 0 : index
    %376 = vector.load %arg24[%c0_256, %c0_257] : memref<32x32xf32, #tpu.memory_space<vmem>>, vector<32x32xf32>
    %cst_258 = arith.constant dense<0.000000e+00> : vector<1x32xf32>
    %377 = tpu.matmul %375, %376, %cst_258 {dimension_numbers = #tpu.dot_dimension_numbers<[1], [0], [0], [1], [0, 0, 1, 1], [], []>} : vector<1x32xf32>, vector<32x32xf32>, vector<1x32xf32> -> vector<1x32xf32>
    %378 = arith.mulf %377, %377 : vector<1x32xf32>
    %cst_259 = arith.constant dense<0.000000e+00> : vector<1xf32>
    %379 = vector.multi_reduction <add>, %378, %cst_259 [1] : vector<1x32xf32> to vector<1xf32>
    %380 = vector.shape_cast %379 : vector<1xf32> to vector<1x1xf32>
    %381 = math.rsqrt %380 : vector<1x1xf32>
    %382 = vector.broadcast %381 : vector<1x1xf32> to vector<1x32xf32>
    %383 = arith.mulf %377, %382 : vector<1x32xf32>
    %c0_260 = arith.constant 0 : index
    %c0_261 = arith.constant 0 : index
    %c0_262 = arith.constant 0 : index
    %384 = vector.load %arg25[%c0_260, %c0_261, %c0_262] : memref<1x1x32xf32, #tpu.memory_space<vmem>>, vector<1x1x32xf32>
    %385 = vector.shape_cast %384 : vector<1x1x32xf32> to vector<1x32xf32>
    %386 = vector.shape_cast %383 : vector<1x32xf32> to vector<1x1x32xf32>
    tpu.vector_store %arg25[%c0_260, %c0_261, %c0_262], %386 {strides = array<i32>} : memref<1x1x32xf32, #tpu.memory_space<vmem>>, vector<1x1x32xf32>,
    return
  }
  func.func @transform_0(%arg0: i32) -> (i32, i32, i32) {
    %c0_i32 = arith.constant 0 : i32
    %c0_i32_0 = arith.constant 0 : i32
    %c0_i32_1 = arith.constant 0 : i32
    return %arg0, %c0_i32, %c0_i32_0 : i32, i32, i32
  }
  func.func @transform_1(%arg0: i32) -> (i32, i32) {
    %c0_i32 = arith.constant 0 : i32
    %c0_i32_0 = arith.constant 0 : i32
    %c0_i32_1 = arith.constant 0 : i32
    return %c0_i32, %c0_i32_0 : i32, i32
  }
  func.func @transform_2(%arg0: i32) -> (i32, i32) {
    %c0_i32 = arith.constant 0 : i32
    %c0_i32_0 = arith.constant 0 : i32
    %c0_i32_1 = arith.constant 0 : i32
    return %c0_i32, %c0_i32_0 : i32, i32
  }
  func.func @transform_3(%arg0: i32) -> (i32, i32) {
    %c0_i32 = arith.constant 0 : i32
    %c0_i32_0 = arith.constant 0 : i32
    %c0_i32_1 = arith.constant 0 : i32
    return %c0_i32, %c0_i32_0 : i32, i32
  }
  func.func @transform_4(%arg0: i32) -> (i32, i32) {
    %c0_i32 = arith.constant 0 : i32
    %c0_i32_0 = arith.constant 0 : i32
    %c0_i32_1 = arith.constant 0 : i32
    return %c0_i32, %c0_i32_0 : i32, i32
  }
  func.func @transform_5(%arg0: i32) -> (i32, i32, i32) {
    %c0_i32 = arith.constant 0 : i32
    %c0_i32_0 = arith.constant 0 : i32
    %c0_i32_1 = arith.constant 0 : i32
    %c0_i32_2 = arith.constant 0 : i32
    return %c0_i32, %c0_i32_0, %c0_i32_1 : i32, i32, i32
  }
  func.func @transform_6(%arg0: i32) -> (i32, i32, i32) {
    %c0_i32 = arith.constant 0 : i32
    %c0_i32_0 = arith.constant 0 : i32
    %c0_i32_1 = arith.constant 0 : i32
    %c0_i32_2 = arith.constant 0 : i32
    return %c0_i32, %c0_i32_0, %c0_i32_1 : i32, i32, i32
  }
  func.func @transform_7(%arg0: i32) -> (i32, i32, i32, i32) {
    %c0_i32 = arith.constant 0 : i32
    %c0_i32_0 = arith.constant 0 : i32
    %c0_i32_1 = arith.constant 0 : i32
    %c0_i32_2 = arith.constant 0 : i32
    %c0_i32_3 = arith.constant 0 : i32
    return %c0_i32, %c0_i32_0, %c0_i32_1, %c0_i32_2 : i32, i32, i32, i32
  }
  func.func @transform_8(%arg0: i32) -> (i32, i32, i32, i32) {
    %c0_i32 = arith.constant 0 : i32
    %c0_i32_0 = arith.constant 0 : i32
    %c0_i32_1 = arith.constant 0 : i32
    %c0_i32_2 = arith.constant 0 : i32
    %c0_i32_3 = arith.constant 0 : i32
    return %c0_i32, %c0_i32_0, %c0_i32_1, %c0_i32_2 : i32, i32, i32, i32
  }
  func.func @transform_9(%arg0: i32) -> (i32, i32, i32, i32) {
    %c0_i32 = arith.constant 0 : i32
    %c0_i32_0 = arith.constant 0 : i32
    %c0_i32_1 = arith.constant 0 : i32
    %c0_i32_2 = arith.constant 0 : i32
    %c0_i32_3 = arith.constant 0 : i32
    return %c0_i32, %c0_i32_0, %c0_i32_1, %c0_i32_2 : i32, i32, i32, i32
  }
  func.func @transform_10(%arg0: i32) -> (i32, i32, i32, i32) {
    %c0_i32 = arith.constant 0 : i32
    %c0_i32_0 = arith.constant 0 : i32
    %c0_i32_1 = arith.constant 0 : i32
    %c0_i32_2 = arith.constant 0 : i32
    %c0_i32_3 = arith.constant 0 : i32
    return %c0_i32, %c0_i32_0, %c0_i32_1, %c0_i32_2 : i32, i32, i32, i32
  }
  func.func @transform_11(%arg0: i32) -> (i32, i32, i32, i32) {
    %c0_i32 = arith.constant 0 : i32
    %c0_i32_0 = arith.constant 0 : i32
    %c0_i32_1 = arith.constant 0 : i32
    %c0_i32_2 = arith.constant 0 : i32
    %c0_i32_3 = arith.constant 0 : i32
    return %c0_i32, %c0_i32_0, %c0_i32_1, %c0_i32_2 : i32, i32, i32, i32
  }
  func.func @transform_12(%arg0: i32) -> (i32, i32, i32, i32) {
    %c0_i32 = arith.constant 0 : i32
    %c0_i32_0 = arith.constant 0 : i32
    %c0_i32_1 = arith.constant 0 : i32
    %c0_i32_2 = arith.constant 0 : i32
    %c0_i32_3 = arith.constant 0 : i32
    return %c0_i32, %c0_i32_0, %c0_i32_1, %c0_i32_2 : i32, i32, i32, i32
  }
  func.func @transform_13(%arg0: i32) -> (i32, i32, i32, i32) {
    %c0_i32 = arith.constant 0 : i32
    %c0_i32_0 = arith.constant 0 : i32
    %c0_i32_1 = arith.constant 0 : i32
    %c0_i32_2 = arith.constant 0 : i32
    %c0_i32_3 = arith.constant 0 : i32
    return %c0_i32, %c0_i32_0, %c0_i32_1, %c0_i32_2 : i32, i32, i32, i32
  }
  func.func @transform_14(%arg0: i32) -> (i32, i32, i32) {
    %c0_i32 = arith.constant 0 : i32
    %c0_i32_0 = arith.constant 0 : i32
    %c0_i32_1 = arith.constant 0 : i32
    %c0_i32_2 = arith.constant 0 : i32
    return %c0_i32, %c0_i32_0, %c0_i32_1 : i32, i32, i32
  }
  func.func @transform_15(%arg0: i32) -> (i32, i32, i32) {
    %c0_i32 = arith.constant 0 : i32
    %c0_i32_0 = arith.constant 0 : i32
    %c0_i32_1 = arith.constant 0 : i32
    %c0_i32_2 = arith.constant 0 : i32
    return %c0_i32, %c0_i32_0, %c0_i32_1 : i32, i32, i32
  }
  func.func @transform_16(%arg0: i32) -> (i32, i32, i32) {
    %c0_i32 = arith.constant 0 : i32
    %c0_i32_0 = arith.constant 0 : i32
    %c0_i32_1 = arith.constant 0 : i32
    %c0_i32_2 = arith.constant 0 : i32
    return %c0_i32, %c0_i32_0, %c0_i32_1 : i32, i32, i32
  }
  func.func @transform_17(%arg0: i32) -> (i32, i32, i32) {
    %c0_i32 = arith.constant 0 : i32
    %c0_i32_0 = arith.constant 0 : i32
    %c0_i32_1 = arith.constant 0 : i32
    %c0_i32_2 = arith.constant 0 : i32
    return %c0_i32, %c0_i32_0, %c0_i32_1 : i32, i32, i32
  }
  func.func @transform_18(%arg0: i32) -> (i32, i32, i32) {
    %c0_i32 = arith.constant 0 : i32
    %c0_i32_0 = arith.constant 0 : i32
    %c0_i32_1 = arith.constant 0 : i32
    %c0_i32_2 = arith.constant 0 : i32
    return %c0_i32, %c0_i32_0, %c0_i32_1 : i32, i32, i32
  }
  func.func @transform_19(%arg0: i32) -> (i32, i32, i32) {
    %c0_i32 = arith.constant 0 : i32
    %c0_i32_0 = arith.constant 0 : i32
    %c0_i32_1 = arith.constant 0 : i32
    %c0_i32_2 = arith.constant 0 : i32
    return %c0_i32, %c0_i32_0, %c0_i32_1 : i32, i32, i32
  }
  func.func @transform_20(%arg0: i32) -> (i32, i32, i32) {
    %c0_i32 = arith.constant 0 : i32
    %c0_i32_0 = arith.constant 0 : i32
    %c0_i32_1 = arith.constant 0 : i32
    %c0_i32_2 = arith.constant 0 : i32
    return %c0_i32, %c0_i32_0, %c0_i32_1 : i32, i32, i32
  }
  func.func @transform_21(%arg0: i32) -> (i32, i32) {
    %c0_i32 = arith.constant 0 : i32
    %c0_i32_0 = arith.constant 0 : i32
    %c0_i32_1 = arith.constant 0 : i32
    return %c0_i32, %c0_i32_0 : i32, i32
  }
  func.func @transform_22(%arg0: i32) -> (i32, i32) {
    %c0_i32 = arith.constant 0 : i32
    %c0_i32_0 = arith.constant 0 : i32
    %c0_i32_1 = arith.constant 0 : i32
    return %c0_i32, %c0_i32_0 : i32, i32
  }
  func.func @transform_23(%arg0: i32) -> (i32, i32) {
    %c0_i32 = arith.constant 0 : i32
    %c0_i32_0 = arith.constant 0 : i32
    %c0_i32_1 = arith.constant 0 : i32
    return %c0_i32, %c0_i32_0 : i32, i32
  }
  func.func @transform_24(%arg0: i32) -> (i32, i32, i32) {
    %c0_i32 = arith.constant 0 : i32
    %c0_i32_0 = arith.constant 0 : i32
    %c0_i32_1 = arith.constant 0 : i32
    return %arg0, %c0_i32, %c0_i32_0 : i32, i32, i32
  }
}

module attributes {stable_mosaic.version = 11 : i64} {
  func.func @_text_tower_kernel(%arg0: i32, %arg1: memref<1x8x32xf32, #tpu.memory_space<vmem>>, %arg2: memref<1x1x8xf32, #tpu.memory_space<vmem>>, %arg3: memref<2x1x32xf32, #tpu.memory_space<vmem>>, %arg4: memref<2x1x32xf32, #tpu.memory_space<vmem>>, %arg5: memref<2x2x32x16xf32, #tpu.memory_space<vmem>>, %arg6: memref<2x2x32x16xf32, #tpu.memory_space<vmem>>, %arg7: memref<2x2x32x16xf32, #tpu.memory_space<vmem>>, %arg8: memref<2x2x1x16xf32, #tpu.memory_space<vmem>>, %arg9: memref<2x2x1x16xf32, #tpu.memory_space<vmem>>, %arg10: memref<2x2x1x16xf32, #tpu.memory_space<vmem>>, %arg11: memref<2x2x16x32xf32, #tpu.memory_space<vmem>>, %arg12: memref<2x1x32xf32, #tpu.memory_space<vmem>>, %arg13: memref<2x1x32xf32, #tpu.memory_space<vmem>>, %arg14: memref<2x1x32xf32, #tpu.memory_space<vmem>>, %arg15: memref<2x32x128xf32, #tpu.memory_space<vmem>>, %arg16: memref<2x1x128xf32, #tpu.memory_space<vmem>>, %arg17: memref<2x128x32xf32, #tpu.memory_space<vmem>>, %arg18: memref<2x1x32xf32, #tpu.memory_space<vmem>>, %arg19: memref<1x32xf32, #tpu.memory_space<vmem>>, %arg20: memref<1x32xf32, #tpu.memory_space<vmem>>, %arg21: memref<32x32xf32, #tpu.memory_space<vmem>>, %arg22: memref<1x1x32xf32, #tpu.memory_space<vmem>>) attributes {dimension_semantics = [#tpu.dimension_semantics<arbitrary>], iteration_bounds = array<i64: 2>, scalar_prefetch = 0 : i64, scratch_operands = 0 : i64, tpu.core_type = #tpu.core_type<tc>, window_params = [{transform_indices = @transform_0, window_bounds = array<i64: 1, 8, 32>}, {transform_indices = @transform_1, window_bounds = array<i64: 1, 1, 8>}, {pipeline_mode = #tpu.pipeline_mode<synchronous>, transform_indices = @transform_2, window_bounds = array<i64: 2, 1, 32>}, {pipeline_mode = #tpu.pipeline_mode<synchronous>, transform_indices = @transform_3, window_bounds = array<i64: 2, 1, 32>}, {pipeline_mode = #tpu.pipeline_mode<synchronous>, transform_indices = @transform_4, window_bounds = array<i64: 2, 2, 32, 16>}, {pipeline_mode = #tpu.pipeline_mode<synchronous>, transform_indices = @transform_5, window_bounds = array<i64: 2, 2, 32, 16>}, {pipeline_mode = #tpu.pipeline_mode<synchronous>, transform_indices = @transform_6, window_bounds = array<i64: 2, 2, 32, 16>}, {pipeline_mode = #tpu.pipeline_mode<synchronous>, transform_indices = @transform_7, window_bounds = array<i64: 2, 2, 1, 16>}, {pipeline_mode = #tpu.pipeline_mode<synchronous>, transform_indices = @transform_8, window_bounds = array<i64: 2, 2, 1, 16>}, {pipeline_mode = #tpu.pipeline_mode<synchronous>, transform_indices = @transform_9, window_bounds = array<i64: 2, 2, 1, 16>}, {pipeline_mode = #tpu.pipeline_mode<synchronous>, transform_indices = @transform_10, window_bounds = array<i64: 2, 2, 16, 32>}, {pipeline_mode = #tpu.pipeline_mode<synchronous>, transform_indices = @transform_11, window_bounds = array<i64: 2, 1, 32>}, {pipeline_mode = #tpu.pipeline_mode<synchronous>, transform_indices = @transform_12, window_bounds = array<i64: 2, 1, 32>}, {pipeline_mode = #tpu.pipeline_mode<synchronous>, transform_indices = @transform_13, window_bounds = array<i64: 2, 1, 32>}, {pipeline_mode = #tpu.pipeline_mode<synchronous>, transform_indices = @transform_14, window_bounds = array<i64: 2, 32, 128>}, {pipeline_mode = #tpu.pipeline_mode<synchronous>, transform_indices = @transform_15, window_bounds = array<i64: 2, 1, 128>}, {pipeline_mode = #tpu.pipeline_mode<synchronous>, transform_indices = @transform_16, window_bounds = array<i64: 2, 128, 32>}, {pipeline_mode = #tpu.pipeline_mode<synchronous>, transform_indices = @transform_17, window_bounds = array<i64: 2, 1, 32>}, {pipeline_mode = #tpu.pipeline_mode<synchronous>, transform_indices = @transform_18, window_bounds = array<i64: 1, 32>}, {pipeline_mode = #tpu.pipeline_mode<synchronous>, transform_indices = @transform_19, window_bounds = array<i64: 1, 32>}, {pipeline_mode = #tpu.pipeline_mode<synchronous>, transform_indices = @transform_20, window_bounds = array<i64: 32, 32>}, {transform_indices = @transform_21, window_bounds = array<i64: 1, 1, 32>}]} {
    %c0 = arith.constant 0 : index
    %c0_0 = arith.constant 0 : index
    %c0_1 = arith.constant 0 : index
    %0 = vector.load %arg1[%c0, %c0_0, %c0_1] : memref<1x8x32xf32, #tpu.memory_space<vmem>>, vector<1x8x32xf32>
    %1 = vector.shape_cast %0 : vector<1x8x32xf32> to vector<8x32xf32>
    %2 = tpu.iota {dimensions = array<i32: 0>} : vector<8x8xi32>
    %3 = tpu.iota {dimensions = array<i32: 1>} : vector<8x8xi32>
    %4 = arith.cmpi sle, %3, %2 : vector<8x8xi32>
    %cst = arith.constant 0.000000e+00 : f32
    %cst_2 = arith.constant -1.000000e+09 : f32
    %5 = vector.broadcast %cst : f32 to vector<8x8xf32>
    %6 = vector.broadcast %cst_2 : f32 to vector<8x8xf32>
    %7 = arith.select %4, %5, %6 : vector<8x8xi1>, vector<8x8xf32>
    %c0_3 = arith.constant 0 : index
    %c0_4 = arith.constant 0 : index
    %c0_5 = arith.constant 0 : index
    %8 = vector.load %arg3[%c0_3, %c0_4, %c0_5] : memref<2x1x32xf32, #tpu.memory_space<vmem>>, vector<1x1x32xf32>
    %9 = vector.shape_cast %8 : vector<1x1x32xf32> to vector<1x32xf32>
    %c0_6 = arith.constant 0 : index
    %c0_7 = arith.constant 0 : index
    %c0_8 = arith.constant 0 : index
    %10 = vector.load %arg4[%c0_6, %c0_7, %c0_8] : memref<2x1x32xf32, #tpu.memory_space<vmem>>, vector<1x1x32xf32>
    %11 = vector.shape_cast %10 : vector<1x1x32xf32> to vector<1x32xf32>
    %cst_9 = arith.constant dense<0.000000e+00> : vector<8xf32>
    %12 = vector.multi_reduction <add>, %1, %cst_9 [1] : vector<8x32xf32> to vector<8xf32>
    %13 = vector.shape_cast %12 : vector<8xf32> to vector<8x1xf32>
    %cst_10 = arith.constant 3.200000e+01 : f32
    %14 = vector.broadcast %cst_10 : f32 to vector<8x1xf32>
    %15 = arith.divf %13, %14 : vector<8x1xf32>
    %16 = vector.broadcast %15 : vector<8x1xf32> to vector<8x32xf32>
    %17 = arith.subf %1, %16 : vector<8x32xf32>
    %18 = arith.mulf %17, %17 : vector<8x32xf32>
    %cst_11 = arith.constant dense<0.000000e+00> : vector<8xf32>
    %19 = vector.multi_reduction <add>, %18, %cst_11 [1] : vector<8x32xf32> to vector<8xf32>
    %20 = vector.shape_cast %19 : vector<8xf32> to vector<8x1xf32>
    %cst_12 = arith.constant 3.200000e+01 : f32
    %21 = vector.broadcast %cst_12 : f32 to vector<8x1xf32>
    %22 = arith.divf %20, %21 : vector<8x1xf32>
    %23 = vector.broadcast %15 : vector<8x1xf32> to vector<8x32xf32>
    %24 = arith.subf %1, %23 : vector<8x32xf32>
    %cst_13 = arith.constant 9.99999974E-6 : f32
    %25 = vector.broadcast %cst_13 : f32 to vector<8x1xf32>
    %26 = arith.addf %22, %25 : vector<8x1xf32>
    %27 = math.rsqrt %26 : vector<8x1xf32>
    %28 = vector.broadcast %27 : vector<8x1xf32> to vector<8x32xf32>
    %29 = arith.mulf %24, %28 : vector<8x32xf32>
    %30 = vector.broadcast %9 : vector<1x32xf32> to vector<8x32xf32>
    %31 = arith.mulf %29, %30 : vector<8x32xf32>
    %32 = vector.broadcast %11 : vector<1x32xf32> to vector<8x32xf32>
    %33 = arith.addf %31, %32 : vector<8x32xf32>
    %c0_14 = arith.constant 0 : index
    %c0_15 = arith.constant 0 : index
    %c0_16 = arith.constant 0 : index
    %c0_17 = arith.constant 0 : index
    %34 = vector.load %arg5[%c0_14, %c0_15, %c0_16, %c0_17] : memref<2x2x32x16xf32, #tpu.memory_space<vmem>>, vector<1x1x32x16xf32>
    %35 = vector.shape_cast %34 : vector<1x1x32x16xf32> to vector<32x16xf32>
    %cst_18 = arith.constant dense<0.000000e+00> : vector<8x16xf32>
    %36 = tpu.matmul %33, %35, %cst_18 {dimension_numbers = #tpu.dot_dimension_numbers<[1], [0], [0], [1], [0, 0, 1, 1], [], []>} : vector<8x32xf32>, vector<32x16xf32>, vector<8x16xf32> -> vector<8x16xf32>
    %c0_19 = arith.constant 0 : index
    %c0_20 = arith.constant 0 : index
    %c0_21 = arith.constant 0 : index
    %c0_22 = arith.constant 0 : index
    %37 = vector.load %arg8[%c0_19, %c0_20, %c0_21, %c0_22] : memref<2x2x1x16xf32, #tpu.memory_space<vmem>>, vector<1x1x1x16xf32>
    %38 = vector.shape_cast %37 : vector<1x1x1x16xf32> to vector<1x16xf32>
    %39 = vector.broadcast %38 : vector<1x16xf32> to vector<8x16xf32>
    %40 = arith.addf %36, %39 : vector<8x16xf32>
    %c0_23 = arith.constant 0 : index
    %c0_24 = arith.constant 0 : index
    %c0_25 = arith.constant 0 : index
    %c0_26 = arith.constant 0 : index
    %41 = vector.load %arg6[%c0_23, %c0_24, %c0_25, %c0_26] : memref<2x2x32x16xf32, #tpu.memory_space<vmem>>, vector<1x1x32x16xf32>
    %42 = vector.shape_cast %41 : vector<1x1x32x16xf32> to vector<32x16xf32>
    %cst_27 = arith.constant dense<0.000000e+00> : vector<8x16xf32>
    %43 = tpu.matmul %33, %42, %cst_27 {dimension_numbers = #tpu.dot_dimension_numbers<[1], [0], [0], [1], [0, 0, 1, 1], [], []>} : vector<8x32xf32>, vector<32x16xf32>, vector<8x16xf32> -> vector<8x16xf32>
    %c0_28 = arith.constant 0 : index
    %c0_29 = arith.constant 0 : index
    %c0_30 = arith.constant 0 : index
    %c0_31 = arith.constant 0 : index
    %44 = vector.load %arg9[%c0_28, %c0_29, %c0_30, %c0_31] : memref<2x2x1x16xf32, #tpu.memory_space<vmem>>, vector<1x1x1x16xf32>
    %45 = vector.shape_cast %44 : vector<1x1x1x16xf32> to vector<1x16xf32>
    %46 = vector.broadcast %45 : vector<1x16xf32> to vector<8x16xf32>
    %47 = arith.addf %43, %46 : vector<8x16xf32>
    %c0_32 = arith.constant 0 : index
    %c0_33 = arith.constant 0 : index
    %c0_34 = arith.constant 0 : index
    %c0_35 = arith.constant 0 : index
    %48 = vector.load %arg7[%c0_32, %c0_33, %c0_34, %c0_35] : memref<2x2x32x16xf32, #tpu.memory_space<vmem>>, vector<1x1x32x16xf32>
    %49 = vector.shape_cast %48 : vector<1x1x32x16xf32> to vector<32x16xf32>
    %cst_36 = arith.constant dense<0.000000e+00> : vector<8x16xf32>
    %50 = tpu.matmul %33, %49, %cst_36 {dimension_numbers = #tpu.dot_dimension_numbers<[1], [0], [0], [1], [0, 0, 1, 1], [], []>} : vector<8x32xf32>, vector<32x16xf32>, vector<8x16xf32> -> vector<8x16xf32>
    %c0_37 = arith.constant 0 : index
    %c0_38 = arith.constant 0 : index
    %c0_39 = arith.constant 0 : index
    %c0_40 = arith.constant 0 : index
    %51 = vector.load %arg10[%c0_37, %c0_38, %c0_39, %c0_40] : memref<2x2x1x16xf32, #tpu.memory_space<vmem>>, vector<1x1x1x16xf32>
    %52 = vector.shape_cast %51 : vector<1x1x1x16xf32> to vector<1x16xf32>
    %53 = vector.broadcast %52 : vector<1x16xf32> to vector<8x16xf32>
    %54 = arith.addf %50, %53 : vector<8x16xf32>
    %55 = tpu.transpose %47, [1, 0] : vector<8x16xf32> -> vector<16x8xf32>
    %cst_41 = arith.constant dense<0.000000e+00> : vector<8x8xf32>
    %56 = tpu.matmul %40, %55, %cst_41 {dimension_numbers = #tpu.dot_dimension_numbers<[1], [0], [0], [1], [0, 0, 1, 1], [], []>} : vector<8x16xf32>, vector<16x8xf32>, vector<8x8xf32> -> vector<8x8xf32>
    %cst_42 = arith.constant 2.500000e-01 : f32
    %57 = vector.broadcast %cst_42 : f32 to vector<8x8xf32>
    %58 = arith.mulf %56, %57 : vector<8x8xf32>
    %59 = arith.addf %58, %7 : vector<8x8xf32>
    %cst_43 = arith.constant dense<0xFF800000> : vector<8xf32>
    %60 = vector.multi_reduction <maximumf>, %59, %cst_43 [1] : vector<8x8xf32> to vector<8xf32>
    %61 = vector.shape_cast %60 : vector<8xf32> to vector<8x1xf32>
    %62 = vector.broadcast %61 : vector<8x1xf32> to vector<8x8xf32>
    %63 = arith.subf %59, %62 : vector<8x8xf32>
    %64 = math.exp %63 : vector<8x8xf32>
    %cst_44 = arith.constant dense<0.000000e+00> : vector<8xf32>
    %65 = vector.multi_reduction <add>, %64, %cst_44 [1] : vector<8x8xf32> to vector<8xf32>
    %66 = vector.shape_cast %65 : vector<8xf32> to vector<8x1xf32>
    %67 = vector.broadcast %66 : vector<8x1xf32> to vector<8x8xf32>
    %68 = arith.divf %64, %67 : vector<8x8xf32>
    %cst_45 = arith.constant dense<0.000000e+00> : vector<8x16xf32>
    %69 = tpu.matmul %68, %54, %cst_45 {dimension_numbers = #tpu.dot_dimension_numbers<[1], [0], [0], [1], [0, 0, 1, 1], [], []>} : vector<8x8xf32>, vector<8x16xf32>, vector<8x16xf32> -> vector<8x16xf32>
    %c0_46 = arith.constant 0 : index
    %c0_47 = arith.constant 0 : index
    %c0_48 = arith.constant 0 : index
    %c0_49 = arith.constant 0 : index
    %70 = vector.load %arg11[%c0_46, %c0_47, %c0_48, %c0_49] : memref<2x2x16x32xf32, #tpu.memory_space<vmem>>, vector<1x1x16x32xf32>
    %71 = vector.shape_cast %70 : vector<1x1x16x32xf32> to vector<16x32xf32>
    %cst_50 = arith.constant dense<0.000000e+00> : vector<8x32xf32>
    %72 = tpu.matmul %69, %71, %cst_50 {dimension_numbers = #tpu.dot_dimension_numbers<[1], [0], [0], [1], [0, 0, 1, 1], [], []>} : vector<8x16xf32>, vector<16x32xf32>, vector<8x32xf32> -> vector<8x32xf32>
    %c0_51 = arith.constant 0 : index
    %c1 = arith.constant 1 : index
    %c0_52 = arith.constant 0 : index
    %c0_53 = arith.constant 0 : index
    %73 = vector.load %arg5[%c0_51, %c1, %c0_52, %c0_53] : memref<2x2x32x16xf32, #tpu.memory_space<vmem>>, vector<1x1x32x16xf32>
    %74 = vector.shape_cast %73 : vector<1x1x32x16xf32> to vector<32x16xf32>
    %cst_54 = arith.constant dense<0.000000e+00> : vector<8x16xf32>
    %75 = tpu.matmul %33, %74, %cst_54 {dimension_numbers = #tpu.dot_dimension_numbers<[1], [0], [0], [1], [0, 0, 1, 1], [], []>} : vector<8x32xf32>, vector<32x16xf32>, vector<8x16xf32> -> vector<8x16xf32>
    %c0_55 = arith.constant 0 : index
    %c1_56 = arith.constant 1 : index
    %c0_57 = arith.constant 0 : index
    %c0_58 = arith.constant 0 : index
    %76 = vector.load %arg8[%c0_55, %c1_56, %c0_57, %c0_58] : memref<2x2x1x16xf32, #tpu.memory_space<vmem>>, vector<1x1x1x16xf32>
    %77 = vector.shape_cast %76 : vector<1x1x1x16xf32> to vector<1x16xf32>
    %78 = vector.broadcast %77 : vector<1x16xf32> to vector<8x16xf32>
    %79 = arith.addf %75, %78 : vector<8x16xf32>
    %c0_59 = arith.constant 0 : index
    %c1_60 = arith.constant 1 : index
    %c0_61 = arith.constant 0 : index
    %c0_62 = arith.constant 0 : index
    %80 = vector.load %arg6[%c0_59, %c1_60, %c0_61, %c0_62] : memref<2x2x32x16xf32, #tpu.memory_space<vmem>>, vector<1x1x32x16xf32>
    %81 = vector.shape_cast %80 : vector<1x1x32x16xf32> to vector<32x16xf32>
    %cst_63 = arith.constant dense<0.000000e+00> : vector<8x16xf32>
    %82 = tpu.matmul %33, %81, %cst_63 {dimension_numbers = #tpu.dot_dimension_numbers<[1], [0], [0], [1], [0, 0, 1, 1], [], []>} : vector<8x32xf32>, vector<32x16xf32>, vector<8x16xf32> -> vector<8x16xf32>
    %c0_64 = arith.constant 0 : index
    %c1_65 = arith.constant 1 : index
    %c0_66 = arith.constant 0 : index
    %c0_67 = arith.constant 0 : index
    %83 = vector.load %arg9[%c0_64, %c1_65, %c0_66, %c0_67] : memref<2x2x1x16xf32, #tpu.memory_space<vmem>>, vector<1x1x1x16xf32>
    %84 = vector.shape_cast %83 : vector<1x1x1x16xf32> to vector<1x16xf32>
    %85 = vector.broadcast %84 : vector<1x16xf32> to vector<8x16xf32>
    %86 = arith.addf %82, %85 : vector<8x16xf32>
    %c0_68 = arith.constant 0 : index
    %c1_69 = arith.constant 1 : index
    %c0_70 = arith.constant 0 : index
    %c0_71 = arith.constant 0 : index
    %87 = vector.load %arg7[%c0_68, %c1_69, %c0_70, %c0_71] : memref<2x2x32x16xf32, #tpu.memory_space<vmem>>, vector<1x1x32x16xf32>
    %88 = vector.shape_cast %87 : vector<1x1x32x16xf32> to vector<32x16xf32>
    %cst_72 = arith.constant dense<0.000000e+00> : vector<8x16xf32>
    %89 = tpu.matmul %33, %88, %cst_72 {dimension_numbers = #tpu.dot_dimension_numbers<[1], [0], [0], [1], [0, 0, 1, 1], [], []>} : vector<8x32xf32>, vector<32x16xf32>, vector<8x16xf32> -> vector<8x16xf32>
    %c0_73 = arith.constant 0 : index
    %c1_74 = arith.constant 1 : index
    %c0_75 = arith.constant 0 : index
    %c0_76 = arith.constant 0 : index
    %90 = vector.load %arg10[%c0_73, %c1_74, %c0_75, %c0_76] : memref<2x2x1x16xf32, #tpu.memory_space<vmem>>, vector<1x1x1x16xf32>
    %91 = vector.shape_cast %90 : vector<1x1x1x16xf32> to vector<1x16xf32>
    %92 = vector.broadcast %91 : vector<1x16xf32> to vector<8x16xf32>
    %93 = arith.addf %89, %92 : vector<8x16xf32>
    %94 = tpu.transpose %86, [1, 0] : vector<8x16xf32> -> vector<16x8xf32>
    %cst_77 = arith.constant dense<0.000000e+00> : vector<8x8xf32>
    %95 = tpu.matmul %79, %94, %cst_77 {dimension_numbers = #tpu.dot_dimension_numbers<[1], [0], [0], [1], [0, 0, 1, 1], [], []>} : vector<8x16xf32>, vector<16x8xf32>, vector<8x8xf32> -> vector<8x8xf32>
    %cst_78 = arith.constant 2.500000e-01 : f32
    %96 = vector.broadcast %cst_78 : f32 to vector<8x8xf32>
    %97 = arith.mulf %95, %96 : vector<8x8xf32>
    %98 = arith.addf %97, %7 : vector<8x8xf32>
    %cst_79 = arith.constant dense<0xFF800000> : vector<8xf32>
    %99 = vector.multi_reduction <maximumf>, %98, %cst_79 [1] : vector<8x8xf32> to vector<8xf32>
    %100 = vector.shape_cast %99 : vector<8xf32> to vector<8x1xf32>
    %101 = vector.broadcast %100 : vector<8x1xf32> to vector<8x8xf32>
    %102 = arith.subf %98, %101 : vector<8x8xf32>
    %103 = math.exp %102 : vector<8x8xf32>
    %cst_80 = arith.constant dense<0.000000e+00> : vector<8xf32>
    %104 = vector.multi_reduction <add>, %103, %cst_80 [1] : vector<8x8xf32> to vector<8xf32>
    %105 = vector.shape_cast %104 : vector<8xf32> to vector<8x1xf32>
    %106 = vector.broadcast %105 : vector<8x1xf32> to vector<8x8xf32>
    %107 = arith.divf %103, %106 : vector<8x8xf32>
    %cst_81 = arith.constant dense<0.000000e+00> : vector<8x16xf32>
    %108 = tpu.matmul %107, %93, %cst_81 {dimension_numbers = #tpu.dot_dimension_numbers<[1], [0], [0], [1], [0, 0, 1, 1], [], []>} : vector<8x8xf32>, vector<8x16xf32>, vector<8x16xf32> -> vector<8x16xf32>
    %c0_82 = arith.constant 0 : index
    %c1_83 = arith.constant 1 : index
    %c0_84 = arith.constant 0 : index
    %c0_85 = arith.constant 0 : index
    %109 = vector.load %arg11[%c0_82, %c1_83, %c0_84, %c0_85] : memref<2x2x16x32xf32, #tpu.memory_space<vmem>>, vector<1x1x16x32xf32>
    %110 = vector.shape_cast %109 : vector<1x1x16x32xf32> to vector<16x32xf32>
    %cst_86 = arith.constant dense<0.000000e+00> : vector<8x32xf32>
    %111 = tpu.matmul %108, %110, %cst_86 {dimension_numbers = #tpu.dot_dimension_numbers<[1], [0], [0], [1], [0, 0, 1, 1], [], []>} : vector<8x16xf32>, vector<16x32xf32>, vector<8x32xf32> -> vector<8x32xf32>
    %112 = arith.addf %72, %111 : vector<8x32xf32>
    %113 = arith.addf %1, %112 : vector<8x32xf32>
    %c0_87 = arith.constant 0 : index
    %c0_88 = arith.constant 0 : index
    %c0_89 = arith.constant 0 : index
    %114 = vector.load %arg12[%c0_87, %c0_88, %c0_89] : memref<2x1x32xf32, #tpu.memory_space<vmem>>, vector<1x1x32xf32>
    %115 = vector.shape_cast %114 : vector<1x1x32xf32> to vector<1x32xf32>
    %116 = vector.broadcast %115 : vector<1x32xf32> to vector<8x32xf32>
    %117 = arith.addf %113, %116 : vector<8x32xf32>
    %c0_90 = arith.constant 0 : index
    %c0_91 = arith.constant 0 : index
    %c0_92 = arith.constant 0 : index
    %118 = vector.load %arg13[%c0_90, %c0_91, %c0_92] : memref<2x1x32xf32, #tpu.memory_space<vmem>>, vector<1x1x32xf32>
    %119 = vector.shape_cast %118 : vector<1x1x32xf32> to vector<1x32xf32>
    %c0_93 = arith.constant 0 : index
    %c0_94 = arith.constant 0 : index
    %c0_95 = arith.constant 0 : index
    %120 = vector.load %arg14[%c0_93, %c0_94, %c0_95] : memref<2x1x32xf32, #tpu.memory_space<vmem>>, vector<1x1x32xf32>
    %121 = vector.shape_cast %120 : vector<1x1x32xf32> to vector<1x32xf32>
    %cst_96 = arith.constant dense<0.000000e+00> : vector<8xf32>
    %122 = vector.multi_reduction <add>, %117, %cst_96 [1] : vector<8x32xf32> to vector<8xf32>
    %123 = vector.shape_cast %122 : vector<8xf32> to vector<8x1xf32>
    %cst_97 = arith.constant 3.200000e+01 : f32
    %124 = vector.broadcast %cst_97 : f32 to vector<8x1xf32>
    %125 = arith.divf %123, %124 : vector<8x1xf32>
    %126 = vector.broadcast %125 : vector<8x1xf32> to vector<8x32xf32>
    %127 = arith.subf %117, %126 : vector<8x32xf32>
    %128 = arith.mulf %127, %127 : vector<8x32xf32>
    %cst_98 = arith.constant dense<0.000000e+00> : vector<8xf32>
    %129 = vector.multi_reduction <add>, %128, %cst_98 [1] : vector<8x32xf32> to vector<8xf32>
    %130 = vector.shape_cast %129 : vector<8xf32> to vector<8x1xf32>
    %cst_99 = arith.constant 3.200000e+01 : f32
    %131 = vector.broadcast %cst_99 : f32 to vector<8x1xf32>
    %132 = arith.divf %130, %131 : vector<8x1xf32>
    %133 = vector.broadcast %125 : vector<8x1xf32> to vector<8x32xf32>
    %134 = arith.subf %117, %133 : vector<8x32xf32>
    %cst_100 = arith.constant 9.99999974E-6 : f32
    %135 = vector.broadcast %cst_100 : f32 to vector<8x1xf32>
    %136 = arith.addf %132, %135 : vector<8x1xf32>
    %137 = math.rsqrt %136 : vector<8x1xf32>
    %138 = vector.broadcast %137 : vector<8x1xf32> to vector<8x32xf32>
    %139 = arith.mulf %134, %138 : vector<8x32xf32>
    %140 = vector.broadcast %119 : vector<1x32xf32> to vector<8x32xf32>
    %141 = arith.mulf %139, %140 : vector<8x32xf32>
    %142 = vector.broadcast %121 : vector<1x32xf32> to vector<8x32xf32>
    %143 = arith.addf %141, %142 : vector<8x32xf32>
    %c0_101 = arith.constant 0 : index
    %c0_102 = arith.constant 0 : index
    %c0_103 = arith.constant 0 : index
    %144 = vector.load %arg15[%c0_101, %c0_102, %c0_103] : memref<2x32x128xf32, #tpu.memory_space<vmem>>, vector<1x32x128xf32>
    %145 = vector.shape_cast %144 : vector<1x32x128xf32> to vector<32x128xf32>
    %cst_104 = arith.constant dense<0.000000e+00> : vector<8x128xf32>
    %146 = tpu.matmul %143, %145, %cst_104 {dimension_numbers = #tpu.dot_dimension_numbers<[1], [0], [0], [1], [0, 0, 1, 1], [], []>} : vector<8x32xf32>, vector<32x128xf32>, vector<8x128xf32> -> vector<8x128xf32>
    %c0_105 = arith.constant 0 : index
    %c0_106 = arith.constant 0 : index
    %c0_107 = arith.constant 0 : index
    %147 = vector.load %arg16[%c0_105, %c0_106, %c0_107] : memref<2x1x128xf32, #tpu.memory_space<vmem>>, vector<1x1x128xf32>
    %148 = vector.shape_cast %147 : vector<1x1x128xf32> to vector<1x128xf32>
    %149 = vector.broadcast %148 : vector<1x128xf32> to vector<8x128xf32>
    %150 = arith.addf %146, %149 : vector<8x128xf32>
    %cst_108 = arith.constant 1.702000e+00 : f32
    %151 = vector.broadcast %cst_108 : f32 to vector<8x128xf32>
    %152 = arith.mulf %151, %150 : vector<8x128xf32>
    %153 = arith.negf %152 : vector<8x128xf32>
    %154 = math.exp %153 : vector<8x128xf32>
    %cst_109 = arith.constant 1.000000e+00 : f32
    %155 = vector.broadcast %cst_109 : f32 to vector<8x128xf32>
    %156 = arith.addf %155, %154 : vector<8x128xf32>
    %157 = arith.divf %155, %156 : vector<8x128xf32>
    %158 = arith.mulf %150, %157 : vector<8x128xf32>
    %c0_110 = arith.constant 0 : index
    %c0_111 = arith.constant 0 : index
    %c0_112 = arith.constant 0 : index
    %159 = vector.load %arg17[%c0_110, %c0_111, %c0_112] : memref<2x128x32xf32, #tpu.memory_space<vmem>>, vector<1x128x32xf32>
    %160 = vector.shape_cast %159 : vector<1x128x32xf32> to vector<128x32xf32>
    %cst_113 = arith.constant dense<0.000000e+00> : vector<8x32xf32>
    %161 = tpu.matmul %158, %160, %cst_113 {dimension_numbers = #tpu.dot_dimension_numbers<[1], [0], [0], [1], [0, 0, 1, 1], [], []>} : vector<8x128xf32>, vector<128x32xf32>, vector<8x32xf32> -> vector<8x32xf32>
    %c0_114 = arith.constant 0 : index
    %c0_115 = arith.constant 0 : index
    %c0_116 = arith.constant 0 : index
    %162 = vector.load %arg18[%c0_114, %c0_115, %c0_116] : memref<2x1x32xf32, #tpu.memory_space<vmem>>, vector<1x1x32xf32>
    %163 = vector.shape_cast %162 : vector<1x1x32xf32> to vector<1x32xf32>
    %164 = vector.broadcast %163 : vector<1x32xf32> to vector<8x32xf32>
    %165 = arith.addf %161, %164 : vector<8x32xf32>
    %166 = arith.addf %117, %165 : vector<8x32xf32>
    %c1_117 = arith.constant 1 : index
    %c0_118 = arith.constant 0 : index
    %c0_119 = arith.constant 0 : index
    %167 = vector.load %arg3[%c1_117, %c0_118, %c0_119] : memref<2x1x32xf32, #tpu.memory_space<vmem>>, vector<1x1x32xf32>
    %168 = vector.shape_cast %167 : vector<1x1x32xf32> to vector<1x32xf32>
    %c1_120 = arith.constant 1 : index
    %c0_121 = arith.constant 0 : index
    %c0_122 = arith.constant 0 : index
    %169 = vector.load %arg4[%c1_120, %c0_121, %c0_122] : memref<2x1x32xf32, #tpu.memory_space<vmem>>, vector<1x1x32xf32>
    %170 = vector.shape_cast %169 : vector<1x1x32xf32> to vector<1x32xf32>
    %cst_123 = arith.constant dense<0.000000e+00> : vector<8xf32>
    %171 = vector.multi_reduction <add>, %166, %cst_123 [1] : vector<8x32xf32> to vector<8xf32>
    %172 = vector.shape_cast %171 : vector<8xf32> to vector<8x1xf32>
    %cst_124 = arith.constant 3.200000e+01 : f32
    %173 = vector.broadcast %cst_124 : f32 to vector<8x1xf32>
    %174 = arith.divf %172, %173 : vector<8x1xf32>
    %175 = vector.broadcast %174 : vector<8x1xf32> to vector<8x32xf32>
    %176 = arith.subf %166, %175 : vector<8x32xf32>
    %177 = arith.mulf %176, %176 : vector<8x32xf32>
    %cst_125 = arith.constant dense<0.000000e+00> : vector<8xf32>
    %178 = vector.multi_reduction <add>, %177, %cst_125 [1] : vector<8x32xf32> to vector<8xf32>
    %179 = vector.shape_cast %178 : vector<8xf32> to vector<8x1xf32>
    %cst_126 = arith.constant 3.200000e+01 : f32
    %180 = vector.broadcast %cst_126 : f32 to vector<8x1xf32>
    %181 = arith.divf %179, %180 : vector<8x1xf32>
    %182 = vector.broadcast %174 : vector<8x1xf32> to vector<8x32xf32>
    %183 = arith.subf %166, %182 : vector<8x32xf32>
    %cst_127 = arith.constant 9.99999974E-6 : f32
    %184 = vector.broadcast %cst_127 : f32 to vector<8x1xf32>
    %185 = arith.addf %181, %184 : vector<8x1xf32>
    %186 = math.rsqrt %185 : vector<8x1xf32>
    %187 = vector.broadcast %186 : vector<8x1xf32> to vector<8x32xf32>
    %188 = arith.mulf %183, %187 : vector<8x32xf32>
    %189 = vector.broadcast %168 : vector<1x32xf32> to vector<8x32xf32>
    %190 = arith.mulf %188, %189 : vector<8x32xf32>
    %191 = vector.broadcast %170 : vector<1x32xf32> to vector<8x32xf32>
    %192 = arith.addf %190, %191 : vector<8x32xf32>
    %c1_128 = arith.constant 1 : index
    %c0_129 = arith.constant 0 : index
    %c0_130 = arith.constant 0 : index
    %c0_131 = arith.constant 0 : index
    %193 = vector.load %arg5[%c1_128, %c0_129, %c0_130, %c0_131] : memref<2x2x32x16xf32, #tpu.memory_space<vmem>>, vector<1x1x32x16xf32>
    %194 = vector.shape_cast %193 : vector<1x1x32x16xf32> to vector<32x16xf32>
    %cst_132 = arith.constant dense<0.000000e+00> : vector<8x16xf32>
    %195 = tpu.matmul %192, %194, %cst_132 {dimension_numbers = #tpu.dot_dimension_numbers<[1], [0], [0], [1], [0, 0, 1, 1], [], []>} : vector<8x32xf32>, vector<32x16xf32>, vector<8x16xf32> -> vector<8x16xf32>
    %c1_133 = arith.constant 1 : index
    %c0_134 = arith.constant 0 : index
    %c0_135 = arith.constant 0 : index
    %c0_136 = arith.constant 0 : index
    %196 = vector.load %arg8[%c1_133, %c0_134, %c0_135, %c0_136] : memref<2x2x1x16xf32, #tpu.memory_space<vmem>>, vector<1x1x1x16xf32>
    %197 = vector.shape_cast %196 : vector<1x1x1x16xf32> to vector<1x16xf32>
    %198 = vector.broadcast %197 : vector<1x16xf32> to vector<8x16xf32>
    %199 = arith.addf %195, %198 : vector<8x16xf32>
    %c1_137 = arith.constant 1 : index
    %c0_138 = arith.constant 0 : index
    %c0_139 = arith.constant 0 : index
    %c0_140 = arith.constant 0 : index
    %200 = vector.load %arg6[%c1_137, %c0_138, %c0_139, %c0_140] : memref<2x2x32x16xf32, #tpu.memory_space<vmem>>, vector<1x1x32x16xf32>
    %201 = vector.shape_cast %200 : vector<1x1x32x16xf32> to vector<32x16xf32>
    %cst_141 = arith.constant dense<0.000000e+00> : vector<8x16xf32>
    %202 = tpu.matmul %192, %201, %cst_141 {dimension_numbers = #tpu.dot_dimension_numbers<[1], [0], [0], [1], [0, 0, 1, 1], [], []>} : vector<8x32xf32>, vector<32x16xf32>, vector<8x16xf32> -> vector<8x16xf32>
    %c1_142 = arith.constant 1 : index
    %c0_143 = arith.constant 0 : index
    %c0_144 = arith.constant 0 : index
    %c0_145 = arith.constant 0 : index
    %203 = vector.load %arg9[%c1_142, %c0_143, %c0_144, %c0_145] : memref<2x2x1x16xf32, #tpu.memory_space<vmem>>, vector<1x1x1x16xf32>
    %204 = vector.shape_cast %203 : vector<1x1x1x16xf32> to vector<1x16xf32>
    %205 = vector.broadcast %204 : vector<1x16xf32> to vector<8x16xf32>
    %206 = arith.addf %202, %205 : vector<8x16xf32>
    %c1_146 = arith.constant 1 : index
    %c0_147 = arith.constant 0 : index
    %c0_148 = arith.constant 0 : index
    %c0_149 = arith.constant 0 : index
    %207 = vector.load %arg7[%c1_146, %c0_147, %c0_148, %c0_149] : memref<2x2x32x16xf32, #tpu.memory_space<vmem>>, vector<1x1x32x16xf32>
    %208 = vector.shape_cast %207 : vector<1x1x32x16xf32> to vector<32x16xf32>
    %cst_150 = arith.constant dense<0.000000e+00> : vector<8x16xf32>
    %209 = tpu.matmul %192, %208, %cst_150 {dimension_numbers = #tpu.dot_dimension_numbers<[1], [0], [0], [1], [0, 0, 1, 1], [], []>} : vector<8x32xf32>, vector<32x16xf32>, vector<8x16xf32> -> vector<8x16xf32>
    %c1_151 = arith.constant 1 : index
    %c0_152 = arith.constant 0 : index
    %c0_153 = arith.constant 0 : index
    %c0_154 = arith.constant 0 : index
    %210 = vector.load %arg10[%c1_151, %c0_152, %c0_153, %c0_154] : memref<2x2x1x16xf32, #tpu.memory_space<vmem>>, vector<1x1x1x16xf32>
    %211 = vector.shape_cast %210 : vector<1x1x1x16xf32> to vector<1x16xf32>
    %212 = vector.broadcast %211 : vector<1x16xf32> to vector<8x16xf32>
    %213 = arith.addf %209, %212 : vector<8x16xf32>
    %214 = tpu.transpose %206, [1, 0] : vector<8x16xf32> -> vector<16x8xf32>
    %cst_155 = arith.constant dense<0.000000e+00> : vector<8x8xf32>
    %215 = tpu.matmul %199, %214, %cst_155 {dimension_numbers = #tpu.dot_dimension_numbers<[1], [0], [0], [1], [0, 0, 1, 1], [], []>} : vector<8x16xf32>, vector<16x8xf32>, vector<8x8xf32> -> vector<8x8xf32>
    %cst_156 = arith.constant 2.500000e-01 : f32
    %216 = vector.broadcast %cst_156 : f32 to vector<8x8xf32>
    %217 = arith.mulf %215, %216 : vector<8x8xf32>
    %218 = arith.addf %217, %7 : vector<8x8xf32>
    %cst_157 = arith.constant dense<0xFF800000> : vector<8xf32>
    %219 = vector.multi_reduction <maximumf>, %218, %cst_157 [1] : vector<8x8xf32> to vector<8xf32>
    %220 = vector.shape_cast %219 : vector<8xf32> to vector<8x1xf32>
    %221 = vector.broadcast %220 : vector<8x1xf32> to vector<8x8xf32>
    %222 = arith.subf %218, %221 : vector<8x8xf32>
    %223 = math.exp %222 : vector<8x8xf32>
    %cst_158 = arith.constant dense<0.000000e+00> : vector<8xf32>
    %224 = vector.multi_reduction <add>, %223, %cst_158 [1] : vector<8x8xf32> to vector<8xf32>
    %225 = vector.shape_cast %224 : vector<8xf32> to vector<8x1xf32>
    %226 = vector.broadcast %225 : vector<8x1xf32> to vector<8x8xf32>
    %227 = arith.divf %223, %226 : vector<8x8xf32>
    %cst_159 = arith.constant dense<0.000000e+00> : vector<8x16xf32>
    %228 = tpu.matmul %227, %213, %cst_159 {dimension_numbers = #tpu.dot_dimension_numbers<[1], [0], [0], [1], [0, 0, 1, 1], [], []>} : vector<8x8xf32>, vector<8x16xf32>, vector<8x16xf32> -> vector<8x16xf32>
    %c1_160 = arith.constant 1 : index
    %c0_161 = arith.constant 0 : index
    %c0_162 = arith.constant 0 : index
    %c0_163 = arith.constant 0 : index
    %229 = vector.load %arg11[%c1_160, %c0_161, %c0_162, %c0_163] : memref<2x2x16x32xf32, #tpu.memory_space<vmem>>, vector<1x1x16x32xf32>
    %230 = vector.shape_cast %229 : vector<1x1x16x32xf32> to vector<16x32xf32>
    %cst_164 = arith.constant dense<0.000000e+00> : vector<8x32xf32>
    %231 = tpu.matmul %228, %230, %cst_164 {dimension_numbers = #tpu.dot_dimension_numbers<[1], [0], [0], [1], [0, 0, 1, 1], [], []>} : vector<8x16xf32>, vector<16x32xf32>, vector<8x32xf32> -> vector<8x32xf32>
    %c1_165 = arith.constant 1 : index
    %c1_166 = arith.constant 1 : index
    %c0_167 = arith.constant 0 : index
    %c0_168 = arith.constant 0 : index
    %232 = vector.load %arg5[%c1_165, %c1_166, %c0_167, %c0_168] : memref<2x2x32x16xf32, #tpu.memory_space<vmem>>, vector<1x1x32x16xf32>
    %233 = vector.shape_cast %232 : vector<1x1x32x16xf32> to vector<32x16xf32>
    %cst_169 = arith.constant dense<0.000000e+00> : vector<8x16xf32>
    %234 = tpu.matmul %192, %233, %cst_169 {dimension_numbers = #tpu.dot_dimension_numbers<[1], [0], [0], [1], [0, 0, 1, 1], [], []>} : vector<8x32xf32>, vector<32x16xf32>, vector<8x16xf32> -> vector<8x16xf32>
    %c1_170 = arith.constant 1 : index
    %c1_171 = arith.constant 1 : index
    %c0_172 = arith.constant 0 : index
    %c0_173 = arith.constant 0 : index
    %235 = vector.load %arg8[%c1_170, %c1_171, %c0_172, %c0_173] : memref<2x2x1x16xf32, #tpu.memory_space<vmem>>, vector<1x1x1x16xf32>
    %236 = vector.shape_cast %235 : vector<1x1x1x16xf32> to vector<1x16xf32>
    %237 = vector.broadcast %236 : vector<1x16xf32> to vector<8x16xf32>
    %238 = arith.addf %234, %237 : vector<8x16xf32>
    %c1_174 = arith.constant 1 : index
    %c1_175 = arith.constant 1 : index
    %c0_176 = arith.constant 0 : index
    %c0_177 = arith.constant 0 : index
    %239 = vector.load %arg6[%c1_174, %c1_175, %c0_176, %c0_177] : memref<2x2x32x16xf32, #tpu.memory_space<vmem>>, vector<1x1x32x16xf32>
    %240 = vector.shape_cast %239 : vector<1x1x32x16xf32> to vector<32x16xf32>
    %cst_178 = arith.constant dense<0.000000e+00> : vector<8x16xf32>
    %241 = tpu.matmul %192, %240, %cst_178 {dimension_numbers = #tpu.dot_dimension_numbers<[1], [0], [0], [1], [0, 0, 1, 1], [], []>} : vector<8x32xf32>, vector<32x16xf32>, vector<8x16xf32> -> vector<8x16xf32>
    %c1_179 = arith.constant 1 : index
    %c1_180 = arith.constant 1 : index
    %c0_181 = arith.constant 0 : index
    %c0_182 = arith.constant 0 : index
    %242 = vector.load %arg9[%c1_179, %c1_180, %c0_181, %c0_182] : memref<2x2x1x16xf32, #tpu.memory_space<vmem>>, vector<1x1x1x16xf32>
    %243 = vector.shape_cast %242 : vector<1x1x1x16xf32> to vector<1x16xf32>
    %244 = vector.broadcast %243 : vector<1x16xf32> to vector<8x16xf32>
    %245 = arith.addf %241, %244 : vector<8x16xf32>
    %c1_183 = arith.constant 1 : index
    %c1_184 = arith.constant 1 : index
    %c0_185 = arith.constant 0 : index
    %c0_186 = arith.constant 0 : index
    %246 = vector.load %arg7[%c1_183, %c1_184, %c0_185, %c0_186] : memref<2x2x32x16xf32, #tpu.memory_space<vmem>>, vector<1x1x32x16xf32>
    %247 = vector.shape_cast %246 : vector<1x1x32x16xf32> to vector<32x16xf32>
    %cst_187 = arith.constant dense<0.000000e+00> : vector<8x16xf32>
    %248 = tpu.matmul %192, %247, %cst_187 {dimension_numbers = #tpu.dot_dimension_numbers<[1], [0], [0], [1], [0, 0, 1, 1], [], []>} : vector<8x32xf32>, vector<32x16xf32>, vector<8x16xf32> -> vector<8x16xf32>
    %c1_188 = arith.constant 1 : index
    %c1_189 = arith.constant 1 : index
    %c0_190 = arith.constant 0 : index
    %c0_191 = arith.constant 0 : index
    %249 = vector.load %arg10[%c1_188, %c1_189, %c0_190, %c0_191] : memref<2x2x1x16xf32, #tpu.memory_space<vmem>>, vector<1x1x1x16xf32>
    %250 = vector.shape_cast %249 : vector<1x1x1x16xf32> to vector<1x16xf32>
    %251 = vector.broadcast %250 : vector<1x16xf32> to vector<8x16xf32>
    %252 = arith.addf %248, %251 : vector<8x16xf32>
    %253 = tpu.transpose %245, [1, 0] : vector<8x16xf32> -> vector<16x8xf32>
    %cst_192 = arith.constant dense<0.000000e+00> : vector<8x8xf32>
    %254 = tpu.matmul %238, %253, %cst_192 {dimension_numbers = #tpu.dot_dimension_numbers<[1], [0], [0], [1], [0, 0, 1, 1], [], []>} : vector<8x16xf32>, vector<16x8xf32>, vector<8x8xf32> -> vector<8x8xf32>
    %cst_193 = arith.constant 2.500000e-01 : f32
    %255 = vector.broadcast %cst_193 : f32 to vector<8x8xf32>
    %256 = arith.mulf %254, %255 : vector<8x8xf32>
    %257 = arith.addf %256, %7 : vector<8x8xf32>
    %cst_194 = arith.constant dense<0xFF800000> : vector<8xf32>
    %258 = vector.multi_reduction <maximumf>, %257, %cst_194 [1] : vector<8x8xf32> to vector<8xf32>
    %259 = vector.shape_cast %258 : vector<8xf32> to vector<8x1xf32>
    %260 = vector.broadcast %259 : vector<8x1xf32> to vector<8x8xf32>
    %261 = arith.subf %257, %260 : vector<8x8xf32>
    %262 = math.exp %261 : vector<8x8xf32>
    %cst_195 = arith.constant dense<0.000000e+00> : vector<8xf32>
    %263 = vector.multi_reduction <add>, %262, %cst_195 [1] : vector<8x8xf32> to vector<8xf32>
    %264 = vector.shape_cast %263 : vector<8xf32> to vector<8x1xf32>
    %265 = vector.broadcast %264 : vector<8x1xf32> to vector<8x8xf32>
    %266 = arith.divf %262, %265 : vector<8x8xf32>
    %cst_196 = arith.constant dense<0.000000e+00> : vector<8x16xf32>
    %267 = tpu.matmul %266, %252, %cst_196 {dimension_numbers = #tpu.dot_dimension_numbers<[1], [0], [0], [1], [0, 0, 1, 1], [], []>} : vector<8x8xf32>, vector<8x16xf32>, vector<8x16xf32> -> vector<8x16xf32>
    %c1_197 = arith.constant 1 : index
    %c1_198 = arith.constant 1 : index
    %c0_199 = arith.constant 0 : index
    %c0_200 = arith.constant 0 : index
    %268 = vector.load %arg11[%c1_197, %c1_198, %c0_199, %c0_200] : memref<2x2x16x32xf32, #tpu.memory_space<vmem>>, vector<1x1x16x32xf32>
    %269 = vector.shape_cast %268 : vector<1x1x16x32xf32> to vector<16x32xf32>
    %cst_201 = arith.constant dense<0.000000e+00> : vector<8x32xf32>
    %270 = tpu.matmul %267, %269, %cst_201 {dimension_numbers = #tpu.dot_dimension_numbers<[1], [0], [0], [1], [0, 0, 1, 1], [], []>} : vector<8x16xf32>, vector<16x32xf32>, vector<8x32xf32> -> vector<8x32xf32>
    %271 = arith.addf %231, %270 : vector<8x32xf32>
    %272 = arith.addf %166, %271 : vector<8x32xf32>
    %c1_202 = arith.constant 1 : index
    %c0_203 = arith.constant 0 : index
    %c0_204 = arith.constant 0 : index
    %273 = vector.load %arg12[%c1_202, %c0_203, %c0_204] : memref<2x1x32xf32, #tpu.memory_space<vmem>>, vector<1x1x32xf32>
    %274 = vector.shape_cast %273 : vector<1x1x32xf32> to vector<1x32xf32>
    %275 = vector.broadcast %274 : vector<1x32xf32> to vector<8x32xf32>
    %276 = arith.addf %272, %275 : vector<8x32xf32>
    %c1_205 = arith.constant 1 : index
    %c0_206 = arith.constant 0 : index
    %c0_207 = arith.constant 0 : index
    %277 = vector.load %arg13[%c1_205, %c0_206, %c0_207] : memref<2x1x32xf32, #tpu.memory_space<vmem>>, vector<1x1x32xf32>
    %278 = vector.shape_cast %277 : vector<1x1x32xf32> to vector<1x32xf32>
    %c1_208 = arith.constant 1 : index
    %c0_209 = arith.constant 0 : index
    %c0_210 = arith.constant 0 : index
    %279 = vector.load %arg14[%c1_208, %c0_209, %c0_210] : memref<2x1x32xf32, #tpu.memory_space<vmem>>, vector<1x1x32xf32>
    %280 = vector.shape_cast %279 : vector<1x1x32xf32> to vector<1x32xf32>
    %cst_211 = arith.constant dense<0.000000e+00> : vector<8xf32>
    %281 = vector.multi_reduction <add>, %276, %cst_211 [1] : vector<8x32xf32> to vector<8xf32>
    %282 = vector.shape_cast %281 : vector<8xf32> to vector<8x1xf32>
    %cst_212 = arith.constant 3.200000e+01 : f32
    %283 = vector.broadcast %cst_212 : f32 to vector<8x1xf32>
    %284 = arith.divf %282, %283 : vector<8x1xf32>
    %285 = vector.broadcast %284 : vector<8x1xf32> to vector<8x32xf32>
    %286 = arith.subf %276, %285 : vector<8x32xf32>
    %287 = arith.mulf %286, %286 : vector<8x32xf32>
    %cst_213 = arith.constant dense<0.000000e+00> : vector<8xf32>
    %288 = vector.multi_reduction <add>, %287, %cst_213 [1] : vector<8x32xf32> to vector<8xf32>
    %289 = vector.shape_cast %288 : vector<8xf32> to vector<8x1xf32>
    %cst_214 = arith.constant 3.200000e+01 : f32
    %290 = vector.broadcast %cst_214 : f32 to vector<8x1xf32>
    %291 = arith.divf %289, %290 : vector<8x1xf32>
    %292 = vector.broadcast %284 : vector<8x1xf32> to vector<8x32xf32>
    %293 = arith.subf %276, %292 : vector<8x32xf32>
    %cst_215 = arith.constant 9.99999974E-6 : f32
    %294 = vector.broadcast %cst_215 : f32 to vector<8x1xf32>
    %295 = arith.addf %291, %294 : vector<8x1xf32>
    %296 = math.rsqrt %295 : vector<8x1xf32>
    %297 = vector.broadcast %296 : vector<8x1xf32> to vector<8x32xf32>
    %298 = arith.mulf %293, %297 : vector<8x32xf32>
    %299 = vector.broadcast %278 : vector<1x32xf32> to vector<8x32xf32>
    %300 = arith.mulf %298, %299 : vector<8x32xf32>
    %301 = vector.broadcast %280 : vector<1x32xf32> to vector<8x32xf32>
    %302 = arith.addf %300, %301 : vector<8x32xf32>
    %c1_216 = arith.constant 1 : index
    %c0_217 = arith.constant 0 : index
    %c0_218 = arith.constant 0 : index
    %303 = vector.load %arg15[%c1_216, %c0_217, %c0_218] : memref<2x32x128xf32, #tpu.memory_space<vmem>>, vector<1x32x128xf32>
    %304 = vector.shape_cast %303 : vector<1x32x128xf32> to vector<32x128xf32>
    %cst_219 = arith.constant dense<0.000000e+00> : vector<8x128xf32>
    %305 = tpu.matmul %302, %304, %cst_219 {dimension_numbers = #tpu.dot_dimension_numbers<[1], [0], [0], [1], [0, 0, 1, 1], [], []>} : vector<8x32xf32>, vector<32x128xf32>, vector<8x128xf32> -> vector<8x128xf32>
    %c1_220 = arith.constant 1 : index
    %c0_221 = arith.constant 0 : index
    %c0_222 = arith.constant 0 : index
    %306 = vector.load %arg16[%c1_220, %c0_221, %c0_222] : memref<2x1x128xf32, #tpu.memory_space<vmem>>, vector<1x1x128xf32>
    %307 = vector.shape_cast %306 : vector<1x1x128xf32> to vector<1x128xf32>
    %308 = vector.broadcast %307 : vector<1x128xf32> to vector<8x128xf32>
    %309 = arith.addf %305, %308 : vector<8x128xf32>
    %cst_223 = arith.constant 1.702000e+00 : f32
    %310 = vector.broadcast %cst_223 : f32 to vector<8x128xf32>
    %311 = arith.mulf %310, %309 : vector<8x128xf32>
    %312 = arith.negf %311 : vector<8x128xf32>
    %313 = math.exp %312 : vector<8x128xf32>
    %cst_224 = arith.constant 1.000000e+00 : f32
    %314 = vector.broadcast %cst_224 : f32 to vector<8x128xf32>
    %315 = arith.addf %314, %313 : vector<8x128xf32>
    %316 = arith.divf %314, %315 : vector<8x128xf32>
    %317 = arith.mulf %309, %316 : vector<8x128xf32>
    %c1_225 = arith.constant 1 : index
    %c0_226 = arith.constant 0 : index
    %c0_227 = arith.constant 0 : index
    %318 = vector.load %arg17[%c1_225, %c0_226, %c0_227] : memref<2x128x32xf32, #tpu.memory_space<vmem>>, vector<1x128x32xf32>
    %319 = vector.shape_cast %318 : vector<1x128x32xf32> to vector<128x32xf32>
    %cst_228 = arith.constant dense<0.000000e+00> : vector<8x32xf32>
    %320 = tpu.matmul %317, %319, %cst_228 {dimension_numbers = #tpu.dot_dimension_numbers<[1], [0], [0], [1], [0, 0, 1, 1], [], []>} : vector<8x128xf32>, vector<128x32xf32>, vector<8x32xf32> -> vector<8x32xf32>
    %c1_229 = arith.constant 1 : index
    %c0_230 = arith.constant 0 : index
    %c0_231 = arith.constant 0 : index
    %321 = vector.load %arg18[%c1_229, %c0_230, %c0_231] : memref<2x1x32xf32, #tpu.memory_space<vmem>>, vector<1x1x32xf32>
    %322 = vector.shape_cast %321 : vector<1x1x32xf32> to vector<1x32xf32>
    %323 = vector.broadcast %322 : vector<1x32xf32> to vector<8x32xf32>
    %324 = arith.addf %320, %323 : vector<8x32xf32>
    %325 = arith.addf %276, %324 : vector<8x32xf32>
    %c0_232 = arith.constant 0 : index
    %c0_233 = arith.constant 0 : index
    %326 = vector.load %arg19[%c0_232, %c0_233] : memref<1x32xf32, #tpu.memory_space<vmem>>, vector<1x32xf32>
    %c0_234 = arith.constant 0 : index
    %c0_235 = arith.constant 0 : index
    %327 = vector.load %arg20[%c0_234, %c0_235] : memref<1x32xf32, #tpu.memory_space<vmem>>, vector<1x32xf32>
    %cst_236 = arith.constant dense<0.000000e+00> : vector<8xf32>
    %328 = vector.multi_reduction <add>, %325, %cst_236 [1] : vector<8x32xf32> to vector<8xf32>
    %329 = vector.shape_cast %328 : vector<8xf32> to vector<8x1xf32>
    %cst_237 = arith.constant 3.200000e+01 : f32
    %330 = vector.broadcast %cst_237 : f32 to vector<8x1xf32>
    %331 = arith.divf %329, %330 : vector<8x1xf32>
    %332 = vector.broadcast %331 : vector<8x1xf32> to vector<8x32xf32>
    %333 = arith.subf %325, %332 : vector<8x32xf32>
    %334 = arith.mulf %333, %333 : vector<8x32xf32>
    %cst_238 = arith.constant dense<0.000000e+00> : vector<8xf32>
    %335 = vector.multi_reduction <add>, %334, %cst_238 [1] : vector<8x32xf32> to vector<8xf32>
    %336 = vector.shape_cast %335 : vector<8xf32> to vector<8x1xf32>
    %cst_239 = arith.constant 3.200000e+01 : f32
    %337 = vector.broadcast %cst_239 : f32 to vector<8x1xf32>
    %338 = arith.divf %336, %337 : vector<8x1xf32>
    %339 = vector.broadcast %331 : vector<8x1xf32> to vector<8x32xf32>
    %340 = arith.subf %325, %339 : vector<8x32xf32>
    %cst_240 = arith.constant 9.99999974E-6 : f32
    %341 = vector.broadcast %cst_240 : f32 to vector<8x1xf32>
    %342 = arith.addf %338, %341 : vector<8x1xf32>
    %343 = math.rsqrt %342 : vector<8x1xf32>
    %344 = vector.broadcast %343 : vector<8x1xf32> to vector<8x32xf32>
    %345 = arith.mulf %340, %344 : vector<8x32xf32>
    %346 = vector.broadcast %326 : vector<1x32xf32> to vector<8x32xf32>
    %347 = arith.mulf %345, %346 : vector<8x32xf32>
    %348 = vector.broadcast %327 : vector<1x32xf32> to vector<8x32xf32>
    %349 = arith.addf %347, %348 : vector<8x32xf32>
    %c0_241 = arith.constant 0 : index
    %c0_242 = arith.constant 0 : index
    %c0_243 = arith.constant 0 : index
    %350 = vector.load %arg2[%c0_241, %c0_242, %c0_243] : memref<1x1x8xf32, #tpu.memory_space<vmem>>, vector<1x1x8xf32>
    %351 = vector.shape_cast %350 : vector<1x1x8xf32> to vector<1x8xf32>
    %cst_244 = arith.constant dense<0.000000e+00> : vector<1x32xf32>
    %352 = tpu.matmul %351, %349, %cst_244 {dimension_numbers = #tpu.dot_dimension_numbers<[1], [0], [0], [1], [0, 0, 1, 1], [], []>} : vector<1x8xf32>, vector<8x32xf32>, vector<1x32xf32> -> vector<1x32xf32>
    %c0_245 = arith.constant 0 : index
    %c0_246 = arith.constant 0 : index
    %353 = vector.load %arg21[%c0_245, %c0_246] : memref<32x32xf32, #tpu.memory_space<vmem>>, vector<32x32xf32>
    %cst_247 = arith.constant dense<0.000000e+00> : vector<1x32xf32>
    %354 = tpu.matmul %352, %353, %cst_247 {dimension_numbers = #tpu.dot_dimension_numbers<[1], [0], [0], [1], [0, 0, 1, 1], [], []>} : vector<1x32xf32>, vector<32x32xf32>, vector<1x32xf32> -> vector<1x32xf32>
    %355 = arith.mulf %354, %354 : vector<1x32xf32>
    %cst_248 = arith.constant dense<0.000000e+00> : vector<1xf32>
    %356 = vector.multi_reduction <add>, %355, %cst_248 [1] : vector<1x32xf32> to vector<1xf32>
    %357 = vector.shape_cast %356 : vector<1xf32> to vector<1x1xf32>
    %358 = math.rsqrt %357 : vector<1x1xf32>
    %359 = vector.broadcast %358 : vector<1x1xf32> to vector<1x32xf32>
    %360 = arith.mulf %354, %359 : vector<1x32xf32>
    %c0_249 = arith.constant 0 : index
    %c0_250 = arith.constant 0 : index
    %c0_251 = arith.constant 0 : index
    %361 = vector.load %arg22[%c0_249, %c0_250, %c0_251] : memref<1x1x32xf32, #tpu.memory_space<vmem>>, vector<1x1x32xf32>
    %362 = vector.shape_cast %361 : vector<1x1x32xf32> to vector<1x32xf32>
    %363 = vector.shape_cast %360 : vector<1x32xf32> to vector<1x1x32xf32>
    tpu.vector_store %arg22[%c0_249, %c0_250, %c0_251], %363 {strides = array<i32>} : memref<1x1x32xf32, #tpu.memory_space<vmem>>, vector<1x1x32xf32>,
    return
  }
  func.func @transform_0(%arg0: i32) -> (i32, i32, i32) {
    %c0_i32 = arith.constant 0 : i32
    %c0_i32_0 = arith.constant 0 : i32
    %c0_i32_1 = arith.constant 0 : i32
    return %arg0, %c0_i32, %c0_i32_0 : i32, i32, i32
  }
  func.func @transform_1(%arg0: i32) -> (i32, i32, i32) {
    %c0_i32 = arith.constant 0 : i32
    %c0_i32_0 = arith.constant 0 : i32
    %c0_i32_1 = arith.constant 0 : i32
    return %arg0, %c0_i32, %c0_i32_0 : i32, i32, i32
  }
  func.func @transform_2(%arg0: i32) -> (i32, i32, i32) {
    %c0_i32 = arith.constant 0 : i32
    %c0_i32_0 = arith.constant 0 : i32
    %c0_i32_1 = arith.constant 0 : i32
    %c0_i32_2 = arith.constant 0 : i32
    return %c0_i32, %c0_i32_0, %c0_i32_1 : i32, i32, i32
  }
  func.func @transform_3(%arg0: i32) -> (i32, i32, i32) {
    %c0_i32 = arith.constant 0 : i32
    %c0_i32_0 = arith.constant 0 : i32
    %c0_i32_1 = arith.constant 0 : i32
    %c0_i32_2 = arith.constant 0 : i32
    return %c0_i32, %c0_i32_0, %c0_i32_1 : i32, i32, i32
  }
  func.func @transform_4(%arg0: i32) -> (i32, i32, i32, i32) {
    %c0_i32 = arith.constant 0 : i32
    %c0_i32_0 = arith.constant 0 : i32
    %c0_i32_1 = arith.constant 0 : i32
    %c0_i32_2 = arith.constant 0 : i32
    %c0_i32_3 = arith.constant 0 : i32
    return %c0_i32, %c0_i32_0, %c0_i32_1, %c0_i32_2 : i32, i32, i32, i32
  }
  func.func @transform_5(%arg0: i32) -> (i32, i32, i32, i32) {
    %c0_i32 = arith.constant 0 : i32
    %c0_i32_0 = arith.constant 0 : i32
    %c0_i32_1 = arith.constant 0 : i32
    %c0_i32_2 = arith.constant 0 : i32
    %c0_i32_3 = arith.constant 0 : i32
    return %c0_i32, %c0_i32_0, %c0_i32_1, %c0_i32_2 : i32, i32, i32, i32
  }
  func.func @transform_6(%arg0: i32) -> (i32, i32, i32, i32) {
    %c0_i32 = arith.constant 0 : i32
    %c0_i32_0 = arith.constant 0 : i32
    %c0_i32_1 = arith.constant 0 : i32
    %c0_i32_2 = arith.constant 0 : i32
    %c0_i32_3 = arith.constant 0 : i32
    return %c0_i32, %c0_i32_0, %c0_i32_1, %c0_i32_2 : i32, i32, i32, i32
  }
  func.func @transform_7(%arg0: i32) -> (i32, i32, i32, i32) {
    %c0_i32 = arith.constant 0 : i32
    %c0_i32_0 = arith.constant 0 : i32
    %c0_i32_1 = arith.constant 0 : i32
    %c0_i32_2 = arith.constant 0 : i32
    %c0_i32_3 = arith.constant 0 : i32
    return %c0_i32, %c0_i32_0, %c0_i32_1, %c0_i32_2 : i32, i32, i32, i32
  }
  func.func @transform_8(%arg0: i32) -> (i32, i32, i32, i32) {
    %c0_i32 = arith.constant 0 : i32
    %c0_i32_0 = arith.constant 0 : i32
    %c0_i32_1 = arith.constant 0 : i32
    %c0_i32_2 = arith.constant 0 : i32
    %c0_i32_3 = arith.constant 0 : i32
    return %c0_i32, %c0_i32_0, %c0_i32_1, %c0_i32_2 : i32, i32, i32, i32
  }
  func.func @transform_9(%arg0: i32) -> (i32, i32, i32, i32) {
    %c0_i32 = arith.constant 0 : i32
    %c0_i32_0 = arith.constant 0 : i32
    %c0_i32_1 = arith.constant 0 : i32
    %c0_i32_2 = arith.constant 0 : i32
    %c0_i32_3 = arith.constant 0 : i32
    return %c0_i32, %c0_i32_0, %c0_i32_1, %c0_i32_2 : i32, i32, i32, i32
  }
  func.func @transform_10(%arg0: i32) -> (i32, i32, i32, i32) {
    %c0_i32 = arith.constant 0 : i32
    %c0_i32_0 = arith.constant 0 : i32
    %c0_i32_1 = arith.constant 0 : i32
    %c0_i32_2 = arith.constant 0 : i32
    %c0_i32_3 = arith.constant 0 : i32
    return %c0_i32, %c0_i32_0, %c0_i32_1, %c0_i32_2 : i32, i32, i32, i32
  }
  func.func @transform_11(%arg0: i32) -> (i32, i32, i32) {
    %c0_i32 = arith.constant 0 : i32
    %c0_i32_0 = arith.constant 0 : i32
    %c0_i32_1 = arith.constant 0 : i32
    %c0_i32_2 = arith.constant 0 : i32
    return %c0_i32, %c0_i32_0, %c0_i32_1 : i32, i32, i32
  }
  func.func @transform_12(%arg0: i32) -> (i32, i32, i32) {
    %c0_i32 = arith.constant 0 : i32
    %c0_i32_0 = arith.constant 0 : i32
    %c0_i32_1 = arith.constant 0 : i32
    %c0_i32_2 = arith.constant 0 : i32
    return %c0_i32, %c0_i32_0, %c0_i32_1 : i32, i32, i32
  }
  func.func @transform_13(%arg0: i32) -> (i32, i32, i32) {
    %c0_i32 = arith.constant 0 : i32
    %c0_i32_0 = arith.constant 0 : i32
    %c0_i32_1 = arith.constant 0 : i32
    %c0_i32_2 = arith.constant 0 : i32
    return %c0_i32, %c0_i32_0, %c0_i32_1 : i32, i32, i32
  }
  func.func @transform_14(%arg0: i32) -> (i32, i32, i32) {
    %c0_i32 = arith.constant 0 : i32
    %c0_i32_0 = arith.constant 0 : i32
    %c0_i32_1 = arith.constant 0 : i32
    %c0_i32_2 = arith.constant 0 : i32
    return %c0_i32, %c0_i32_0, %c0_i32_1 : i32, i32, i32
  }
  func.func @transform_15(%arg0: i32) -> (i32, i32, i32) {
    %c0_i32 = arith.constant 0 : i32
    %c0_i32_0 = arith.constant 0 : i32
    %c0_i32_1 = arith.constant 0 : i32
    %c0_i32_2 = arith.constant 0 : i32
    return %c0_i32, %c0_i32_0, %c0_i32_1 : i32, i32, i32
  }
  func.func @transform_16(%arg0: i32) -> (i32, i32, i32) {
    %c0_i32 = arith.constant 0 : i32
    %c0_i32_0 = arith.constant 0 : i32
    %c0_i32_1 = arith.constant 0 : i32
    %c0_i32_2 = arith.constant 0 : i32
    return %c0_i32, %c0_i32_0, %c0_i32_1 : i32, i32, i32
  }
  func.func @transform_17(%arg0: i32) -> (i32, i32, i32) {
    %c0_i32 = arith.constant 0 : i32
    %c0_i32_0 = arith.constant 0 : i32
    %c0_i32_1 = arith.constant 0 : i32
    %c0_i32_2 = arith.constant 0 : i32
    return %c0_i32, %c0_i32_0, %c0_i32_1 : i32, i32, i32
  }
  func.func @transform_18(%arg0: i32) -> (i32, i32) {
    %c0_i32 = arith.constant 0 : i32
    %c0_i32_0 = arith.constant 0 : i32
    %c0_i32_1 = arith.constant 0 : i32
    return %c0_i32, %c0_i32_0 : i32, i32
  }
  func.func @transform_19(%arg0: i32) -> (i32, i32) {
    %c0_i32 = arith.constant 0 : i32
    %c0_i32_0 = arith.constant 0 : i32
    %c0_i32_1 = arith.constant 0 : i32
    return %c0_i32, %c0_i32_0 : i32, i32
  }
  func.func @transform_20(%arg0: i32) -> (i32, i32) {
    %c0_i32 = arith.constant 0 : i32
    %c0_i32_0 = arith.constant 0 : i32
    %c0_i32_1 = arith.constant 0 : i32
    return %c0_i32, %c0_i32_0 : i32, i32
  }
  func.func @transform_21(%arg0: i32) -> (i32, i32, i32) {
    %c0_i32 = arith.constant 0 : i32
    %c0_i32_0 = arith.constant 0 : i32
    %c0_i32_1 = arith.constant 0 : i32
    return %arg0, %c0_i32, %c0_i32_0 : i32, i32, i32
  }
}

</mosaic_0001>

<bundles_post_ra>
// kernel: _lambda_.3
= control target key start
LH: loop header
LB: loop body
LE: loop exit
PB: predicated region body
PF: predicated region fallthrough
CT: control target
= control target key end

     0   :  { %s3009_s0 = inlined_call_operand.vmem [shape: f32[2,8,32], index: 0, kind: input, shape index: {}]   ;;  %s3010_s1 = inlined_call_operand.vmem [shape: f32[2,1,8], index: 1, kind: input, shape index: {}]   ;;  %s3011_s2 = inlined_call_operand.vmem [shape: f32[2,1,32], index: 2, kind: input, shape index: {}]   ;;  %s3012_s3 = inlined_call_operand.vmem [shape: f32[2,1,32], index: 3, kind: input, shape index: {}]   ;;  %s3013_s4 = inlined_call_operand.vmem [shape: f32[2,2,32,16], index: 4, kind: input, shape index: {}]   ;;  %s3014_s5 = inlined_call_operand.vmem [shape: f32[2,2,32,16], index: 5, kind: input, shape index: {}]   ;;  %s3015_s6 = inlined_call_operand.vmem [shape: f32[2,2,32,16], index: 6, kind: input, shape index: {}]   ;;  %s3016_s7 = inlined_call_operand.vmem [shape: f32[2,2,1,16], index: 7, kind: input, shape index: {}]   ;;  %s3017_s8 = inlined_call_operand.vmem [shape: f32[2,2,1,16], index: 8, kind: input, shape index: {}]   ;;  %s3018_s9 = inlined_call_operand.vmem [shape: f32[2,2,1,16], index: 9, kind: input, shape index: {}]   ;;  %s3019_s10 = inlined_call_operand.vmem [shape: f32[2,2,16,32], index: 10, kind: input, shape index: {}]   ;;  %s3020_s11 = inlined_call_operand.vmem [shape: f32[2,1,32], index: 11, kind: input, shape index: {}]   ;;  %s3021_s12 = inlined_call_operand.vmem [shape: f32[2,1,32], index: 12, kind: input, shape index: {}]   ;;  %s3022_s13 = inlined_call_operand.vmem [shape: f32[2,1,32], index: 13, kind: input, shape index: {}]   ;;  %s3023_s14 = inlined_call_operand.vmem [shape: f32[2,32,128], index: 14, kind: input, shape index: {}]   ;;  %s3024_s15 = inlined_call_operand.vmem [shape: f32[2,1,128], index: 15, kind: input, shape index: {}]   ;;  %s3025_s16 = inlined_call_operand.vmem [shape: f32[2,128,32], index: 16, kind: input, shape index: {}]   ;;  %s3026_s17 = inlined_call_operand.vmem [shape: f32[2,1,32], index: 17, kind: input, shape index: {}]   ;;  %s3027_s18 = inlined_call_operand.hbm [shape: f32[1,32], index: 18, kind: input, shape index: {}]   ;;  %s3028_s19 = inlined_call_operand.vmem [shape: f32[1,32], index: 19, kind: input, shape index: {}]   ;;  %s3029_s20 = inlined_call_operand.vmem [shape: f32[32,32], index: 20, kind: input, shape index: {}]   ;;  %s3030_s21 = inlined_call_operand.hbm [shape: f32[2,1,32], index: 21, kind: output, shape index: {}]  }
   0x1   :  { %3044 = sst [smem:[#allocation15_spill]] %s3009_s0 }
   0x2   :  { %3045 = sst [smem:[#allocation16_spill]] %s3010_s1 }
   0x3   :  { %3046 = sst [smem:[#allocation17_spill]] %s3011_s2 }
   0x4   :  { %3047 = sst [smem:[#allocation18_spill]] %s3012_s3 }
   0x5   :  { %3048 = sst [smem:[#allocation19_spill]] %s3013_s4 }
   0x6   :  { %3049 = sst [smem:[#allocation20_spill]] %s3014_s5 }
   0x7   :  { %3050 = sst [smem:[#allocation21_spill]] %s3015_s6 }
   0x8   :  { %3051 = sst [smem:[#allocation22_spill]] %s3016_s7 }
   0x9   :  { %3052 = sst [smem:[#allocation23_spill]] %s3017_s8 }
   0xa   :  { %3053 = sst [smem:[#allocation24_spill]] %s3018_s9 }
   0xb   :  { %3054 = sst [smem:[#allocation25_spill]] %s3027_s18 }
   0xc   :  { %3055 = sst [smem:[#allocation26_spill]] %s3030_s21 }
   0xd   :  { %26 = vsyncpa [#allocation3], 0 }
   0xe   :  { %27 = vsyncpa [#allocation4], 0 }
   0xf   :  { %29 = vsyncpa [#allocation4 + $0x1], 0  ;;  %s2434_s2 = smov 0   ;;  %s2436_s25 = smov 0  }
  0x10   :  { %s2438_s26 = smov 0   ;;  %s2440_s27 = smov 0  }
  0x11 LB: > { %3056 = sst [smem:[#allocation8_spill]] %s2307_s2  ;;  %s2455_s3 = sadd.s32 4294967295, %s2319_s27   ;;  %s2319_s27 = sphi %s2440_s27, %s3082_s27   ;;  %s2315_s26 = sphi %s2438_s26, %s3084_s26   ;;  %s2311_s25 = sphi %s2436_s25, %s3086_s25   ;;  %s2307_s2 = sphi %s2434_s2, %s3085_s2  }
  0x12   : > { %3057 = sst [smem:[#allocation9_spill]] %s2315_s26  ;;  %s1984_s28 = sadd.s32 4294967294, %s2319_s27  }
  0x13   : > { %3058 = sst [smem:[#allocation10_spill]] %s2319_s27  ;;  %s2459_s29 = sadd.s32 1, %s2319_s27  }
  0x14   : > { %3059 = sst [smem:[#allocation11_spill]] %s2459_s29  ;;  %s493_s0 = sadd.s32 1, %s2315_s26 }
  0x15   : > { %s490_s4 = ssub.s32 %s2319_s27, %s2459_s29  ;;  %p503_p0 = scmp.ne.s32.totalorder %s2315_s26, %s2311_s25 }
  0x16   : > { %p491_p1 = scmp.eq.s32.totalorder %s490_s4, 0  ;;  %p504_p2 = scmp.eq.s32.totalorder %s2455_s3, 1 }
  0x17   : > { %p509_p3 = scmp.ne.s32.totalorder %s2311_s25, %s2307_s2  ;;  %p510_p4 = scmp.eq.s32.totalorder %s1984_s28, 1 }
  0x18   : > { %s2470_s30 = scalar_select %p491_p1, %s2315_s26, %s493_s0  }
  0x19   : > { %p2472_p5 = por %p504_p2, %p503_p0  ;;  %p2476_p6 = por %p510_p4, %p509_p3 }
  0x1a   : > { %3060 = sst [smem:[#allocation12_spill]] %s2470_s30  ;;  %p1985_p7 = scmp.ge.s32.totalorder %s2319_s27, 1 }
  0x1b   : > { %s3061_s5 = scalar_select %p2472_p5, 1, 0 }
  0x1c   : > { %s3063_s22 = scalar_select %p2476_p6, 1, 0 }
  0x1d   : > { %3062 = sst [smem:[#allocation13_spill]] %s3061_s5  ;;  %p517_p8 = scmp.lt.s32.totalorder %s2319_s27, 3 }
  0x1e   : > { %3064 = sst [smem:[#allocation14_spill]] %s3063_s22  ;;  %p2119_p9 = scmp.eq.s32.totalorder %s2455_s3, 0 }
  0x1f   : > { %p518_p10 = pnand %p1985_p7, %p517_p8  ;;  %s3065_s18 = sld [smem:[#allocation25_spill]] }
  0x20   : > { %s2321_s28 = smov [#allocation2]  }
  0x21   : > { %p2111_p11 = pneg %p518_p10  ;;  %s579_s0 = sshll.u32 %s2321_s28, 4  ;;  %s580_s0 = int_to_ptr.vmem [resolvable:$true] %s579_s0 }
  0x22   : > { %611 = sbr.rel (%p518_p10) target bundleno = 4526 (0x11ae), region = 104 }
  0x23   : > { %p2112_p12 = pnand %p2119_p9, %p2111_p11 }
  0x25   : > { %s577_s24 = sshll.u32 %s3065_s18, 4  ;;  %s578_s24 = int_to_ptr.hbm [resolvable:$true] %s577_s24 }
  0x26   : > { %2114 = dma.hbm_to_vmem [thread:$0]  (!%p2112_p12), %s578_s24, 16, %s580_s0, [#allocation3]  }
  0x27   : > { %2298 = dma.done.wait (%p2119_p9), [#allocation3], 16  }
  0x28   : > { %2300 = vsyncadd (%p2119_p9), [#allocation3], 4294967280  ;;  %p673_p13 = scmp.lt.s32.totalorder %s2455_s3, 1  ;;  %s3066_s1 = sld [smem:[#allocation15_spill]]  ;;  %vm689_vm0 = vcmask 261120   ;;  %v2322_v2 = vmov 32.0  }
  0x29   : > { %2185 = vrcp.f32 %v2322_v2  ;;  %s3068_s6 = sld [smem:[#allocation21_spill]]  ;;  %vm814_vm5 = vcmask 130048   ;;  %vm843_vm7 = vcmask 64512  }
  0x2a   : > { %s2488_s4 = scalar_select %p673_p13, %s2455_s3, 1 }
  0x2b   : > { %s3069_s2 = sld [smem:[#allocation20_spill]] }
  0x2c   : > { %s1990_s30 = sshll.u32 %s2488_s4, 3  ;;  %s3071_s28 = sld [smem:[#allocation17_spill]] }
  0x2d   : > { %s3072_s29 = sld [smem:[#allocation18_spill]] }
  0x2e   : > { %s676_s18 = scalar_lea.vmem %s3066_s1, %s1990_s30  ;;  %s3067_s30 = sld [smem:[#allocation19_spill]] }
  0x2f   : > { %v2494_v0 = vld [vmem:[%s676_s18] sm:$0xff]  ;;  %v2186_v3 = vpop.eup %2185  ;;  %v789_v15 = vld [vmem:[%s3068_s6 + $0x18] sm:$0xff]  ;;  %v788_v17 = vld [vmem:[%s3068_s6 + $0x10] sm:$0xff]  ;;  %s3073_s8 = sld [smem:[#allocation23_spill]] }
  0x30   : > { %v690_v1 = vsel %vm689_vm0, %v2494_v0, 0.0  ;;  %v694_v4 = vmul.f32 32.0, %v2186_v3  ;;  %vm698_vm1 = vweird.f32 %v2186_v3  ;;  %806 = vmatpush.msra.mxu2 %v789_v15  ;;  %v787_v19 = vld [vmem:[%s3068_s6 + $0x8] sm:$0xff]  ;;  %v786_v21 = vld [vmem:[%s3068_s6] sm:$0xff]  ;;  %v2012_v46 = vld [vmem:[%s3068_s6 + $0x38] sm:$0xff]  ;;  %s3074_s9 = sld [smem:[#allocation24_spill]] }
  0x31   : > { %691 = vadd.xlane.f32.xlu0 %v690_v1  ;;  %s3070_s22 = smov %s3069_s2  ;;  %v761_v22 = vld [vmem:[%s3069_s2 + $0x18] sm:$0xff]  ;;  %v2011_v48 = vld [vmem:[%s3068_s6 + $0x30] sm:$0xff]  ;;  %v2010_v50 = vld [vmem:[%s3068_s6 + $0x28] sm:$0xff]  ;;  %s3075_s7 = sld [smem:[#allocation22_spill]] }
  0x32   : > { %v695_v5 = vsub.f32 1.0, %v694_v4  ;;  %807 = vmatpush.msra.mxu2 %v788_v17  ;;  %v2006_v23 = vld [vmem:[%s3070_s22 + $0x38] sm:$0xff]  ;;  %v760_v24 = vld [vmem:[%s3070_s22 + $0x10] sm:$0xff]  ;;  %v759_v26 = vld [vmem:[%s3070_s22 + $0x8] sm:$0xff]  ;;  %s3076_s0 = sld [smem:[#allocation16_spill]] }
  0x33   : > { %v2005_v25 = vld [vmem:[%s3070_s22 + $0x30] sm:$0xff]  ;;  %v2004_v27 = vld [vmem:[%s3070_s22 + $0x28] sm:$0xff]  ;;  %v758_v30 = vld [vmem:[%s3070_s22] sm:$0xff]  ;;  %s3077_s18 = sld [smem:[#allocation26_spill]] }
  0x34   : > { %v696_v6 = vmul.f32 %v2186_v3, %v695_v5  ;;  %v730_v14 = vld [vmem:[%s3067_s30 + $0x18] sm:$0xff]  ;;  %v729_v16 = vld [vmem:[%s3067_s30 + $0x10] sm:$0xff]  ;;  %v728_v18 = vld [vmem:[%s3067_s30 + $0x8] sm:$0xff]  ;;  %808 = vmatpush.msra.mxu2 %v787_v19  ;;  %v681_v5 = vlaneseq }
  0x35   : > { %750 = vmatpush.msra.mxu0 %v730_v14  ;;  %v727_v20 = vld [vmem:[%s3067_s30] sm:$0xff]  ;;  %v2000_v45 = vld [vmem:[%s3067_s30 + $0x38] sm:$0xff]  ;;  %v1999_v47 = vld [vmem:[%s3067_s30 + $0x30] sm:$0xff] }
  0x36   : > { %v697_v7 = vadd.f32 %v2186_v3, %v696_v6  ;;  %809 = vmatpush.msra.mxu2 %v786_v21  ;;  %v2003_v31 = vld [vmem:[%s3070_s22 + $0x20] sm:$0xff]  ;;  %v1998_v49 = vld [vmem:[%s3067_s30 + $0x28] sm:$0xff]  ;;  %v682_v6 = vshrl.u32 %v681_v5, 7 }
  0x37   : > { %751 = vmatpush.msra.mxu0 %v729_v16  ;;  %v2157_v39 = vld [vmem:[%s3071_s28] ss:$0 sm:$0xff]  ;;  %v2162_v61 = vld [vmem:[%s3073_s8 + $0x1] ss:$0 sm:$0xff] }
  0x38   : > { %v2498_v8 = vsel %vm698_vm1, %v2186_v3, %v697_v7  ;;  %945 = vmatpush.msrb.mxu2 %v2006_v23  ;;  %v2158_v41 = vld [vmem:[%s3072_s29] ss:$0 sm:$0xff]  ;;  %v2164_v2 = vld [vmem:[%s3074_s9 + $0x1] ss:$0 sm:$0xff]  ;;  %v684_v7 = vand.u32 127, %v681_v5  ;;  %s679_s23 = scalar_lea.vmem %s3076_s0, %s2488_s4  ;;  %s671_s4 = sand.u32 1, %s2311_s25  }
  0x39   : > { %752 = vmatpush.msra.mxu0 %v728_v18  ;;  %v1997_v51 = vld [vmem:[%s3067_s30 + $0x20] sm:$0xff]  ;;  %s1904_s26 = scalar_lea.hbm %s3077_s18, %s2455_s3  ;;  %s672_s21 = scalar_lea.vmem [#allocation5], %s671_s4 }
  0x3a   : > { %946 = vmatpush.msrb.mxu2 %v2005_v25  ;;  %v2009_v52 = vld [vmem:[%s3068_s6 + $0x20] sm:$0xff]  ;;  %vm685_vm6 = vcmp.le.s32.totalorder %v684_v7, %v682_v6  ;;  %s1906_s0 = sshll.u32 %s672_s21, 4  ;;  %s1896_s1 = scalar_lea.sflag [#allocation4], %s671_s4  ;;  %s1907_s0 = int_to_ptr.vmem [resolvable:$true] %s1906_s0 }
  0x3b   : > { %753 = vmatpush.msra.mxu0 %v727_v20  ;;  %v2161_v54 = vld [vmem:[%s3073_s8] ss:$0 sm:$0xff]  ;;  %v892_v20 = vld [vmem:[%s3019_s10 + $0x8] sm:$0xff] }
  0x3c   : > { %947 = vmatpush.msrb.mxu2 %v2004_v27  ;;  %v2160_v55 = vld [vmem:[%s3074_s9] ss:$0 sm:$0xff] }
  0x3d   : > { %778 = vmatpush.msrb.mxu0 %v761_v22  ;;  %v2159_v57 = vld [vmem:[%s3075_s7] ss:$0 sm:$0xff] }
  0x3e   : > { %948 = vmatpush.msrb.mxu2 %v2003_v31 }
  0x3f   : > { %779 = vmatpush.msrb.mxu0 %v760_v24 }
  0x41   : > { %780 = vmatpush.msrb.mxu0 %v759_v26 }
  0x43   : > { %781 = vmatpush.msrb.mxu0 %v758_v30 }
  0xa4   : > { %v692_v9 = vpop.xlane.xlu0 %691 }
  0xa5   : > { %v700_v10 = vmul.f32 %v2498_v8, %v692_v9 }
  0xa7   : > { %v701_v11 = vsub.f32 %v2494_v0, %v700_v10  ;;  %v2323_v10 = vmov -1e+09  }
  0xa9   : > { %v702_v12 = vmul.f32 %v701_v11, %v701_v11 }
  0xab   : > { %v703_v13 = vsel %vm689_vm0, %v702_v12, 0.0 }
  0xac   : > { %704 = vadd.xlane.f32.xlu0 %v703_v13 }
 0x11f   : > { %v705_v28 = vpop.xlane.xlu0 %704 }
 0x120   : > { %v706_v29 = vmul.f32 %v705_v28, %v2498_v8 }
 0x122   : > { %v707_v32 = vadd.f32 1e-05, %v706_v29 }
 0x124   : > { %2187 = vrsqrt.f32 %v707_v32  ;;  %vm714_vm3 = vweird.f32 %v707_v32 }
 0x12a   : > { %v2188_v33 = vpop.eup %2187 }
 0x12b   : > { %v709_v34 = vmul.f32 %v2188_v33, %v707_v32  ;;  %vm715_vm2 = vweird.f32 %v2188_v33 }
 0x12c   : > { %vm716_vm4 = vmor %vm714_vm3, %vm715_vm2 }
 0x12d   : > { %v710_v35 = vmul.f32 %v2188_v33, %v709_v34 }
 0x12f   : > { %v711_v36 = vmul.f32 0.5, %v710_v35 }
 0x131   : > { %v712_v37 = vsub.f32 1.5, %v711_v36  ;;  %v891_v36 = vld [vmem:[%s3019_s10] sm:$0xff] }
 0x133   : > { %v713_v38 = vmul.f32 %v2188_v33, %v712_v37 }
 0x135   : > { %v717_v40 = vsel %vm716_vm4, %v2188_v33, %v713_v38  ;;  %v2163_v33 = vld [vmem:[%s3075_s7 + $0x1] ss:$0 sm:$0xff] }
 0x136   : > { %v718_v42 = vmul.f32 %v717_v40, %v701_v11  ;;  %v2606_v11 = vsel %vm685_vm6, 0.0, %v2323_v10 }
 0x138   : > { %v722_v43 = vmul.f32 %v2157_v39, %v718_v42 }
 0x13a   : > { %v726_v44 = vadd.f32 %v2158_v41, %v722_v43 }
 0x13c   : > { %1991 = vmatmul.msk.f32.vlgmr.msra.gmra.mxu0 %vm689_vm0, %v726_v44  ;;  %1993 = vmatmul.msk.f32.vlgmr.msra.gmra.mxu2 %vm689_vm0, %v726_v44 }
 0x13d   : > { %915 = vmatpush.msra.mxu0 %v2000_v45  ;;  %975 = vmatpush.msra.mxu2 %v2012_v46 }
 0x13f   : > { %916 = vmatpush.msra.mxu0 %v1999_v47  ;;  %976 = vmatpush.msra.mxu2 %v2011_v48  ;;  %v2019_v47 = vld [vmem:[%s3019_s10 + $0x18] sm:$0xff] }
 0x140   : > { %1078 = vmatpush.msra.mxu1 %v2019_v47 }
 0x141   : > { %917 = vmatpush.msra.mxu0 %v1998_v49  ;;  %977 = vmatpush.msra.mxu2 %v2010_v50 }
 0x143   : > { %918 = vmatpush.msra.mxu0 %v1997_v51  ;;  %978 = vmatpush.msra.mxu2 %v2009_v52 }
 0x144   : > { %1992 = vmatmul.msk.f32.vlgmr.msrb.gmra.mxu0 %vm689_vm0, %v726_v44  ;;  %2008 = vmatmul.msk.f32.vlgmr.msrb.gmra.mxu2 %vm689_vm0, %v726_v44 }
 0x145   : > { %1101 = vmatpush.msrb.mxu2 %v892_v20 }
 0x147   : > { %1102 = vmatpush.msrb.mxu2 %v891_v36  ;;  %v1207_v36 = vld [vmem:[%s3025_s16 + $0x50] sm:$0xff] }
 0x14c   : > { %2002 = vmatmul.msk.f32.vlgmr.msra.gmra.mxu0 %vm689_vm0, %v726_v44  ;;  %2014 = vmatmul.msk.f32.vlgmr.msra.gmra.mxu2 %vm689_vm0, %v726_v44 }
 0x1b9   : > { %v755_v53 = vpop.f32.mrf.mxu0 }
 0x1ba   : > { %v756_v62 = vadd.f32 %v2159_v57, %v755_v53 }
 0x1bf   : > { %v811_v56 = vpop.f32.mrf.mxu2 }
 0x1c0   : > { %v812_v60 = vadd.f32 %v2160_v55, %v811_v56 }
 0x1c1   : > { %v783_v58 = vpop.f32.mrf.mxu0 }
 0x1c2   : > { %v784_v59 = vadd.f32 %v2161_v54, %v783_v58 }
 0x1c4   : > { %1994 = vmatpush.xpose.msk.msra.mxu3 %vm814_vm5, %v784_v59 }
 0x1c7   : > { %1995 = vmatmul.msk.f32.vlgmr.msra.gmra.mxu3 %vm814_vm5, %v756_v62  ;;  %v950_v63 = vpop.f32.mrf.mxu2 }
 0x1c8   : > { %886 = vmatpush.msrb.mxu3 %v812_v60  ;;  %v951_v1 = vadd.f32 %v2162_v61, %v950_v63  ;;  %v2018_v60 = vld [vmem:[%s3019_s10 + $0x10] sm:$0xff] }
 0x1c9   : > { %v920_v34 = vpop.f32.mrf.mxu0  ;;  %1079 = vmatpush.msra.mxu1 %v2018_v60 }
 0x1ca   : > { %2015 = vmatpush.xpose.msk.msra.mxu3 %vm814_vm5, %v951_v1  ;;  %v921_v35 = vadd.f32 %v2163_v33, %v920_v34  ;;  %v1210_v33 = vld [vmem:[%s3025_s16 + $0x68] sm:$0xff]  ;;  %v1209_v34 = vld [vmem:[%s3025_s16 + $0x60] sm:$0xff] }
 0x1cf   : > { %v980_v3 = vpop.f32.mrf.mxu2 }
 0x1d0   : > { %v981_v4 = vadd.f32 %v2164_v2, %v980_v3  ;;  %v2165_v2 = vld [vmem:[%s3020_s11] ss:$0 sm:$0xff] }
 0x1d2   : > { %1053 = vmatpush.msrb.mxu0 %v981_v4 }
 0x24a   : > { %v838_v9 = vpop.f32.mrf.mxu3 }
 0x24b   : > { %v841_v12 = vmul.f32 0.25, %v838_v9 }
 0x24d   : > { %v842_v13 = vadd.f32 %v841_v12, %v2606_v11 }
 0x24f   : > { %v844_v14 = vsel %vm843_vm7, %v842_v13, -inf }
 0x250   : > { %845 = vmax.xlane.f32.xlu1 %v844_v14  ;;  %v1146_v14 = vld [vmem:[%s3023_s14 + $0x8] sm:$0xff] }
 0x2c3   : > { %v846_v15 = vpop.xlane.xlu1 %845 }
 0x2c4   : > { %v847_v16 = vsub.f32 %v842_v13, %v846_v15  ;;  %v1148_v13 = vld [vmem:[%s3023_s14 + $0x18] sm:$0xff]  ;;  %v1145_v15 = vld [vmem:[%s3023_s14] sm:$0xff] }
 0x2c6   : > { %v848_v17 = vmul.f32 1.442695, %v847_v16 }
 0x2c8   : > { %2189 = vpow2.f32 %v848_v17 }
 0x2ce   : > { %v2190_v18 = vpop.eup %2189 }
 0x2cf   : > { %v850_v19 = vsel %vm843_vm7, %v2190_v18, 0.0 }
 0x2d0   : > { %851 = vadd.xlane.f32.xlu1 %v850_v19 }
 0x343   : > { %v852_v21 = vpop.xlane.xlu1 %851 }
 0x344   : > { %2191 = vrcp.f32 %v852_v21  ;;  %v864_v25 = vand.u32 2147483648, %v852_v21  ;;  %v862_v27 = vand.u32 2147483647, %v852_v21  ;;  %vm858_vm9 = vweird.f32 %v852_v21 }
 0x346   : > { %v865_v29 = vor.u32 1.1754944e-38, %v864_v25  ;;  %vm863_vm11 = vcmp.eq.f32.partialorder %v862_v27, 8.507059e+37  ;;  %v2166_v25 = vld [vmem:[%s3021_s12] ss:$0 sm:$0xff] }
 0x34a   : > { %v2192_v22 = vpop.eup %2191 }
 0x34b   : > { %v854_v23 = vmul.f32 %v2192_v22, %v852_v21  ;;  %vm859_vm8 = vweird.f32 %v2192_v22 }
 0x34c   : > { %vm860_vm10 = vmor %vm858_vm9, %vm859_vm8 }
 0x34d   : > { %v855_v24 = vsub.f32 1.0, %v854_v23 }
 0x34f   : > { %v856_v26 = vmul.f32 %v2192_v22, %v855_v24 }
 0x351   : > { %v857_v28 = vadd.f32 %v2192_v22, %v856_v26 }
 0x353   : > { %v861_v30 = vsel %vm860_vm10, %v2192_v22, %v857_v28  ;;  %v2167_v28 = vld [vmem:[%s3022_s13] ss:$0 sm:$0xff] }
 0x354   : > { %v866_v31 = vsel %vm863_vm11, %v865_v29, %v861_v30 }
 0x355   : > { %v867_v32 = vmul.f32 %v2190_v18, %v866_v31  ;;  %v1212_v31 = vld [vmem:[%s3025_s16 + $0x78] sm:$0xff] }
 0x356   : > { %1217 = vmatpush.msra.mxu0 %v1212_v31 }
 0x357   : > { %1996 = vmatmul.msk.f32.vlgmr.msrb.gmra.mxu3 %vm843_vm7, %v867_v32  ;;  %v1211_v32 = vld [vmem:[%s3025_s16 + $0x70] sm:$0xff] }
 0x358   : > { %1168 = vmatpush.msrb.mxu3 %v1148_v13  ;;  %1218 = vmatpush.msra.mxu0 %v1211_v32 }
 0x35a   : > { %1219 = vmatpush.msra.mxu0 %v1210_v33 }
 0x35c   : > { %1220 = vmatpush.msra.mxu0 %v1209_v34 }
 0x35f   : > { %2016 = vmatmul.msk.f32.vlgmr.msra.gmra.mxu3 %vm814_vm5, %v921_v35  ;;  %v1208_v35 = vld [vmem:[%s3025_s16 + $0x58] sm:$0xff] }
 0x360   : > { %1221 = vmatpush.msra.mxu0 %v1208_v35 }
 0x362   : > { %1222 = vmatpush.msra.mxu0 %v1207_v36 }
 0x3da   : > { %v888_v37 = vpop.f32.mrf.mxu3 }
 0x3db   : > { %2021 = vmatmul.msk.f32.vlgmr.msrb.gmra.mxu2 %vm814_vm5, %v888_v37  ;;  %v1206_v37 = vld [vmem:[%s3025_s16 + $0x48] sm:$0xff] }
 0x3dc   : > { %1223 = vmatpush.msra.mxu0 %v1206_v37 }
 0x3e2   : > { %v1006_v38 = vpop.f32.mrf.mxu3 }
 0x3e3   : > { %v1009_v39 = vmul.f32 0.25, %v1006_v38  ;;  %v1205_v38 = vld [vmem:[%s3025_s16 + $0x40] sm:$0xff] }
 0x3e4   : > { %1224 = vmatpush.msra.mxu0 %v1205_v38  ;;  %v2170_v38 = vld [vmem:[%s3071_s28 + $0x1] ss:$0 sm:$0xff] }
 0x3e5   : > { %v1010_v40 = vadd.f32 %v1009_v39, %v2606_v11  ;;  %v1204_v39 = vld [vmem:[%s3025_s16 + $0x38] sm:$0xff] }
 0x3e6   : > { %1225 = vmatpush.msra.mxu0 %v1204_v39 }
 0x3e7   : > { %v1011_v41 = vsel %vm843_vm7, %v1010_v40, -inf }
 0x3e8   : > { %1012 = vmax.xlane.f32.xlu2 %v1011_v41  ;;  %v1202_v41 = vld [vmem:[%s3025_s16 + $0x28] sm:$0xff] }
 0x45b   : > { %v1013_v42 = vpop.xlane.xlu2 %1012 }
 0x45c   : > { %v1014_v43 = vsub.f32 %v1010_v40, %v1013_v42  ;;  %v1203_v40 = vld [vmem:[%s3025_s16 + $0x30] sm:$0xff]  ;;  %v1201_v42 = vld [vmem:[%s3025_s16 + $0x20] sm:$0xff] }
 0x45d   : > { %1226 = vmatpush.msra.mxu0 %v1203_v40  ;;  %v2171_v40 = vld [vmem:[%s3072_s29 + $0x1] ss:$0 sm:$0xff] }
 0x45e   : > { %v1015_v44 = vmul.f32 1.442695, %v1014_v43  ;;  %v1104_v62 = vpop.f32.mrf.mxu2  ;;  %v1200_v43 = vld [vmem:[%s3025_s16 + $0x18] sm:$0xff] }
 0x45f   : > { %1227 = vmatpush.msra.mxu0 %v1202_v41 }
 0x460   : > { %2193 = vpow2.f32 %v1015_v44  ;;  %v2168_v44 = vld [vmem:[%s3024_s15] ss:$0 sm:$0xff] }
 0x461   : > { %1228 = vmatpush.msra.mxu0 %v1201_v42 }
 0x463   : > { %1229 = vmatpush.msra.mxu0 %v1200_v43 }
 0x466   : > { %v2194_v45 = vpop.eup %2193 }
 0x467   : > { %v1017_v46 = vsel %vm843_vm7, %v2194_v45, 0.0 }
 0x468   : > { %1018 = vadd.xlane.f32.xlu2 %v1017_v46  ;;  %v1198_v46 = vld [vmem:[%s3025_s16 + $0x8] sm:$0xff] }
 0x4db   : > { %v1019_v48 = vpop.xlane.xlu2 %1018 }
 0x4dc   : > { %2195 = vrcp.f32 %v1019_v48  ;;  %v1031_v52 = vand.u32 2147483648, %v1019_v48  ;;  %v1029_v54 = vand.u32 2147483647, %v1019_v48  ;;  %vm1025_vm13 = vweird.f32 %v1019_v48 }
 0x4de   : > { %v1032_v56 = vor.u32 1.1754944e-38, %v1031_v52  ;;  %vm1030_vm15 = vcmp.eq.f32.partialorder %v1029_v54, 8.507059e+37 }
 0x4e2   : > { %v2196_v49 = vpop.eup %2195 }
 0x4e3   : > { %v1021_v50 = vmul.f32 %v2196_v49, %v1019_v48  ;;  %vm1026_vm12 = vweird.f32 %v2196_v49 }
 0x4e4   : > { %vm1027_vm14 = vmor %vm1025_vm13, %vm1026_vm12 }
 0x4e5   : > { %v1022_v51 = vsub.f32 1.0, %v1021_v50 }
 0x4e7   : > { %v1023_v53 = vmul.f32 %v2196_v49, %v1022_v51 }
 0x4e9   : > { %v1024_v55 = vadd.f32 %v2196_v49, %v1023_v53 }
 0x4eb   : > { %v1028_v57 = vsel %vm1027_vm14, %v2196_v49, %v1024_v55  ;;  %v1197_v49 = vld [vmem:[%s3025_s16] sm:$0xff] }
 0x4ec   : > { %v1033_v58 = vsel %vm1030_vm15, %v1032_v56, %v1028_v57 }
 0x4ed   : > { %v1034_v59 = vmul.f32 %v2194_v45, %v1033_v58  ;;  %v1199_v45 = vld [vmem:[%s3025_s16 + $0x10] sm:$0xff] }
 0x4ee   : > { %1230 = vmatpush.msra.mxu0 %v1199_v45  ;;  %v2174_v45 = vld [vmem:[%s3074_s9 + $0x2] ss:$0 sm:$0xff] }
 0x4ef   : > { %2017 = vmatmul.msk.f32.vlgmr.msrb.gmra.mxu0 %vm843_vm7, %v1034_v59 }
 0x4f0   : > { %1231 = vmatpush.msra.mxu0 %v1198_v46  ;;  %v2172_v46 = vld [vmem:[%s3075_s7 + $0x2] ss:$0 sm:$0xff] }
 0x4f2   : > { %1232 = vmatpush.msra.mxu0 %v1197_v49 }
 0x56c   : > { %v1055_v61 = vpop.f32.mrf.mxu0 }
 0x56d   : > { %2020 = vmatmul.msk.f32.vlgmr.msra.gmra.mxu1 %vm814_vm5, %v1055_v61 }
 0x5ea   : > { %v1081_v63 = vpop.f32.mrf.mxu1 }
 0x5eb   : > { %v1105_v1 = vadd.f32 %v1104_v62, %v1081_v63 }
 0x5ed   : > { %v1107_v3 = vadd.f32 %v1105_v1, %v2494_v0  ;;  %v1147_v0 = vld [vmem:[%s3023_s14 + $0x10] sm:$0xff] }
 0x5ee   : > { %1169 = vmatpush.msrb.mxu3 %v1147_v0 }
 0x5ef   : > { %v2638_v4 = vadd.f32 %v2165_v2, %v1107_v3  ;;  %v2169_v2 = vld [vmem:[%s3026_s17] ss:$0 sm:$0xff] }
 0x5f0   : > { %1170 = vmatpush.msrb.mxu3 %v1146_v14  ;;  %v2029_v14 = vld [vmem:[%s3067_s30 + $0x58] sm:$0xff] }
 0x5f1   : > { %v1115_v5 = vsel %vm689_vm0, %v2638_v4, 0.0  ;;  %1297 = vmatpush.msrb.mxu1 %v2029_v14 }
 0x5f2   : > { %1116 = vadd.xlane.f32.xlu0 %v1115_v5  ;;  %1171 = vmatpush.msrb.mxu3 %v1145_v15  ;;  %v2041_v15 = vld [vmem:[%s3068_s6 + $0x58] sm:$0xff] }
 0x5f4   : > { %1357 = vmatpush.msra.mxu3 %v2041_v15  ;;  %v2064_v15 = vld [vmem:[%s3068_s6 + $0x78] sm:$0xff] }
 0x665   : > { %v1117_v6 = vpop.xlane.xlu0 %1116 }
 0x666   : > { %v1118_v7 = vmul.f32 %v1117_v6, %v2498_v8 }
 0x668   : > { %v1119_v9 = vsub.f32 %v2638_v4, %v1118_v7 }
 0x66a   : > { %v1120_v10 = vmul.f32 %v1119_v9, %v1119_v9 }
 0x66c   : > { %v1121_v12 = vsel %vm689_vm0, %v1120_v10, 0.0 }
 0x66d   : > { %1122 = vadd.xlane.f32.xlu1 %v1121_v12 }
 0x6e0   : > { %v1123_v16 = vpop.xlane.xlu1 %1122 }
 0x6e1   : > { %v1124_v17 = vmul.f32 %v1123_v16, %v2498_v8  ;;  %v2028_v16 = vld [vmem:[%s3067_s30 + $0x50] sm:$0xff] }
 0x6e2   : > { %1298 = vmatpush.msrb.mxu1 %v2028_v16  ;;  %v2063_v16 = vld [vmem:[%s3068_s6 + $0x70] sm:$0xff] }
 0x6e3   : > { %v1125_v18 = vadd.f32 1e-05, %v1124_v17  ;;  %v2034_v17 = vld [vmem:[%s3070_s22 + $0x50] sm:$0xff] }
 0x6e5   : > { %2197 = vrsqrt.f32 %v1125_v18  ;;  %vm1132_vm2 = vweird.f32 %v1125_v18 }
 0x6eb   : > { %v2198_v19 = vpop.eup %2197 }
 0x6ec   : > { %v1127_v20 = vmul.f32 %v2198_v19, %v1125_v18  ;;  %vm1133_vm1 = vweird.f32 %v2198_v19  ;;  %v2040_v18 = vld [vmem:[%s3068_s6 + $0x50] sm:$0xff] }
 0x6ed   : > { %vm1134_vm3 = vmor %vm1132_vm2, %vm1133_vm1  ;;  %1358 = vmatpush.msra.mxu3 %v2040_v18 }
 0x6ee   : > { %v1128_v21 = vmul.f32 %v2198_v19, %v1127_v20  ;;  %v2033_v20 = vld [vmem:[%s3070_s22 + $0x48] sm:$0xff] }
 0x6f0   : > { %v1129_v22 = vmul.f32 0.5, %v1128_v21  ;;  %v2039_v21 = vld [vmem:[%s3068_s6 + $0x48] sm:$0xff] }
 0x6f1   : > { %1359 = vmatpush.msra.mxu3 %v2039_v21 }
 0x6f2   : > { %v1130_v23 = vsub.f32 1.5, %v1129_v22  ;;  %v2026_v22 = vld [vmem:[%s3067_s30 + $0x40] sm:$0xff] }
 0x6f4   : > { %v1131_v24 = vmul.f32 %v2198_v19, %v1130_v23  ;;  %v2032_v23 = vld [vmem:[%s3070_s22 + $0x40] sm:$0xff] }
 0x6f6   : > { %v1135_v26 = vsel %vm1134_vm3, %v2198_v19, %v1131_v24  ;;  %v2027_v19 = vld [vmem:[%s3067_s30 + $0x48] sm:$0xff]  ;;  %v2038_v24 = vld [vmem:[%s3068_s6 + $0x40] sm:$0xff] }
 0x6f7   : > { %v1136_v27 = vmul.f32 %v1135_v26, %v1119_v9  ;;  %1299 = vmatpush.msrb.mxu1 %v2027_v19  ;;  %1360 = vmatpush.msra.mxu3 %v2038_v24  ;;  %v2051_v26 = vld [vmem:[%s3067_s30 + $0x70] sm:$0xff] }
 0x6f9   : > { %v1140_v29 = vmul.f32 %v2166_v25, %v1136_v27  ;;  %1300 = vmatpush.msrb.mxu1 %v2026_v22  ;;  %v2052_v25 = vld [vmem:[%s3067_s30 + $0x78] sm:$0xff] }
 0x6fb   : > { %v1144_v30 = vadd.f32 %v2167_v28, %v1140_v29  ;;  %v2050_v28 = vld [vmem:[%s3067_s30 + $0x68] sm:$0xff] }
 0x6fd   : > { %2022 = vmatmul.msk.f32.vlgmr.msrb.gmra.mxu3 %vm689_vm0, %v1144_v30  ;;  %v2049_v30 = vld [vmem:[%s3067_s30 + $0x60] sm:$0xff] }
 0x6fe   : > { %1465 = vmatpush.msrb.mxu3 %v2052_v25 }
 0x700   : > { %1466 = vmatpush.msrb.mxu3 %v2051_v26 }
 0x702   : > { %1467 = vmatpush.msrb.mxu3 %v2050_v28 }
 0x704   : > { %1468 = vmatpush.msrb.mxu3 %v2049_v30 }
 0x780   : > { %v1173_v47 = vpop.f32.mrf.mxu3 }
 0x781   : > { %v1174_v48 = vadd.f32 %v2168_v44, %v1173_v47  ;;  %v2173_v44 = vld [vmem:[%s3073_s8 + $0x2] ss:$0 sm:$0xff] }
 0x783   : > { %v2023_v50 = vmul.f32 -1.702, %v1174_v48 }
 0x785   : > { %v1178_v51 = vmul.f32 1.442695, %v2023_v50 }
 0x787   : > { %2199 = vpow2.f32 %v1178_v51  ;;  %v2058_v51 = vld [vmem:[%s3070_s22 + $0x78] sm:$0xff] }
 0x78d   : > { %v2200_v52 = vpop.eup %2199 }
 0x78e   : > { %v1180_v53 = vadd.f32 1.0, %v2200_v52 }
 0x790   : > { %2201 = vrcp.f32 %v1180_v53  ;;  %v1192_v57 = vand.u32 2147483648, %v1180_v53  ;;  %v1190_v59 = vand.u32 2147483647, %v1180_v53  ;;  %vm1186_vm6 = vweird.f32 %v1180_v53 }
 0x792   : > { %v1193_v61 = vor.u32 1.1754944e-38, %v1192_v57  ;;  %vm1191_vm9 = vcmp.eq.f32.partialorder %v1190_v59, 8.507059e+37 }
 0x796   : > { %v2202_v54 = vpop.eup %2201 }
 0x797   : > { %v1182_v55 = vmul.f32 %v2202_v54, %v1180_v53  ;;  %vm1187_vm4 = vweird.f32 %v2202_v54 }
 0x798   : > { %vm1188_vm8 = vmor %vm1186_vm6, %vm1187_vm4 }
 0x799   : > { %v1183_v56 = vsub.f32 1.0, %v1182_v55  ;;  %v2056_v55 = vld [vmem:[%s3070_s22 + $0x68] sm:$0xff] }
 0x79b   : > { %v1184_v58 = vmul.f32 %v2202_v54, %v1183_v56  ;;  %v2055_v56 = vld [vmem:[%s3070_s22 + $0x60] sm:$0xff] }
 0x79d   : > { %v1185_v60 = vadd.f32 %v2202_v54, %v1184_v58 }
 0x79f   : > { %v1189_v62 = vsel %vm1188_vm8, %v2202_v54, %v1185_v60  ;;  %v2057_v54 = vld [vmem:[%s3070_s22 + $0x70] sm:$0xff] }
 0x7a0   : > { %v1194_v63 = vsel %vm1191_vm9, %v1193_v61, %v1189_v62  ;;  %v2176_v61 = vld [vmem:[%s3073_s8 + $0x3] ss:$0 sm:$0xff] }
 0x7a1   : > { %v1196_v1 = vmul.f32 %v1194_v63, %v1174_v48  ;;  %v2175_v62 = vld [vmem:[%s3075_s7 + $0x3] ss:$0 sm:$0xff] }
 0x7a3   : > { %1233 = vmatmul.f32.vlgmr.msra.gmra.mxu0 %v1196_v1 }
 0x820   : > { %v1234_v3 = vpop.f32.mrf.mxu0 }
 0x821   : > { %v1235_v5 = vadd.f32 %v2169_v2, %v1234_v3 }
 0x823   : > { %v2720_v6 = vadd.f32 %v1235_v5, %v2638_v4  ;;  %v2035_v4 = vld [vmem:[%s3070_s22 + $0x58] sm:$0xff] }
 0x824   : > { %1327 = vmatpush.msra.mxu2 %v2035_v4 }
 0x825   : > { %v1242_v7 = vsel %vm689_vm0, %v2720_v6, 0.0 }
 0x826   : > { %1243 = vadd.xlane.f32.xlu2 %v1242_v7  ;;  %1328 = vmatpush.msra.mxu2 %v2034_v17  ;;  %v2062_v17 = vld [vmem:[%s3068_s6 + $0x68] sm:$0xff] }
 0x828   : > { %1329 = vmatpush.msra.mxu2 %v2033_v20 }
 0x82a   : > { %1330 = vmatpush.msra.mxu2 %v2032_v23 }
 0x899   : > { %v1244_v9 = vpop.xlane.xlu2 %1243 }
 0x89a   : > { %v1245_v10 = vmul.f32 %v1244_v9, %v2498_v8 }
 0x89c   : > { %v1246_v12 = vsub.f32 %v2720_v6, %v1245_v10 }
 0x89e   : > { %v1247_v13 = vmul.f32 %v1246_v12, %v1246_v12 }
 0x8a0   : > { %v1248_v0 = vsel %vm689_vm0, %v1247_v13, 0.0 }
 0x8a1   : > { %1249 = vadd.xlane.f32.xlu0 %v1248_v0 }
 0x914   : > { %v1250_v27 = vpop.xlane.xlu0 %1249 }
 0x915   : > { %v1251_v29 = vmul.f32 %v1250_v27, %v2498_v8 }
 0x917   : > { %v1252_v31 = vadd.f32 1e-05, %v1251_v29 }
 0x919   : > { %2203 = vrsqrt.f32 %v1252_v31  ;;  %vm1259_vm11 = vweird.f32 %v1252_v31 }
 0x91f   : > { %v2204_v32 = vpop.eup %2203 }
 0x920   : > { %v1254_v33 = vmul.f32 %v2204_v32, %v1252_v31  ;;  %vm1260_vm10 = vweird.f32 %v2204_v32 }
 0x921   : > { %vm1261_vm12 = vmor %vm1259_vm11, %vm1260_vm10 }
 0x922   : > { %v1255_v34 = vmul.f32 %v2204_v32, %v1254_v33 }
 0x924   : > { %v1256_v35 = vmul.f32 0.5, %v1255_v34 }
 0x926   : > { %v1257_v36 = vsub.f32 1.5, %v1256_v35  ;;  %v2048_v35 = vld [vmem:[%s3019_s10 + $0x28] sm:$0xff] }
 0x928   : > { %v1258_v37 = vmul.f32 %v2204_v32, %v1257_v36  ;;  %v2047_v36 = vld [vmem:[%s3019_s10 + $0x20] sm:$0xff] }
 0x92a   : > { %v1262_v39 = vsel %vm1261_vm12, %v2204_v32, %v1258_v37 }
 0x92b   : > { %v1263_v41 = vmul.f32 %v1262_v39, %v1246_v12 }
 0x92d   : > { %v1267_v42 = vmul.f32 %v2170_v38, %v1263_v41 }
 0x92f   : > { %v2782_v43 = vadd.f32 %v2171_v40, %v1267_v42 }
 0x931   : > { %2031 = vmatmul.msk.f32.vlgmr.msrb.gmra.mxu1 %vm689_vm0, %v2782_v43  ;;  %2037 = vmatmul.msk.f32.vlgmr.msra.gmra.mxu2 %vm689_vm0, %v2782_v43 }
 0x932   : > { %2043 = vmatmul.msk.f32.vlgmr.msra.gmra.mxu3 %vm689_vm0, %v2782_v43 }
 0x93a   : > { %2054 = vmatmul.msk.f32.vlgmr.msrb.gmra.mxu3 %vm689_vm0, %v2782_v43 }
 0x9ae   : > { %v1302_v48 = vpop.f32.mrf.mxu1 }
 0x9af   : > { %v1303_v53 = vadd.f32 %v2172_v46, %v1302_v48 }
 0x9b4   : > { %v1332_v47 = vpop.f32.mrf.mxu2 }
 0x9b5   : > { %v1333_v49 = vadd.f32 %v2173_v44, %v1332_v47  ;;  %v1362_v50 = vpop.f32.mrf.mxu3 }
 0x9b6   : > { %v1363_v52 = vadd.f32 %v2174_v45, %v1362_v50 }
 0x9b7   : > { %2044 = vmatpush.xpose.msk.msra.mxu1 %vm814_vm5, %v1333_v49 }
 0x9b8   : > { %1435 = vmatpush.msrb.mxu2 %v1363_v52 }
 0x9ba   : > { %2045 = vmatmul.msk.f32.vlgmr.msra.gmra.mxu1 %vm814_vm5, %v1303_v53  ;;  %1525 = vmatpush.msra.mxu2 %v2064_v15  ;;  %v2071_v53 = vld [vmem:[%s3019_s10 + $0x38] sm:$0xff] }
 0x9bb   : > { %1495 = vmatpush.msrb.mxu1 %v2058_v51 }
 0x9bc   : > { %1526 = vmatpush.msra.mxu2 %v2063_v16 }
 0x9bd   : > { %1496 = vmatpush.msrb.mxu1 %v2057_v54  ;;  %v1470_v1 = vpop.f32.mrf.mxu3  ;;  %v2070_v54 = vld [vmem:[%s3019_s10 + $0x30] sm:$0xff] }
 0x9be   : > { %v1471_v3 = vadd.f32 %v2175_v62, %v1470_v1  ;;  %1527 = vmatpush.msra.mxu2 %v2062_v17 }
 0x9bf   : > { %1497 = vmatpush.msrb.mxu1 %v2056_v55 }
 0x9c1   : > { %1498 = vmatpush.msrb.mxu1 %v2055_v56 }
 0x9c2   : > { %2060 = vmatmul.msk.f32.vlgmr.msrb.gmra.mxu1 %vm689_vm0, %v2782_v43 }
 0xa37   : > { %v1388_v57 = vpop.f32.mrf.mxu1 }
 0xa38   : > { %v1391_v58 = vmul.f32 0.25, %v1388_v57 }
 0xa3a   : > { %v1392_v59 = vadd.f32 %v1391_v58, %v2606_v11 }
 0xa3c   : > { %v1393_v60 = vsel %vm843_vm7, %v1392_v59, -inf }
 0xa3d   : > { %1394 = vmax.xlane.f32.xlu1 %v1393_v60 }
 0xa3f   : > { %v1500_v63 = vpop.f32.mrf.mxu1 }
 0xa40   : > { %v1501_v2 = vadd.f32 %v2176_v61, %v1500_v63 }
 0xa42   : > { %2067 = vmatpush.xpose.msk.msra.mxu3 %vm814_vm5, %v1501_v2 }
 0xa45   : > { %2068 = vmatmul.msk.f32.vlgmr.msra.gmra.mxu3 %vm814_vm5, %v1471_v3 }
 0xa46   : > { %1651 = vmatpush.msrb.mxu3 %v2048_v35  ;;  %v2088_v35 = vld [vmem:[%s3025_s16 + $0xa0] sm:$0xff] }
 0xa48   : > { %1652 = vmatpush.msrb.mxu3 %v2047_v36  ;;  %v2087_v36 = vld [vmem:[%s3025_s16 + $0x98] sm:$0xff] }
 0xab0   : > { %v1395_v5 = vpop.xlane.xlu1 %1394 }
 0xab1   : > { %v1396_v7 = vsub.f32 %v1392_v59, %v1395_v5  ;;  %v2178_v59 = vld [vmem:[%s3020_s11 + $0x1] ss:$0 sm:$0xff] }
 0xab3   : > { %v1397_v9 = vmul.f32 1.442695, %v1396_v7  ;;  %v2080_v7 = vld [vmem:[%s3023_s14 + $0x38] sm:$0xff] }
 0xab4   : > { %1723 = vmatpush.msrb.mxu0 %v2080_v7 }
 0xab5   : > { %2205 = vpow2.f32 %v1397_v9  ;;  %v2078_v9 = vld [vmem:[%s3023_s14 + $0x28] sm:$0xff] }
 0xabb   : > { %v2206_v10 = vpop.eup %2205 }
 0xabc   : > { %v1399_v12 = vsel %vm843_vm7, %v2206_v10, 0.0 }
 0xabd   : > { %1400 = vadd.xlane.f32.xlu2 %v1399_v12 }
 0xac8   : > { %v1556_v13 = vpop.f32.mrf.mxu3 }
 0xac9   : > { %v1559_v0 = vmul.f32 0.25, %v1556_v13 }
 0xacb   : > { %v1560_v14 = vadd.f32 %v1559_v0, %v2606_v11  ;;  %v2061_v11 = vld [vmem:[%s3068_s6 + $0x60] sm:$0xff]  ;;  %s2273_s6 = scalar_lea.hbm %s3077_s18, 2 }
 0xacc   : > { %1528 = vmatpush.msra.mxu2 %v2061_v11 }
 0xacd   : > { %v1561_v4 = vsel %vm843_vm7, %v1560_v14, -inf }
 0xace   : > { %1562 = vmax.xlane.f32.xlu0 %v1561_v4 }
 0xb30   : > { %v1401_v18 = vpop.xlane.xlu2 %1400 }
 0xb31   : > { %2207 = vrcp.f32 %v1401_v18  ;;  %v1413_v22 = vand.u32 2147483648, %v1401_v18  ;;  %v1411_v24 = vand.u32 2147483647, %v1401_v18  ;;  %vm1407_vm14 = vweird.f32 %v1401_v18 }
 0xb33   : > { %v1414_v26 = vor.u32 1.1754944e-38, %v1413_v22  ;;  %vm1412_vm1 = vcmp.eq.f32.partialorder %v1411_v24, 8.507059e+37  ;;  %v2099_v24 = vld [vmem:[%s3025_s16 + $0xf8] sm:$0xff] }
 0xb37   : > { %v2208_v19 = vpop.eup %2207 }
 0xb38   : > { %v1403_v20 = vmul.f32 %v2208_v19, %v1401_v18  ;;  %vm1408_vm13 = vweird.f32 %v2208_v19  ;;  %v2179_v18 = vld [vmem:[%s3021_s12 + $0x1] ss:$0 sm:$0xff] }
 0xb39   : > { %vm1409_vm15 = vmor %vm1407_vm14, %vm1408_vm13 }
 0xb3a   : > { %v1404_v21 = vsub.f32 1.0, %v1403_v20 }
 0xb3c   : > { %v1405_v23 = vmul.f32 %v2208_v19, %v1404_v21  ;;  %v2180_v21 = vld [vmem:[%s3022_s13 + $0x1] ss:$0 sm:$0xff] }
 0xb3e   : > { %v1406_v25 = vadd.f32 %v2208_v19, %v1405_v23 }
 0xb40   : > { %v1410_v27 = vsel %vm1409_vm15, %v2208_v19, %v1406_v25  ;;  %v2098_v25 = vld [vmem:[%s3025_s16 + $0xf0] sm:$0xff] }
 0xb41   : > { %v1415_v28 = vsel %vm1412_vm1, %v1414_v26, %v1410_v27  ;;  %v1563_v29 = vpop.xlane.xlu0 %1562  ;;  %v2097_v26 = vld [vmem:[%s3025_s16 + $0xe8] sm:$0xff]  ;;  %v2096_v27 = vld [vmem:[%s3025_s16 + $0xe0] sm:$0xff] }
 0xb42   : > { %v1564_v30 = vsub.f32 %v1560_v14, %v1563_v29  ;;  %v1416_v31 = vmul.f32 %v2206_v10, %v1415_v28  ;;  %v2077_v10 = vld [vmem:[%s3023_s14 + $0x20] sm:$0xff]  ;;  %v2095_v28 = vld [vmem:[%s3025_s16 + $0xd8] sm:$0xff]  ;;  %v2094_v29 = vld [vmem:[%s3025_s16 + $0xd0] sm:$0xff] }
 0xb44   : > { %v1565_v32 = vmul.f32 1.442695, %v1564_v30  ;;  %2046 = vmatmul.msk.f32.vlgmr.msrb.gmra.mxu2 %vm843_vm7, %v1416_v31  ;;  %v2093_v30 = vld [vmem:[%s3025_s16 + $0xc8] sm:$0xff]  ;;  %v2092_v31 = vld [vmem:[%s3025_s16 + $0xc0] sm:$0xff] }
 0xb45   : > { %1628 = vmatpush.msrb.mxu2 %v2071_v53 }
 0xb46   : > { %2209 = vpow2.f32 %v1565_v32  ;;  %v2091_v32 = vld [vmem:[%s3025_s16 + $0xb8] sm:$0xff] }
 0xb47   : > { %1629 = vmatpush.msrb.mxu2 %v2070_v54 }
 0xb4c   : > { %v2210_v33 = vpop.eup %2209  ;;  %2066 = vmatmul.msk.f32.vlgmr.msra.gmra.mxu2 %vm689_vm0, %v2782_v43  ;;  %v2177_v43 = vld [vmem:[%s3074_s9 + $0x3] ss:$0 sm:$0xff] }
 0xb4d   : > { %v1567_v34 = vsel %vm843_vm7, %v2210_v33, 0.0 }
 0xb4e   : > { %1568 = vadd.xlane.f32.xlu1 %v1567_v34  ;;  %v2089_v34 = vld [vmem:[%s3025_s16 + $0xa8] sm:$0xff] }
 0xbc1   : > { %v1569_v37 = vpop.xlane.xlu1 %1568 }
 0xbc2   : > { %2211 = vrcp.f32 %v1569_v37  ;;  %v1581_v42 = vand.u32 2147483648, %v1569_v37  ;;  %v1579_v45 = vand.u32 2147483647, %v1569_v37  ;;  %vm1575_vm3 = vweird.f32 %v1569_v37 }
 0xbc4   : > { %v1582_v48 = vor.u32 1.1754944e-38, %v1581_v42  ;;  %vm1580_vm6 = vcmp.eq.f32.partialorder %v1579_v45, 8.507059e+37  ;;  %v2084_v42 = vld [vmem:[%s3025_s16 + $0x80] sm:$0xff] }
 0xbc7   : > { %v1437_v38 = vpop.f32.mrf.mxu2 }
 0xbc8   : > { %v2212_v39 = vpop.eup %2211  ;;  %2073 = vmatmul.msk.f32.vlgmr.msrb.gmra.mxu3 %vm814_vm5, %v1437_v38  ;;  %v2086_v38 = vld [vmem:[%s3025_s16 + $0x90] sm:$0xff] }
 0xbc9   : > { %v1571_v40 = vmul.f32 %v2212_v39, %v1569_v37  ;;  %vm1576_vm2 = vweird.f32 %v2212_v39  ;;  %v2181_v37 = vld [vmem:[%s3024_s15 + $0x1] ss:$0 sm:$0xff] }
 0xbca   : > { %vm1577_vm4 = vmor %vm1575_vm3, %vm1576_vm2  ;;  %vm1879_vm2 = vcmask 253952  }
 0xbcb   : > { %v1572_v41 = vsub.f32 1.0, %v1571_v40  ;;  %v2085_v40 = vld [vmem:[%s3025_s16 + $0x88] sm:$0xff] }
 0xbcd   : > { %v1573_v44 = vmul.f32 %v2212_v39, %v1572_v41 }
 0xbcf   : > { %v1574_v46 = vadd.f32 %v2212_v39, %v1573_v44  ;;  %v1530_v47 = vpop.f32.mrf.mxu2 }
 0xbd0   : > { %v1531_v49 = vadd.f32 %v2177_v43, %v1530_v47 }
 0xbd1   : > { %v1578_v50 = vsel %vm1577_vm4, %v2212_v39, %v1574_v46 }
 0xbd2   : > { %v1583_v51 = vsel %vm1580_vm6, %v1582_v48, %v1578_v50  ;;  %1603 = vmatpush.msra.mxu1 %v1531_v49 }
 0xbd3   : > { %v1584_v52 = vmul.f32 %v2210_v33, %v1583_v51  ;;  %v2090_v33 = vld [vmem:[%s3025_s16 + $0xb0] sm:$0xff] }
 0xbd4   : > { %1774 = vmatpush.msrb.mxu1 %v2099_v24 }
 0xbd5   : > { %2069 = vmatmul.msk.f32.vlgmr.msra.gmra.mxu1 %vm843_vm7, %v1584_v52 }
 0xbd6   : > { %1775 = vmatpush.msrb.mxu1 %v2098_v25 }
 0xbd8   : > { %1776 = vmatpush.msrb.mxu1 %v2097_v26 }
 0xbda   : > { %1777 = vmatpush.msrb.mxu1 %v2096_v27 }
 0xbdc   : > { %1778 = vmatpush.msrb.mxu1 %v2095_v28 }
 0xbde   : > { %1779 = vmatpush.msrb.mxu1 %v2094_v29 }
 0xbe0   : > { %1780 = vmatpush.msrb.mxu1 %v2093_v30 }
 0xbe2   : > { %1781 = vmatpush.msrb.mxu1 %v2092_v31 }
 0xbe4   : > { %1782 = vmatpush.msrb.mxu1 %v2091_v32 }
 0xbe6   : > { %1783 = vmatpush.msrb.mxu1 %v2090_v33 }
 0xbe8   : > { %1784 = vmatpush.msrb.mxu1 %v2089_v34 }
 0xbea   : > { %1785 = vmatpush.msrb.mxu1 %v2088_v35 }
 0xbec   : > { %1786 = vmatpush.msrb.mxu1 %v2087_v36 }
 0xbee   : > { %1787 = vmatpush.msrb.mxu1 %v2086_v38 }
 0xbf0   : > { %1788 = vmatpush.msrb.mxu1 %v2085_v40 }
 0xbf2   : > { %1789 = vmatpush.msrb.mxu1 %v2084_v42 }
 0xc4b   : > { %v1654_v56 = vpop.f32.mrf.mxu3 }
 0xc52   : > { %v1605_v55 = vpop.f32.mrf.mxu1 }
 0xc53   : > { %2072 = vmatmul.msk.f32.vlgmr.msrb.gmra.mxu2 %vm814_vm5, %v1605_v55 }
 0xcd6   : > { %v1631_v57 = vpop.f32.mrf.mxu2 }
 0xcd7   : > { %v1655_v58 = vadd.f32 %v1654_v56, %v1631_v57 }
 0xcd9   : > { %v1657_v60 = vadd.f32 %v1655_v58, %v2720_v6  ;;  %v2079_v6 = vld [vmem:[%s3023_s14 + $0x30] sm:$0xff]  ;;  %v2182_v58 = vld [vmem:[%s3026_s17 + $0x1] ss:$0 sm:$0xff] }
 0xcda   : > { %1724 = vmatpush.msrb.mxu0 %v2079_v6  ;;  %v1854_v6 = vld [vmem:[%s3029_s20 + $0x18] sm:$0xff] }
 0xcdb   : > { %v2868_v61 = vadd.f32 %v2178_v59, %v1657_v60  ;;  %1870 = vmatpush.msra.mxu3 %v1854_v6 }
 0xcdc   : > { %1725 = vmatpush.msrb.mxu0 %v2078_v9  ;;  %v1853_v9 = vld [vmem:[%s3029_s20 + $0x10] sm:$0xff] }
 0xcdd   : > { %v1668_v62 = vsel %vm689_vm0, %v2868_v61, 0.0  ;;  %1871 = vmatpush.msra.mxu3 %v1853_v9 }
 0xcde   : > { %1669 = vadd.xlane.f32.xlu2 %v1668_v62  ;;  %1726 = vmatpush.msrb.mxu0 %v2077_v10  ;;  %v1852_v10 = vld [vmem:[%s3029_s20 + $0x8] sm:$0xff] }
 0xcdf   : > { %1872 = vmatpush.msra.mxu3 %v1852_v10 }
 0xd51   : > { %v1670_v63 = vpop.xlane.xlu2 %1669 }
 0xd52   : > { %v1671_v1 = vmul.f32 %v1670_v63, %v2498_v8 }
 0xd54   : > { %v1672_v2 = vsub.f32 %v2868_v61, %v1671_v1 }
 0xd56   : > { %v1673_v3 = vmul.f32 %v1672_v2, %v1672_v2 }
 0xd58   : > { %v1674_v5 = vsel %vm689_vm0, %v1673_v3, 0.0 }
 0xd59   : > { %1675 = vadd.xlane.f32.xlu0 %v1674_v5 }
 0xdcc   : > { %v1676_v12 = vpop.xlane.xlu0 %1675 }
 0xdcd   : > { %v1677_v13 = vmul.f32 %v1676_v12, %v2498_v8 }
 0xdcf   : > { %v1678_v0 = vadd.f32 1e-05, %v1677_v13 }
 0xdd1   : > { %2213 = vrsqrt.f32 %v1678_v0  ;;  %vm1685_vm8 = vweird.f32 %v1678_v0 }
 0xdd7   : > { %v2214_v14 = vpop.eup %2213 }
 0xdd8   : > { %v1680_v4 = vmul.f32 %v2214_v14, %v1678_v0  ;;  %vm1686_vm5 = vweird.f32 %v2214_v14 }
 0xdd9   : > { %vm1687_vm9 = vmor %vm1685_vm8, %vm1686_vm5 }
 0xdda   : > { %v1681_v15 = vmul.f32 %v2214_v14, %v1680_v4 }
 0xddc   : > { %v1682_v16 = vmul.f32 0.5, %v1681_v15 }
 0xdde   : > { %v1683_v17 = vsub.f32 1.5, %v1682_v16 }
 0xde0   : > { %v1684_v11 = vmul.f32 %v2214_v14, %v1683_v17 }
 0xde2   : > { %v1688_v19 = vsel %vm1687_vm9, %v2214_v14, %v1684_v11  ;;  %v2183_v11 = vld [vmem:[#allocation2] ss:$0 sm:$0xff] }
 0xde3   : > { %v1689_v20 = vmul.f32 %v1688_v19, %v1672_v2 }
 0xde5   : > { %v1693_v22 = vmul.f32 %v2179_v18, %v1689_v20 }
 0xde7   : > { %v1697_v23 = vadd.f32 %v2180_v21, %v1693_v22  ;;  %v1827_v22 = vld [vmem:[%s679_s23] sm:$0x1]  ;;  %s1908_s23 = sshll.u32 %s1904_s26, 4  ;;  %s1909_s23 = int_to_ptr.hbm [resolvable:$true] %s1908_s23 }
 0xde8   : > { %s2267_s27 = sshra.s32 %s1909_s23, 4  ;;  %s2268_s27 = int_to_ptr.hbm [resolvable:$true] %s2267_s27 }
 0xde9   : > { %2082 = vmatmul.msk.f32.vlgmr.msrb.gmra.mxu0 %vm689_vm0, %v1697_v23  ;;  %v1851_v23 = vld [vmem:[%s3029_s20] sm:$0xff]  ;;  %s2269_s5 = scalar_lea.hbm %s2268_s27, 1  ;;  %p2274_p3 = scmp.lt.s32.totalorder %s2268_s27, %s3077_s18 }
 0xdea   : > { %1873 = vmatpush.msra.mxu3 %v1851_v23  ;;  %p2270_p0 = scmp.ne.s32.totalorder %s2268_s27, %s2269_s5  ;;  %p2275_p4 = scmp.lt.s32.totalorder %s2273_s6, %s2269_s5 }
 0xdec   : > { %p2271_p1 = pnand %p2270_p0, %p2472_p5  ;;  %p2276_p7 = por %p2275_p4, %p2274_p3 }
 0xdee   : > { %p2272_p2 = pneg %p2271_p1 }
 0xdf0   : > { %p2277_p8 = pnand %p2276_p7, %p2272_p2 }
 0xe66   : > { %v1728_v39 = vpop.f32.mrf.mxu0 }
 0xe67   : > { %v1729_v41 = vadd.f32 %v2181_v37, %v1728_v39 }
 0xe69   : > { %v2083_v43 = vmul.f32 -1.702, %v1729_v41 }
 0xe6b   : > { %v1733_v44 = vmul.f32 1.442695, %v2083_v43 }
 0xe6d   : > { %2215 = vpow2.f32 %v1733_v44 }
 0xe73   : > { %v2216_v45 = vpop.eup %2215 }
 0xe74   : > { %v1735_v46 = vadd.f32 1.0, %v2216_v45 }
 0xe76   : > { %2217 = vrcp.f32 %v1735_v46  ;;  %v1747_v50 = vand.u32 2147483648, %v1735_v46  ;;  %v1745_v52 = vand.u32 2147483647, %v1735_v46  ;;  %vm1741_vm11 = vweird.f32 %v1735_v46 }
 0xe78   : > { %v1748_v54 = vor.u32 1.1754944e-38, %v1747_v50  ;;  %vm1746_vm13 = vcmp.eq.f32.partialorder %v1745_v52, 8.507059e+37 }
 0xe7c   : > { %v2218_v47 = vpop.eup %2217 }
 0xe7d   : > { %v1737_v48 = vmul.f32 %v2218_v47, %v1735_v46  ;;  %vm1742_vm10 = vweird.f32 %v2218_v47 }
 0xe7e   : > { %vm1743_vm12 = vmor %vm1741_vm11, %vm1742_vm10 }
 0xe7f   : > { %v1738_v49 = vsub.f32 1.0, %v1737_v48 }
 0xe81   : > { %v1739_v51 = vmul.f32 %v2218_v47, %v1738_v49 }
 0xe83   : > { %v1740_v53 = vadd.f32 %v2218_v47, %v1739_v51 }
 0xe85   : > { %v1744_v55 = vsel %vm1743_vm12, %v2218_v47, %v1740_v53 }
 0xe86   : > { %v1749_v56 = vsel %vm1746_vm13, %v1748_v54, %v1744_v55 }
 0xe87   : > { %v1751_v57 = vmul.f32 %v1749_v56, %v1729_v41 }
 0xe89   : > { %1790 = vmatmul.f32.vlgmr.msrb.gmra.mxu1 %v1751_v57 }
 0xf06   : > { %v1791_v59 = vpop.f32.mrf.mxu1 }
 0xf07   : > { %v1792_v60 = vadd.f32 %v2182_v58, %v1791_v59 }
 0xf09   : > { %v1794_v62 = vadd.f32 %v1792_v60, %v2868_v61 }
 0xf0b   : > { %v1797_v63 = vsel %vm689_vm0, %v1794_v62, 0.0 }
 0xf0c   : > { %1798 = vadd.xlane.f32.xlu1 %v1797_v63 }
 0xf7f   : > { %v1799_v1 = vpop.xlane.xlu1 %1798 }
 0xf80   : > { %v1800_v2 = vmul.f32 %v1799_v1, %v2498_v8 }
 0xf82   : > { %v1801_v3 = vsub.f32 %v1794_v62, %v1800_v2 }
 0xf84   : > { %v1802_v5 = vmul.f32 %v1801_v3, %v1801_v3 }
 0xf86   : > { %v1803_v7 = vsel %vm689_vm0, %v1802_v5, 0.0 }
 0xf87   : > { %1804 = vadd.xlane.f32.xlu2 %v1803_v7 }
 0xffa   : > { %v1805_v61 = vpop.xlane.xlu2 %1804 }
 0xffb   : > { %v1806_v12 = vmul.f32 %v1805_v61, %v2498_v8  ;;  %v2184_v8 = vld [vmem:[%s3028_s19] ss:$0 sm:$0xff] }
 0xffd   : > { %v1807_v13 = vadd.f32 1e-05, %v1806_v12 }
 0xfff   : > { %2219 = vrsqrt.f32 %v1807_v13  ;;  %vm1814_vm15 = vweird.f32 %v1807_v13 }
0x1005   : > { %v2220_v0 = vpop.eup %2219 }
0x1006   : > { %v1809_v14 = vmul.f32 %v2220_v0, %v1807_v13  ;;  %vm1815_vm14 = vweird.f32 %v2220_v0 }
0x1007   : > { %vm1816_vm1 = vmor %vm1814_vm15, %vm1815_vm14 }
0x1008   : > { %v1810_v4 = vmul.f32 %v2220_v0, %v1809_v14 }
0x100a   : > { %v1811_v15 = vmul.f32 0.5, %v1810_v4 }
0x100c   : > { %v1812_v16 = vsub.f32 1.5, %v1811_v15 }
0x100e   : > { %v1813_v17 = vmul.f32 %v2220_v0, %v1812_v16 }
0x1010   : > { %v1817_v18 = vsel %vm1816_vm1, %v2220_v0, %v1813_v17 }
0x1011   : > { %v1818_v19 = vmul.f32 %v1817_v18, %v1801_v3 }
0x1013   : > { %v1822_v20 = vmul.f32 %v2183_v11, %v1818_v19 }
0x1015   : > { %v1826_v21 = vadd.f32 %v2184_v8, %v1822_v20 }
0x1017   : > { %1846 = vmatpush.msra.mxu2 %v1826_v21 }
0x1018   : > { %2101 = vmatmul.msk.f32.vlgmr.msra.gmra.mxu2 %vm843_vm7, %v1827_v22 }
0x109b   : > { %v1848_v24 = vpop.f32.mrf.mxu2 }
0x109c   : > { %2102 = vmatmul.msk.f32.vlgmr.msra.gmra.mxu3 %vm689_vm0, %v1848_v24 }
0x111f   : > { %v1875_v25 = vpop.f32.mrf.mxu3 }
0x1120   : > { %v1878_v26 = vmul.f32 %v1875_v25, %v1875_v25 }
0x1122   : > { %v1880_v27 = vsel %vm1879_vm2, %v1878_v26, 0.0 }
0x1123   : > { %1881 = vadd.xlane.f32.xlu0 %v1880_v27 }
0x1196   : > { %v1882_v28 = vpop.xlane.xlu0 %1881 }
0x1197   : > { %2221 = vrsqrt.f32 %v1882_v28  ;;  %vm1889_vm0 = vweird.f32 %v1882_v28 }
0x119d   : > { %v2222_v29 = vpop.eup %2221 }
0x119e   : > { %v1884_v30 = vmul.f32 %v2222_v29, %v1882_v28  ;;  %vm1890_vm7 = vweird.f32 %v2222_v29 }
0x119f   : > { %vm1891_vm3 = vmor %vm1889_vm0, %vm1890_vm7 }
0x11a0   : > { %v1885_v31 = vmul.f32 %v2222_v29, %v1884_v30 }
0x11a2   : > { %v1886_v32 = vmul.f32 0.5, %v1885_v31 }
0x11a4   : > { %v1887_v33 = vsub.f32 1.5, %v1886_v32 }
0x11a6   : > { %v1888_v34 = vmul.f32 %v2222_v29, %v1887_v33 }
0x11a8   : > { %v1892_v35 = vsel %vm1891_vm3, %v2222_v29, %v1888_v34 }
0x11a9   : > { %v1893_v36 = vmul.f32 %v1892_v35, %v1875_v25 }
0x11ab   : > { %1894 = vst.msk [vmem:[%s672_s21] sm:$0x1] %vm1879_vm2, %v1893_v36 }
0x11ac   : > { %2280 = shalt.err (!%p2277_p8)
}
0x11ad   : > { %2109 = dma.vmem_to_hbm [thread:$0]  (%p2472_p5), %s1907_s0, 16, %s1909_s23, %s1896_s1  }
0x11ae PF: > { %s3079_s4 = sld [smem:[#allocation10_spill]] }
0x11af   : > { %s3080_s21 = sld [smem:[#allocation8_spill]] }
0x11b4   : > { %p2121_p9 = scmp.ge.s32.totalorder %s3079_s4, 2 }
0x11b5   : > { %s1920_s9 = sand.u32 1, %s3080_s21  }
0x11b6   : > { %p2116_p10 = pnand %p2121_p9, %p2476_p6  ;;  %s1921_s3 = scalar_lea.sflag [#allocation4], %s1920_s9 }
0x11b8   : > { %p2117_p11 = pneg %p2116_p10 }
0x11ba   : > { %2302 = dma.done.wait (%p2117_p11), %s1921_s3, 16  }
0x11bb   : > { %2304 = vsyncadd (%p2117_p11), %s1921_s3, 4294967280  ;;  %s3082_s27 = sld [smem:[#allocation11_spill]]  ;;  %s3085_s2 = smov %s2311_s25 }
0x11bc   : > { %s3083_s6 = sld [smem:[#allocation9_spill]] }
0x11bd   : > { %s3084_s26 = sld [smem:[#allocation12_spill]] }
0x11c1   : > { %p32_p12 = scmp.ge.s32.totalorder %s3082_s27, 4  }
0x11c2   : > { %s3086_s25 = smov %s3083_s6 }
0x11c3   :  { %34 = sbr.rel (!%p32_p12) target bundleno = 17 (0x11), region = 177 }
0x11c8   :  { %1926 = vsyncpa [#allocation3], 1 }
0x11c9   :  { %1928 = vsyncpa [#allocation3 + $0x1], 1 }
0x11ca   :  { %1929 = vsyncpa [#allocation4], 1 }
0x11cb   :  { %1931 = vsyncpa [#allocation4 + $0x1], 1 }

// kernel: _lambda_.2
= control target key start
LH: loop header
LB: loop body
LE: loop exit
PB: predicated region body
PF: predicated region fallthrough
CT: control target
= control target key end

     0   :  { %s3781_s0 = inlined_call_operand.vmem [shape: f32[2,8,192], index: 0, kind: input, shape index: {}]   ;;  %s3782_s1 = inlined_call_operand.vmem [shape: f32[192,32], index: 1, kind: input, shape index: {}]   ;;  %s3783_s2 = inlined_call_operand.vmem [shape: f32[9,32], index: 2, kind: input, shape index: {}]   ;;  %s3784_s3 = inlined_call_operand.vmem [shape: f32[1,32], index: 3, kind: input, shape index: {}]   ;;  %s3785_s4 = inlined_call_operand.vmem [shape: f32[1,32], index: 4, kind: input, shape index: {}]   ;;  %s3786_s5 = inlined_call_operand.vmem [shape: f32[2,1,32], index: 5, kind: input, shape index: {}]   ;;  %s3787_s6 = inlined_call_operand.vmem [shape: f32[2,1,32], index: 6, kind: input, shape index: {}]   ;;  %s3788_s7 = inlined_call_operand.vmem [shape: f32[2,2,32,16], index: 7, kind: input, shape index: {}]   ;;  %s3789_s8 = inlined_call_operand.vmem [shape: f32[2,2,32,16], index: 8, kind: input, shape index: {}]   ;;  %s3790_s9 = inlined_call_operand.vmem [shape: f32[2,2,32,16], index: 9, kind: input, shape index: {}]   ;;  %s3791_s10 = inlined_call_operand.vmem [shape: f32[2,2,1,16], index: 10, kind: input, shape index: {}]   ;;  %s3792_s11 = inlined_call_operand.vmem [shape: f32[2,2,1,16], index: 11, kind: input, shape index: {}]   ;;  %s3793_s12 = inlined_call_operand.vmem [shape: f32[2,2,1,16], index: 12, kind: input, shape index: {}]   ;;  %s3794_s13 = inlined_call_operand.vmem [shape: f32[2,2,16,32], index: 13, kind: input, shape index: {}]   ;;  %s3795_s14 = inlined_call_operand.vmem [shape: f32[2,1,32], index: 14, kind: input, shape index: {}]   ;;  %s3796_s15 = inlined_call_operand.vmem [shape: f32[2,1,32], index: 15, kind: input, shape index: {}]   ;;  %s3797_s16 = inlined_call_operand.vmem [shape: f32[2,1,32], index: 16, kind: input, shape index: {}]   ;;  %s3798_s17 = inlined_call_operand.vmem [shape: f32[2,32,128], index: 17, kind: input, shape index: {}]   ;;  %s3799_s18 = inlined_call_operand.vmem [shape: f32[2,1,128], index: 18, kind: input, shape index: {}]   ;;  %s3800_s19 = inlined_call_operand.vmem [shape: f32[2,128,32], index: 19, kind: input, shape index: {}]   ;;  %s3801_s20 = inlined_call_operand.vmem [shape: f32[2,1,32], index: 20, kind: input, shape index: {}]   ;;  %s3802_s21 = inlined_call_operand.vmem [shape: f32[1,32], index: 21, kind: input, shape index: {}]   ;;  %s3803_s22 = inlined_call_operand.vmem [shape: f32[1,32], index: 22, kind: input, shape index: {}]   ;;  %s3804_s23 = inlined_call_operand.vmem [shape: f32[32,32], index: 23, kind: input, shape index: {}]   ;;  %s3805_s24 = inlined_call_operand.hbm [shape: f32[2,1,32], index: 24, kind: output, shape index: {}]  }
   0x1   :  { %3826 = sst [smem:[#allocation12_spill]] %s3781_s0 }
   0x2   :  { %3827 = sst [smem:[#allocation13_spill]] %s3782_s1 }
   0x3   :  { %3828 = sst [smem:[#allocation14_spill]] %s3783_s2 }
   0x4   :  { %3829 = sst [smem:[#allocation15_spill]] %s3784_s3 }
   0x5   :  { %3830 = sst [smem:[#allocation16_spill]] %s3785_s4 }
   0x6   :  { %3831 = sst [smem:[#allocation17_spill]] %s3786_s5 }
   0x7   :  { %3832 = sst [smem:[#allocation18_spill]] %s3787_s6 }
   0x8   :  { %3833 = sst [smem:[#allocation19_spill]] %s3788_s7 }
   0x9   :  { %3834 = sst [smem:[#allocation20_spill]] %s3789_s8 }
   0xa   :  { %3835 = sst [smem:[#allocation21_spill]] %s3790_s9 }
   0xb   :  { %3836 = sst [smem:[#allocation22_spill]] %s3791_s10 }
   0xc   :  { %3837 = sst [smem:[#allocation23_spill]] %s3805_s24 }
   0xd   :  { %29 = vsyncpa [#allocation3], 0 }
   0xe   :  { %31 = vsyncpa [#allocation3 + $0x1], 0  ;;  %s3043_s5 = smov 0   ;;  %s3045_s26 = smov 0  }
   0xf   :  { %s3047_s27 = smov 0   ;;  %s3049_s28 = smov 0  }
  0x10 LB: > { %3838 = sst [smem:[#allocation5_spill]] %s2902_s5  ;;  %s3064_s6 = sadd.s32 4294967295, %s2914_s28   ;;  %s2914_s28 = sphi %s3049_s28, %s3864_s28   ;;  %s2910_s27 = sphi %s3047_s27, %s3866_s27   ;;  %s2906_s26 = sphi %s3045_s26, %s3868_s26   ;;  %s2902_s5 = sphi %s3043_s5, %s3867_s5  }
  0x11   : > { %3839 = sst [smem:[#allocation6_spill]] %s2910_s27  ;;  %s2545_s2 = sadd.s32 4294967294, %s2914_s28  }
  0x12   : > { %3840 = sst [smem:[#allocation7_spill]] %s2914_s28  ;;  %s3068_s29 = sadd.s32 1, %s2914_s28  }
  0x13   : > { %3841 = sst [smem:[#allocation8_spill]] %s3068_s29  ;;  %s553_s0 = sadd.s32 1, %s2910_s27 }
  0x14   : > { %s550_s7 = ssub.s32 %s2914_s28, %s3068_s29  ;;  %p563_p0 = scmp.ne.s32.totalorder %s2910_s27, %s2906_s26 }
  0x15   : > { %p551_p1 = scmp.eq.s32.totalorder %s550_s7, 0  ;;  %p564_p2 = scmp.eq.s32.totalorder %s3064_s6, 1 }
  0x16   : > { %p569_p3 = scmp.ne.s32.totalorder %s2906_s26, %s2902_s5  ;;  %p570_p4 = scmp.eq.s32.totalorder %s2545_s2, 1 }
  0x17   : > { %s3079_s30 = scalar_select %p551_p1, %s2910_s27, %s553_s0  }
  0x18   : > { %p3081_p5 = por %p564_p2, %p563_p0  ;;  %p3085_p6 = por %p570_p4, %p569_p3 }
  0x19   : > { %3842 = sst [smem:[#allocation9_spill]] %s3079_s30  ;;  %p2548_p7 = scmp.ge.s32.totalorder %s2914_s28, 1 }
  0x1a   : > { %s3843_s3 = scalar_select %p3081_p5, 1, 0 }
  0x1b   : > { %s3845_s25 = scalar_select %p3085_p6, 1, 0 }
  0x1c   : > { %3844 = sst [smem:[#allocation10_spill]] %s3843_s3  ;;  %p665_p8 = scmp.lt.s32.totalorder %s2914_s28, 3 }
  0x1d   : > { %3846 = sst [smem:[#allocation11_spill]] %s3845_s25 }
  0x1e   : > { %p666_p9 = pnand %p2548_p7, %p665_p8 }
  0x1f   : > { %s3847_s1 = sld [smem:[#allocation13_spill]] (!%p666_p9)  ;;  %p730_p10 = scmp.lt.s32.totalorder (!%p666_p9), %s3064_s6, 1 }
  0x20   : > { %669 = sbr.rel (%p666_p9) target bundleno = 5246 (0x147e), region = 116  ;;  %s3848_s28 = sld [smem:[#allocation12_spill]] (!%p666_p9) }
  0x21   : > { %s3849_s25 = sld [smem:[#allocation14_spill]] (!%p666_p9)  ;;  %s728_s3 = sand.u32 (!%p666_p9), 1, %s2906_s26  }
  0x22   : > { %s3851_s7 = sld [smem:[#allocation16_spill]] (!%p666_p9) }
  0x23   : > { %s3853_s5 = sld [smem:[#allocation20_spill]] (!%p666_p9) }
  0x24   : > { %s3855_s9 = sld [smem:[#allocation21_spill]] (!%p666_p9) }
  0x25   : > { %v752_v0 = vld [vmem:[%s3847_s1 + $0x78] sm:$0xff]  ;;  %v751_v1 = vld [vmem:[%s3847_s1 + $0x70] sm:$0xff]  ;;  %v750_v2 = vld [vmem:[%s3847_s1 + $0x68] sm:$0xff]  ;;  %s731_s2 = scalar_select %p730_p10, %s3064_s6, 1  ;;  %vm761_vm0 = vcmask 523264   ;;  %v805_v26 = vlaneseq  ;;  %v2916_v34 = vmov 0.0  }
  0x26   : > { %765 = vmatpush.msra.mxu0 %v752_v0  ;;  %v760_v3 = vld [vmem:[%s3847_s1 + $0xb8] sm:$0xff]  ;;  %v759_v4 = vld [vmem:[%s3847_s1 + $0xb0] sm:$0xff]  ;;  %v749_v5 = vld [vmem:[%s3847_s1 + $0x60] sm:$0xff]  ;;  %vm817_vm3 = vcmask 64512   ;;  %vm849_vm4 = vcmask 261120   ;;  %vm853_vm5 = vcmask 253952  }
  0x27   : > { %793 = vmatpush.msra.mxu1 %v760_v3  ;;  %v758_v6 = vld [vmem:[%s3847_s1 + $0xa8] sm:$0xff]  ;;  %v748_v7 = vld [vmem:[%s3847_s1 + $0x58] sm:$0xff]  ;;  %v747_v8 = vld [vmem:[%s3847_s1 + $0x50] sm:$0xff]  ;;  %s2703_s30 = sshll.u32 %s731_s2, 4  ;;  %v806_v27 = vshrl.u32 %v805_v26, 7  ;;  %v809_v28 = vand.u32 127, %v805_v26 }
  0x28   : > { %766 = vmatpush.msra.mxu0 %v751_v1  ;;  %v757_v9 = vld [vmem:[%s3847_s1 + $0xa0] sm:$0xff]  ;;  %v746_v10 = vld [vmem:[%s3847_s1 + $0x48] sm:$0xff]  ;;  %v756_v11 = vld [vmem:[%s3847_s1 + $0x98] sm:$0xff]  ;;  %s734_s2 = scalar_lea.vmem %s3848_s28, %s2703_s30  ;;  %v2917_v45 = vmov 32.0   ;;  %s3850_s28 = sld [smem:[#allocation15_spill]] }
  0x29   : > { %794 = vmatpush.msra.mxu1 %v759_v4  ;;  %v755_v12 = vld [vmem:[%s3847_s1 + $0x90] sm:$0xff]  ;;  %v745_v13 = vld [vmem:[%s3847_s1 + $0x40] sm:$0xff]  ;;  %v754_v14 = vld [vmem:[%s3847_s1 + $0x88] sm:$0xff]  ;;  %v810_v29 = vadd.s32 1, %v809_v28  ;;  %v807_v30 = vadd.s32 8, %v806_v27  ;;  %2778 = vrcp.f32 %v2917_v45  ;;  %s3854_s8 = smov %s3853_s5  ;;  %s3857_s30 = sld [smem:[#allocation18_spill]] }
  0x2a   : > { %767 = vmatpush.msra.mxu0 %v750_v2  ;;  %v744_v15 = vld [vmem:[%s3847_s1 + $0x38] sm:$0xff]  ;;  %v753_v16 = vld [vmem:[%s3847_s1 + $0x80] sm:$0xff]  ;;  %v743_v17 = vld [vmem:[%s3847_s1 + $0x30] sm:$0xff]  ;;  %s3858_s10 = sld [smem:[#allocation22_spill]] }
  0x2b   : > { %795 = vmatpush.msra.mxu1 %v758_v6  ;;  %v736_v18 = vld [vmem:[%s734_s2 + $0x8] sm:$0xff]  ;;  %v741_v20 = vld [vmem:[%s3847_s1 + $0x20] sm:$0xff]  ;;  %v740_v21 = vld [vmem:[%s3847_s1 + $0x18] sm:$0xff]  ;;  %vm811_vm1 = vcmp.eq.s32.totalorder %v806_v27, %v810_v29  ;;  %vm812_vm2 = vcmp.eq.s32.totalorder %v807_v30, %v810_v29  ;;  %s3859_s24 = sld [smem:[#allocation23_spill]] }
  0x2c   : > { %768 = vmatpush.msra.mxu0 %v749_v5  ;;  %v742_v19 = vld [vmem:[%s3847_s1 + $0x28] sm:$0xff]  ;;  %v739_v22 = vld [vmem:[%s3847_s1 + $0x10] sm:$0xff]  ;;  %v737_v24 = vld [vmem:[%s3847_s1] sm:$0xff]  ;;  %v813_v35 = vsel %vm811_vm1, 1.0, %v2916_v34  ;;  %v814_v36 = vsel %vm812_vm2, 1.0, %v2916_v34 }
  0x2d   : > { %796 = vmatpush.msra.mxu1 %v757_v9  ;;  %v738_v23 = vld [vmem:[%s3847_s1 + $0x8] sm:$0xff]  ;;  %v735_v25 = vld [vmem:[%s734_s2] sm:$0xff]  ;;  %s3852_s2 = sld [smem:[#allocation19_spill]]  ;;  %s2478_s1 = scalar_lea.sflag [#allocation3], %s728_s3 }
  0x2e   : > { %769 = vmatpush.msra.mxu0 %v748_v7  ;;  %v815_v37 = vld [vmem:[%s3849_s25] sm:$0xff]  ;;  %v816_v41 = vld [vmem:[%s3849_s25 + $0x8] sm:$0x1] }
  0x2f   : > { %797 = vmatpush.msra.mxu1 %v756_v11  ;;  %v2779_v46 = vpop.eup %2778 }
  0x30   : > { %770 = vmatpush.msra.mxu0 %v747_v8  ;;  %v858_v47 = vmul.f32 32.0, %v2779_v46  ;;  %vm862_vm6 = vweird.f32 %v2779_v46 }
  0x31   : > { %798 = vmatpush.msra.mxu1 %v755_v12  ;;  %v2750_v12 = vld [vmem:[%s3850_s28] ss:$0 sm:$0xff]  ;;  %s729_s28 = scalar_lea.vmem [#allocation2], %s728_s3 }
  0x32   : > { %771 = vmatpush.msra.mxu0 %v746_v10  ;;  %v859_v48 = vsub.f32 1.0, %v858_v47  ;;  %v1006_v47 = vld [vmem:[%s3854_s8 + $0x8] sm:$0xff]  ;;  %s2488_s0 = sshll.u32 %s729_s28, 4  ;;  %s2489_s0 = int_to_ptr.vmem [resolvable:$true] %s2488_s0 }
  0x33   : > { %799 = vmatpush.msra.mxu1 %v754_v14  ;;  %v2569_v45 = vld [vmem:[%s3852_s2 + $0x30] sm:$0xff] }
  0x34   : > { %772 = vmatpush.msra.mxu0 %v745_v13  ;;  %v860_v49 = vmul.f32 %v2779_v46, %v859_v48  ;;  %v1037_v48 = vld [vmem:[%s3855_s9 + $0x8] sm:$0xff] }
  0x35   : > { %800 = vmatpush.msra.mxu1 %v753_v16  ;;  %v2751_v16 = vld [vmem:[%s3851_s7] ss:$0 sm:$0xff]  ;;  %s3856_s7 = sld [smem:[#allocation17_spill]] }
  0x36   : > { %773 = vmatpush.msra.mxu0 %v744_v15  ;;  %2551 = vmatmul.msk.f32.vlgmr.msra.gmra.mxu1 %vm761_vm0, %v736_v18  ;;  %v861_v50 = vadd.f32 %v2779_v46, %v860_v49  ;;  %v2568_v49 = vld [vmem:[%s3852_s2 + $0x28] sm:$0xff] }
  0x38   : > { %774 = vmatpush.msra.mxu0 %v743_v17  ;;  %v3177_v51 = vsel %vm862_vm6, %v2779_v46, %v861_v50  ;;  %v969_v46 = vld [vmem:[%s3852_s2 + $0x8] sm:$0xff]  ;;  %v968_v50 = vld [vmem:[%s3852_s2] sm:$0xff]  ;;  %vm1067_vm6 = vcmask 130048  }
  0x3a   : > { %775 = vmatpush.msra.mxu0 %v742_v19 }
  0x3c   : > { %776 = vmatpush.msra.mxu0 %v741_v20 }
  0x3e   : > { %777 = vmatpush.msra.mxu0 %v740_v21 }
  0x40   : > { %778 = vmatpush.msra.mxu0 %v739_v22 }
  0x42   : > { %779 = vmatpush.msra.mxu0 %v738_v23 }
  0x44   : > { %780 = vmatpush.msra.mxu0 %v737_v24 }
  0x45   : > { %781 = vmatmul.f32.vlgmr.msra.gmra.mxu0 %v735_v25 }
  0xb3   : > { %v802_v31 = vpop.f32.mrf.mxu1 }
  0xc2   : > { %v782_v32 = vpop.f32.mrf.mxu0 }
  0xc3   : > { %v803_v33 = vadd.f32 %v802_v31, %v782_v32 }
  0xc5   : > { %839 = vmatpush.msrb.mxu1 %v803_v33  ;;  %2704 = vmatpush.msra.mxu3 %v803_v33 }
  0xc6   : > { %2552 = vmatmul.msk.f32.vlgmr.msrb.gmra.mxu1 %vm817_vm3, %v813_v35  ;;  %2553 = vmatmul.msk.f32.vlgmr.msra.gmra.mxu3 %vm817_vm3, %v814_v36  ;;  %vm1161_vm3 = vcmask 1040384  }
 0x143   : > { %v841_v38 = vpop.f32.mrf.mxu1 }
 0x144   : > { %v842_v39 = vadd.f32 %v841_v38, %v815_v37  ;;  %v971_v38 = vld [vmem:[%s3852_s2 + $0x18] sm:$0xff] }
 0x145   : > { %994 = vmatpush.msrb.mxu3 %v971_v38 }
 0x146   : > { %v850_v40 = vsel %vm849_vm4, %v842_v39, 0.0 }
 0x147   : > { %851 = vadd.xlane.f32.xlu0 %v850_v40  ;;  %v1039_v40 = vld [vmem:[%s3855_s9 + $0x18] sm:$0xff] }
 0x148   : > { %1056 = vmatpush.msra.mxu1 %v1039_v40 }
 0x149   : > { %v844_v42 = vpop.f32.mrf.mxu3 }
 0x14a   : > { %v845_v43 = vadd.f32 %v844_v42, %v816_v41  ;;  %v2570_v41 = vld [vmem:[%s3852_s2 + $0x38] sm:$0xff]  ;;  %v970_v42 = vld [vmem:[%s3852_s2 + $0x10] sm:$0xff] }
 0x14b   : > { %1212 = vmatpush.msrb.mxu0 %v2570_v41  ;;  %995 = vmatpush.msrb.mxu3 %v970_v42  ;;  %v2584_v42 = vld [vmem:[%s3855_s9 + $0x38] sm:$0xff] }
 0x14c   : > { %v854_v44 = vsel %vm853_vm5, %v845_v43, 0.0 }
 0x14d   : > { %1213 = vmatpush.msrb.mxu0 %v2569_v45  ;;  %996 = vmatpush.msrb.mxu3 %v969_v46  ;;  %v2583_v45 = vld [vmem:[%s3855_s9 + $0x30] sm:$0xff]  ;;  %v2582_v46 = vld [vmem:[%s3855_s9 + $0x28] sm:$0xff] }
 0x14f   : > { %855 = vadd.xlane.f32.xlu0 %v854_v44  ;;  %v1038_v44 = vld [vmem:[%s3855_s9 + $0x10] sm:$0xff]  ;;  %1214 = vmatpush.msrb.mxu0 %v2568_v49 }
 0x150   : > { %1057 = vmatpush.msra.mxu1 %v1038_v44  ;;  %997 = vmatpush.msrb.mxu3 %v968_v50 }
 0x152   : > { %1058 = vmatpush.msra.mxu1 %v1037_v48 }
 0x1ba   : > { %v852_v52 = vpop.xlane.xlu0 %851 }
 0x1bb   : > { %v864_v53 = vmul.f32 %v3177_v51, %v852_v52  ;;  %v1005_v52 = vld [vmem:[%s3854_s8] sm:$0xff] }
 0x1bd   : > { %v866_v54 = vsub.f32 %v842_v39, %v864_v53  ;;  %v1008_v39 = vld [vmem:[%s3853_s5 + $0x18] sm:$0xff]  ;;  %v1036_v53 = vld [vmem:[%s3855_s9] sm:$0xff]  ;;  %s2486_s5 = scalar_lea.hbm %s3859_s24, %s3064_s6 }
 0x1be   : > { %1025 = vmatpush.msra.mxu2 %v1008_v39  ;;  %1059 = vmatpush.msra.mxu1 %v1036_v53  ;;  %s2490_s25 = sshll.u32 %s2486_s5, 4  ;;  %s2491_s25 = int_to_ptr.hbm [resolvable:$true] %s2490_s25 }
 0x1bf   : > { %v868_v55 = vmul.f32 %v866_v54, %v866_v54  ;;  %2705 = vmatpush.msra.mxu3 %v1008_v39  ;;  %v2756_v39 = vld [vmem:[%s3858_s10] ss:$0 sm:$0xff] }
 0x1c1   : > { %v870_v56 = vsel %vm849_vm4, %v868_v55, 0.0 }
 0x1c2   : > { %871 = vadd.xlane.f32.xlu1 %v870_v56  ;;  %v856_v57 = vpop.xlane.xlu0 %855 }
 0x1c3   : > { %v865_v58 = vmul.f32 %v3177_v51, %v856_v57 }
 0x1c5   : > { %v867_v59 = vsub.f32 %v845_v43, %v865_v58  ;;  %v1007_v43 = vld [vmem:[%s3854_s8 + $0x10] sm:$0xff]  ;;  %v2577_v58 = vld [vmem:[%s3854_s8 + $0x38] sm:$0xff] }
 0x1c6   : > { %1026 = vmatpush.msra.mxu2 %v1007_v43  ;;  %2706 = vmatpush.msra.mxu3 %v1007_v43 }
 0x1c7   : > { %v869_v60 = vmul.f32 %v867_v59, %v867_v59  ;;  %1245 = vmatpush.msrb.mxu1 %v2577_v58 }
 0x1c8   : > { %1027 = vmatpush.msra.mxu2 %v1006_v47  ;;  %2707 = vmatpush.msra.mxu3 %v1006_v47  ;;  %v2581_v47 = vld [vmem:[%s3855_s9 + $0x20] sm:$0xff] }
 0x1c9   : > { %v873_v61 = vsel %vm853_vm5, %v869_v60, 0.0 }
 0x1ca   : > { %874 = vadd.xlane.f32.xlu1 %v873_v61  ;;  %1028 = vmatpush.msra.mxu2 %v1005_v52  ;;  %v2575_v61 = vld [vmem:[%s3854_s8 + $0x28] sm:$0xff] }
 0x1cb   : > { %2708 = vmatpush.msra.mxu3 %v1005_v52 }
 0x235   : > { %v872_v62 = vpop.xlane.xlu1 %871 }
 0x236   : > { %v876_v63 = vmul.f32 %v872_v62, %v3177_v51 }
 0x238   : > { %v878_v0 = vadd.f32 1e-05, %v876_v63  ;;  %v2574_v63 = vld [vmem:[%s3854_s8 + $0x20] sm:$0xff] }
 0x23a   : > { %2780 = vrsqrt.f32 %v878_v0  ;;  %vm886_vm8 = vweird.f32 %v878_v0 }
 0x23d   : > { %v875_v1 = vpop.xlane.xlu1 %874 }
 0x23e   : > { %v877_v2 = vmul.f32 %v875_v1, %v3177_v51 }
 0x240   : > { %v2781_v3 = vpop.eup %2780  ;;  %v879_v4 = vadd.f32 1e-05, %v877_v2 }
 0x241   : > { %v881_v5 = vmul.f32 %v2781_v3, %v878_v0  ;;  %vm887_vm7 = vweird.f32 %v2781_v3 }
 0x242   : > { %2782 = vrsqrt.f32 %v879_v4  ;;  %vm888_vm9 = vmor %vm886_vm8, %vm887_vm7  ;;  %vm896_vm11 = vweird.f32 %v879_v4  ;;  %vm1105_vm7 = vcmask 72704   ;;  %vm1109_vm8 = vcmask 65536  }
 0x243   : > { %v882_v6 = vmul.f32 %v2781_v3, %v881_v5 }
 0x245   : > { %v883_v7 = vmul.f32 0.5, %v882_v6 }
 0x247   : > { %v884_v8 = vsub.f32 1.5, %v883_v7 }
 0x248   : > { %v2783_v9 = vpop.eup %2782 }
 0x249   : > { %v885_v10 = vmul.f32 %v2781_v3, %v884_v8  ;;  %v891_v11 = vmul.f32 %v2783_v9, %v879_v4  ;;  %vm897_vm10 = vweird.f32 %v2783_v9 }
 0x24a   : > { %vm898_vm12 = vmor %vm896_vm11, %vm897_vm10 }
 0x24b   : > { %v889_v13 = vsel %vm888_vm9, %v2781_v3, %v885_v10  ;;  %v892_v14 = vmul.f32 %v2783_v9, %v891_v11 }
 0x24c   : > { %v900_v15 = vmul.f32 %v889_v13, %v866_v54  ;;  %v2567_v54 = vld [vmem:[%s3852_s2 + $0x20] sm:$0xff] }
 0x24d   : > { %v893_v17 = vmul.f32 0.5, %v892_v14  ;;  %1215 = vmatpush.msrb.mxu0 %v2567_v54 }
 0x24e   : > { %v905_v18 = vmul.f32 %v2750_v12, %v900_v15 }
 0x24f   : > { %v894_v19 = vsub.f32 1.5, %v893_v17 }
 0x250   : > { %v3191_v20 = vadd.f32 %v2751_v16, %v905_v18 }
 0x251   : > { %v895_v21 = vmul.f32 %v2783_v9, %v894_v19 }
 0x252   : > { %v914_v22 = vsel %vm849_vm4, %v3191_v20, 0.0 }
 0x253   : > { %v899_v23 = vsel %vm898_vm12, %v2783_v9, %v895_v21  ;;  %915 = vadd.xlane.f32.xlu2 %v914_v22  ;;  %v2752_v9 = vld [vmem:[%s3856_s7] ss:$0 sm:$0xff] }
 0x254   : > { %v901_v24 = vmul.f32 %v899_v23, %v867_v59  ;;  %v2576_v59 = vld [vmem:[%s3854_s8 + $0x30] sm:$0xff] }
 0x255   : > { %1246 = vmatpush.msrb.mxu1 %v2576_v59 }
 0x256   : > { %v906_v25 = vmul.f32 %v2750_v12, %v901_v24  ;;  %v2753_v12 = vld [vmem:[%s3857_s30] ss:$0 sm:$0xff] }
 0x257   : > { %1247 = vmatpush.msrb.mxu1 %v2575_v61 }
 0x258   : > { %v3195_v26 = vadd.f32 %v2751_v16, %v906_v25 }
 0x259   : > { %1248 = vmatpush.msrb.mxu1 %v2574_v63 }
 0x25a   : > { %v917_v27 = vsel %vm853_vm5, %v3195_v26, 0.0 }
 0x25b   : > { %918 = vadd.xlane.f32.xlu2 %v917_v27  ;;  %v2754_v27 = vld [vmem:[%s3793_s12] ss:$0 sm:$0xff] }
 0x2c6   : > { %v916_v28 = vpop.xlane.xlu2 %915 }
 0x2c7   : > { %v920_v29 = vmul.f32 %v916_v28, %v3177_v51 }
 0x2c9   : > { %v3201_v30 = vsub.f32 %v3191_v20, %v920_v29 }
 0x2cb   : > { %v924_v31 = vmul.f32 %v3201_v30, %v3201_v30 }
 0x2cd   : > { %v926_v32 = vsel %vm849_vm4, %v924_v31, 0.0 }
 0x2ce   : > { %927 = vadd.xlane.f32.xlu0 %v926_v32  ;;  %v919_v33 = vpop.xlane.xlu2 %918 }
 0x2cf   : > { %v921_v34 = vmul.f32 %v919_v33, %v3177_v51  ;;  %v2757_v33 = vld [vmem:[%s3792_s11] ss:$0 sm:$0xff] }
 0x2d1   : > { %v3208_v35 = vsub.f32 %v3195_v26, %v921_v34 }
 0x2d3   : > { %v925_v36 = vmul.f32 %v3208_v35, %v3208_v35 }
 0x2d5   : > { %v929_v37 = vsel %vm853_vm5, %v925_v36, 0.0 }
 0x2d6   : > { %930 = vadd.xlane.f32.xlu1 %v929_v37  ;;  %v2758_v37 = vld [vmem:[%s3792_s11 + $0x1] ss:$0 sm:$0xff] }
 0x341   : > { %v928_v55 = vpop.xlane.xlu0 %927 }
 0x342   : > { %v932_v56 = vmul.f32 %v928_v55, %v3177_v51 }
 0x344   : > { %v934_v57 = vadd.f32 1e-05, %v932_v56 }
 0x346   : > { %2784 = vrsqrt.f32 %v934_v57  ;;  %vm942_vm14 = vweird.f32 %v934_v57 }
 0x349   : > { %v931_v60 = vpop.xlane.xlu1 %930 }
 0x34a   : > { %v933_v62 = vmul.f32 %v931_v60, %v3177_v51 }
 0x34c   : > { %v2785_v0 = vpop.eup %2784  ;;  %v935_v1 = vadd.f32 1e-05, %v933_v62 }
 0x34d   : > { %v937_v2 = vmul.f32 %v2785_v0, %v934_v57  ;;  %vm943_vm13 = vweird.f32 %v2785_v0  ;;  %v2759_v57 = vld [vmem:[%s3793_s12 + $0x1] ss:$0 sm:$0xff] }
 0x34e   : > { %2786 = vrsqrt.f32 %v935_v1  ;;  %vm944_vm15 = vmor %vm942_vm14, %vm943_vm13  ;;  %vm952_vm1 = vweird.f32 %v935_v1 }
 0x34f   : > { %v938_v3 = vmul.f32 %v2785_v0, %v937_v2 }
 0x351   : > { %v939_v4 = vmul.f32 0.5, %v938_v3 }
 0x353   : > { %v940_v5 = vsub.f32 1.5, %v939_v4 }
 0x354   : > { %v2787_v6 = vpop.eup %2786 }
 0x355   : > { %v941_v7 = vmul.f32 %v2785_v0, %v940_v5  ;;  %v947_v8 = vmul.f32 %v2787_v6, %v935_v1  ;;  %vm953_vm0 = vweird.f32 %v2787_v6 }
 0x356   : > { %vm954_vm2 = vmor %vm952_vm1, %vm953_vm0 }
 0x357   : > { %v945_v10 = vsel %vm944_vm15, %v2785_v0, %v941_v7  ;;  %v948_v11 = vmul.f32 %v2787_v6, %v947_v8 }
 0x358   : > { %v956_v13 = vmul.f32 %v945_v10, %v3201_v30 }
 0x359   : > { %v949_v14 = vmul.f32 0.5, %v948_v11 }
 0x35a   : > { %v961_v15 = vmul.f32 %v2752_v9, %v956_v13 }
 0x35b   : > { %v950_v16 = vsub.f32 1.5, %v949_v14 }
 0x35c   : > { %v966_v17 = vadd.f32 %v2753_v12, %v961_v15  ;;  %v1189_v15 = vld [vmem:[%s3794_s13 + $0x8] sm:$0xff] }
 0x35d   : > { %v951_v18 = vmul.f32 %v2787_v6, %v950_v16 }
 0x35e   : > { %2554 = vmatmul.msk.f32.vlgmr.msrb.gmra.mxu3 %vm849_vm4, %v966_v17  ;;  %2556 = vmatmul.msk.f32.vlgmr.msra.gmra.mxu2 %vm849_vm4, %v966_v17 }
 0x35f   : > { %v955_v19 = vsel %vm954_vm2, %v2787_v6, %v951_v18  ;;  %2558 = vmatmul.msk.f32.vlgmr.msra.gmra.mxu1 %vm849_vm4, %v966_v17  ;;  %2572 = vmatmul.msk.f32.vlgmr.msrb.gmra.mxu0 %vm849_vm4, %v966_v17 }
 0x360   : > { %v957_v21 = vmul.f32 %v955_v19, %v3208_v35 }
 0x362   : > { %v962_v22 = vmul.f32 %v2752_v9, %v957_v21 }
 0x364   : > { %v967_v23 = vadd.f32 %v2753_v12, %v962_v22 }
 0x366   : > { %2555 = vmatmul.msk.f32.gmra.mxu3 %vm849_vm4, %v967_v23 }
 0x367   : > { %2559 = vmatmul.msk.f32.gmra.mxu1 %vm849_vm4, %v967_v23  ;;  %2573 = vmatmul.msk.f32.gmra.mxu0 %vm849_vm4, %v967_v23 }
 0x36e   : > { %2557 = vmatmul.msk.f32.vlgmr.msra.gmra.mxu3 %vm849_vm4, %v967_v23 }
 0x36f   : > { %2579 = vmatmul.msk.f32.vlgmr.msrb.gmra.mxu1 %vm849_vm4, %v966_v17 }
 0x377   : > { %2580 = vmatmul.msk.f32.gmra.mxu1 %vm849_vm4, %v967_v23 }
 0x3dc   : > { %v1061_v24 = vpop.f32.mrf.mxu1 }
 0x3dd   : > { %v1062_v30 = vadd.f32 %v2754_v27, %v1061_v24 }
 0x3e1   : > { %v999_v25 = vpop.f32.mrf.mxu3  ;;  %v1030_v36 = vpop.f32.mrf.mxu2 }
 0x3e2   : > { %v1031_v41 = vadd.f32 %v2757_v33, %v1030_v36  ;;  %v1000_v43 = vadd.f32 %v2756_v39, %v999_v25 }
 0x3e4   : > { %v1064_v28 = vpop.f32.mrf.mxu1 }
 0x3e5   : > { %v1065_v29 = vadd.f32 %v2754_v27, %v1064_v28 }
 0x3e7   : > { %2564 = vmatpush.msk.msrb.mxu2 %vm1161_vm3, %v1065_v29 }
 0x3e9   : > { %1180 = vmatpush.msrb.mxu2 %v1062_v30  ;;  %v1002_v31 = vpop.f32.mrf.mxu3 }
 0x3ea   : > { %v1003_v48 = vadd.f32 %v2756_v39, %v1002_v31  ;;  %v1188_v39 = vld [vmem:[%s3794_s13] sm:$0xff] }
 0x3ec   : > { %v1250_v32 = vpop.f32.mrf.mxu1 }
 0x3ed   : > { %v1251_v44 = vadd.f32 %v2758_v37, %v1250_v32 }
 0x3f1   : > { %v1033_v34 = vpop.f32.mrf.mxu3 }
 0x3f2   : > { %v1034_v35 = vadd.f32 %v2757_v33, %v1033_v34  ;;  %v1217_v34 = vpop.f32.mrf.mxu0 }
 0x3f4   : > { %v1253_v38 = vpop.f32.mrf.mxu1  ;;  %2560 = vmatpush.xpose.msk.msrb.mxu3 %vm1067_vm6, %v1034_v35  ;;  %v2755_v35 = vld [vmem:[%s3858_s10 + $0x1] ss:$0 sm:$0xff] }
 0x3f5   : > { %v1254_v40 = vadd.f32 %v2758_v37, %v1253_v38  ;;  %v1218_v36 = vadd.f32 %v2755_v35, %v1217_v34 }
 0x3f7   : > { %2588 = vmatpush.xpose.msk.msra.mxu2 %vm1067_vm6, %v1254_v40 }
 0x3f8   : > { %2561 = vmatpush.xpose.msk.msrb.mxu3 %vm1067_vm6, %v1031_v41 }
 0x3fa   : > { %v1220_v37 = vpop.f32.mrf.mxu0 }
 0x3fb   : > { %2589 = vmatpush.xpose.msk.msra.mxu2 %vm1067_vm6, %v1251_v44  ;;  %2562 = vmatmul.msk.f32.vlgmr.msrb.gmra.mxu3 %vm1067_vm6, %v1000_v43  ;;  %v1221_v38 = vadd.f32 %v2755_v35, %v1220_v37 }
 0x3fc   : > { %1278 = vmatpush.msra.mxu3 %v2584_v42 }
 0x3fe   : > { %1279 = vmatpush.msra.mxu3 %v2583_v45 }
 0x400   : > { %1280 = vmatpush.msra.mxu3 %v2582_v46 }
 0x402   : > { %1281 = vmatpush.msra.mxu3 %v2581_v47 }
 0x403   : > { %2563 = vmatmul.msk.f32.gmra.mxu3 %vm1067_vm6, %v1003_v48 }
 0x404   : > { %1458 = vmatpush.msrb.mxu3 %v1189_v15 }
 0x406   : > { %1459 = vmatpush.msrb.mxu3 %v1188_v39 }
 0x40b   : > { %2586 = vmatmul.msk.f32.vlgmr.msra.gmra.mxu3 %vm849_vm4, %v966_v17 }
 0x413   : > { %2587 = vmatmul.msk.f32.gmra.mxu3 %vm849_vm4, %v967_v23 }
 0x47e   : > { %v1097_v49 = vpop.f32.mrf.mxu3 }
 0x47f   : > { %v1103_v50 = vmul.f32 0.25, %v1097_v49 }
 0x481   : > { %v1106_v52 = vsel %vm1105_vm7, %v1103_v50, -inf }
 0x482   : > { %1107 = vmax.xlane.f32.xlu2 %v1106_v52 }
 0x486   : > { %v1100_v53 = vpop.f32.mrf.mxu3 }
 0x487   : > { %v1104_v54 = vmul.f32 0.25, %v1100_v53 }
 0x489   : > { %v1110_v55 = vsel %vm1109_vm8, %v1104_v54, -inf }
 0x48a   : > { %1111 = vmax.xlane.f32.xlu0 %v1110_v55 }
 0x48e   : > { %v1283_v56 = vpop.f32.mrf.mxu3 }
 0x48f   : > { %v1284_v60 = vadd.f32 %v2759_v57, %v1283_v56 }
 0x496   : > { %v1286_v58 = vpop.f32.mrf.mxu3 }
 0x497   : > { %v1287_v59 = vadd.f32 %v2759_v57, %v1286_v58 }
 0x499   : > { %2592 = vmatpush.msk.msra.mxu0 %vm1161_vm3, %v1287_v59  ;;  %v2596_v59 = vld [vmem:[%s3794_s13 + $0x18] sm:$0xff] }
 0x49a   : > { %1429 = vmatpush.msra.mxu1 %v2596_v59 }
 0x49b   : > { %1398 = vmatpush.msra.mxu0 %v1284_v60 }
 0x4f5   : > { %v1108_v61 = vpop.xlane.xlu2 %1107 }
 0x4f6   : > { %v1113_v62 = vsub.f32 %v1103_v50, %v1108_v61 }
 0x4f8   : > { %v1115_v63 = vmul.f32 1.442695, %v1113_v62 }
 0x4fa   : > { %2788 = vpow2.f32 %v1115_v63 }
 0x4fd   : > { %v1112_v0 = vpop.xlane.xlu0 %1111 }
 0x4fe   : > { %v1114_v1 = vsub.f32 %v1104_v54, %v1112_v0 }
 0x500   : > { %v2789_v2 = vpop.eup %2788  ;;  %v1117_v3 = vmul.f32 1.442695, %v1114_v1 }
 0x501   : > { %v1119_v4 = vsel %vm1105_vm7, %v2789_v2, 0.0 }
 0x502   : > { %2790 = vpow2.f32 %v1117_v3  ;;  %1120 = vadd.xlane.f32.xlu1 %v1119_v4 }
 0x508   : > { %v2791_v5 = vpop.eup %2790 }
 0x509   : > { %v1122_v6 = vsel %vm1109_vm8, %v2791_v5, 0.0 }
 0x50a   : > { %1123 = vadd.xlane.f32.xlu2 %v1122_v6 }
 0x575   : > { %v1121_v7 = vpop.xlane.xlu1 %1120 }
 0x576   : > { %2792 = vrcp.f32 %v1121_v7  ;;  %v1136_v12 = vand.u32 2147483648, %v1121_v7  ;;  %v1134_v14 = vand.u32 2147483647, %v1121_v7  ;;  %vm1130_vm10 = vweird.f32 %v1121_v7 }
 0x578   : > { %v1137_v18 = vor.u32 1.1754944e-38, %v1136_v12  ;;  %vm1135_vm12 = vcmp.eq.f32.partialorder %v1134_v14, 8.507059e+37 }
 0x57c   : > { %v2793_v8 = vpop.eup %2792 }
 0x57d   : > { %v1126_v9 = vmul.f32 %v2793_v8, %v1121_v7  ;;  %v1124_v10 = vpop.xlane.xlu2 %1123  ;;  %vm1131_vm9 = vweird.f32 %v2793_v8 }
 0x57e   : > { %2794 = vrcp.f32 %v1124_v10  ;;  %vm1132_vm11 = vmor %vm1130_vm10, %vm1131_vm9  ;;  %v1151_v25 = vand.u32 2147483648, %v1124_v10  ;;  %v1149_v28 = vand.u32 2147483647, %v1124_v10  ;;  %vm1145_vm14 = vweird.f32 %v1124_v10 }
 0x57f   : > { %v1127_v11 = vsub.f32 1.0, %v1126_v9 }
 0x580   : > { %v1152_v30 = vor.u32 1.1754944e-38, %v1151_v25  ;;  %vm1150_vm0 = vcmp.eq.f32.partialorder %v1149_v28, 8.507059e+37  ;;  %v2760_v28 = vld [vmem:[%s3795_s14] ss:$0 sm:$0xff] }
 0x581   : > { %v1128_v13 = vmul.f32 %v2793_v8, %v1127_v11 }
 0x583   : > { %v1129_v16 = vadd.f32 %v2793_v8, %v1128_v13 }
 0x584   : > { %v2795_v17 = vpop.eup %2794 }
 0x585   : > { %v1141_v19 = vmul.f32 %v2795_v17, %v1124_v10  ;;  %v1133_v21 = vsel %vm1132_vm11, %v2793_v8, %v1129_v16  ;;  %vm1146_vm13 = vweird.f32 %v2795_v17 }
 0x586   : > { %v1138_v22 = vsel %vm1135_vm12, %v1137_v18, %v1133_v21  ;;  %vm1147_vm15 = vmor %vm1145_vm14, %vm1146_vm13  ;;  %v2595_v21 = vld [vmem:[%s3794_s13 + $0x10] sm:$0xff] }
 0x587   : > { %v1142_v23 = vsub.f32 1.0, %v1141_v19  ;;  %v1139_v24 = vmul.f32 %v2789_v2, %v1138_v22  ;;  %1430 = vmatpush.msra.mxu1 %v2595_v21  ;;  %v1620_v21 = vld [vmem:[%s3800_s19 + $0x50] sm:$0xff] }
 0x589   : > { %v1143_v27 = vmul.f32 %v2795_v17, %v1142_v23  ;;  %2565 = vmatmul.msk.f32.vlgmr.msrb.gmra.mxu2 %vm1105_vm7, %v1139_v24 }
 0x58b   : > { %v1144_v29 = vadd.f32 %v2795_v17, %v1143_v27 }
 0x58d   : > { %v1148_v31 = vsel %vm1147_vm15, %v2795_v17, %v1144_v29 }
 0x58e   : > { %v1153_v32 = vsel %vm1150_vm0, %v1152_v30, %v1148_v31 }
 0x58f   : > { %v1154_v33 = vmul.f32 %v2791_v5, %v1153_v32 }
 0x591   : > { %2566 = vmatmul.msk.f32.gmra.mxu2 %vm1105_vm7, %v1154_v33 }
 0x599   : > { %2590 = vmatmul.msk.f32.vlgmr.msra.gmra.mxu2 %vm1067_vm6, %v1218_v36 }
 0x5a1   : > { %2591 = vmatmul.msk.f32.gmra.mxu2 %vm1067_vm6, %v1221_v38 }
 0x60c   : > { %v1182_v40 = vpop.f32.mrf.mxu2 }
 0x60d   : > { %2599 = vmatmul.msk.f32.vlgmr.msrb.gmra.mxu3 %vm1067_vm6, %v1182_v40 }
 0x614   : > { %v1185_v41 = vpop.f32.mrf.mxu2 }
 0x615   : > { %2600 = vmatmul.msk.f32.gmra.mxu3 %vm1067_vm6, %v1185_v41 }
 0x61c   : > { %v1318_v42 = vpop.f32.mrf.mxu2 }
 0x61d   : > { %v1324_v43 = vmul.f32 0.25, %v1318_v42 }
 0x61f   : > { %v1326_v44 = vsel %vm1105_vm7, %v1324_v43, -inf }
 0x620   : > { %1327 = vmax.xlane.f32.xlu0 %v1326_v44 }
 0x624   : > { %v1321_v45 = vpop.f32.mrf.mxu2 }
 0x625   : > { %v1325_v46 = vmul.f32 0.25, %v1321_v45 }
 0x627   : > { %v1329_v47 = vsel %vm1109_vm8, %v1325_v46, -inf }
 0x628   : > { %1330 = vmax.xlane.f32.xlu1 %v1329_v47  ;;  %v1533_v47 = vld [vmem:[%s3798_s17 + $0x10] sm:$0xff] }
 0x690   : > { %v1461_v24 = vpop.f32.mrf.mxu3 }
 0x693   : > { %v1328_v48 = vpop.xlane.xlu0 %1327 }
 0x694   : > { %v1332_v49 = vsub.f32 %v1324_v43, %v1328_v48  ;;  %v1532_v48 = vld [vmem:[%s3798_s17 + $0x8] sm:$0xff] }
 0x696   : > { %v1334_v50 = vmul.f32 1.442695, %v1332_v49  ;;  %v1531_v49 = vld [vmem:[%s3798_s17] sm:$0xff] }
 0x698   : > { %2796 = vpow2.f32 %v1334_v50  ;;  %v1464_v32 = vpop.f32.mrf.mxu3 }
 0x69b   : > { %v1331_v52 = vpop.xlane.xlu1 %1330 }
 0x69c   : > { %v1333_v53 = vsub.f32 %v1325_v46, %v1331_v52  ;;  %v1534_v46 = vld [vmem:[%s3798_s17 + $0x18] sm:$0xff] }
 0x69d   : > { %1557 = vmatpush.msrb.mxu2 %v1534_v46 }
 0x69e   : > { %v2797_v54 = vpop.eup %2796  ;;  %v1336_v55 = vmul.f32 1.442695, %v1333_v53 }
 0x69f   : > { %v1338_v56 = vsel %vm1105_vm7, %v2797_v54, 0.0  ;;  %1558 = vmatpush.msrb.mxu2 %v1533_v47 }
 0x6a0   : > { %2798 = vpow2.f32 %v1336_v55  ;;  %1339 = vadd.xlane.f32.xlu2 %v1338_v56 }
 0x6a1   : > { %1559 = vmatpush.msrb.mxu2 %v1532_v48 }
 0x6a3   : > { %1560 = vmatpush.msrb.mxu2 %v1531_v49 }
 0x6a6   : > { %v2799_v57 = vpop.eup %2798 }
 0x6a7   : > { %v1341_v58 = vsel %vm1109_vm8, %v2799_v57, 0.0 }
 0x6a8   : > { %1342 = vadd.xlane.f32.xlu0 %v1341_v58 }
 0x713   : > { %v1340_v60 = vpop.xlane.xlu2 %1339 }
 0x714   : > { %2800 = vrcp.f32 %v1340_v60  ;;  %v1355_v1 = vand.u32 2147483648, %v1340_v60  ;;  %v1353_v3 = vand.u32 2147483647, %v1340_v60  ;;  %vm1349_vm2 = vweird.f32 %v1340_v60 }
 0x716   : > { %v1356_v6 = vor.u32 1.1754944e-38, %v1355_v1  ;;  %vm1354_vm10 = vcmp.eq.f32.partialorder %v1353_v3, 8.507059e+37  ;;  %v2761_v1 = vld [vmem:[%s3796_s15] ss:$0 sm:$0xff] }
 0x71a   : > { %v2801_v61 = vpop.eup %2800 }
 0x71b   : > { %v1345_v62 = vmul.f32 %v2801_v61, %v1340_v60  ;;  %v1343_v63 = vpop.xlane.xlu0 %1342  ;;  %vm1350_vm1 = vweird.f32 %v2801_v61 }
 0x71c   : > { %2802 = vrcp.f32 %v1343_v63  ;;  %vm1351_vm9 = vmor %vm1349_vm2, %vm1350_vm1  ;;  %v1370_v12 = vand.u32 2147483648, %v1343_v63  ;;  %v1368_v14 = vand.u32 2147483647, %v1343_v63  ;;  %vm1364_vm12 = vweird.f32 %v1343_v63 }
 0x71d   : > { %v1346_v0 = vsub.f32 1.0, %v1345_v62 }
 0x71e   : > { %v1371_v16 = vor.u32 1.1754944e-38, %v1370_v12  ;;  %vm1369_vm14 = vcmp.eq.f32.partialorder %v1368_v14, 8.507059e+37 }
 0x71f   : > { %v1347_v2 = vmul.f32 %v2801_v61, %v1346_v0 }
 0x721   : > { %v1348_v4 = vadd.f32 %v2801_v61, %v1347_v2 }
 0x722   : > { %v2803_v5 = vpop.eup %2802 }
 0x723   : > { %v1352_v7 = vsel %vm1351_vm9, %v2801_v61, %v1348_v4  ;;  %v1360_v8 = vmul.f32 %v2803_v5, %v1343_v63  ;;  %vm1365_vm11 = vweird.f32 %v2803_v5 }
 0x724   : > { %v1357_v9 = vsel %vm1354_vm10, %v1356_v6, %v1352_v7  ;;  %vm1366_vm13 = vmor %vm1364_vm12, %vm1365_vm11 }
 0x725   : > { %v1361_v10 = vsub.f32 1.0, %v1360_v8  ;;  %v1358_v11 = vmul.f32 %v2797_v54, %v1357_v9 }
 0x727   : > { %v1362_v13 = vmul.f32 %v2803_v5, %v1361_v10  ;;  %2593 = vmatmul.msk.f32.vlgmr.msra.gmra.mxu0 %vm1105_vm7, %v1358_v11 }
 0x729   : > { %v1363_v15 = vadd.f32 %v2803_v5, %v1362_v13 }
 0x72b   : > { %v1367_v17 = vsel %vm1366_vm13, %v2803_v5, %v1363_v15  ;;  %v2762_v5 = vld [vmem:[%s3797_s16] ss:$0 sm:$0xff]  ;;  %v1625_v15 = vld [vmem:[%s3800_s19 + $0x78] sm:$0xff] }
 0x72c   : > { %v1372_v18 = vsel %vm1369_vm14, %v1371_v16, %v1367_v17  ;;  %1630 = vmatpush.msrb.mxu0 %v1625_v15  ;;  %v1624_v16 = vld [vmem:[%s3800_s19 + $0x70] sm:$0xff]  ;;  %v1623_v17 = vld [vmem:[%s3800_s19 + $0x68] sm:$0xff] }
 0x72d   : > { %v1373_v19 = vmul.f32 %v2799_v57, %v1372_v18  ;;  %v1622_v18 = vld [vmem:[%s3800_s19 + $0x60] sm:$0xff] }
 0x72e   : > { %1631 = vmatpush.msrb.mxu0 %v1624_v16 }
 0x72f   : > { %2594 = vmatmul.msk.f32.gmra.mxu0 %vm1105_vm7, %v1373_v19  ;;  %v1621_v19 = vld [vmem:[%s3800_s19 + $0x58] sm:$0xff] }
 0x730   : > { %1632 = vmatpush.msrb.mxu0 %v1623_v17 }
 0x732   : > { %1633 = vmatpush.msrb.mxu0 %v1622_v18 }
 0x734   : > { %1634 = vmatpush.msrb.mxu0 %v1621_v19 }
 0x736   : > { %1635 = vmatpush.msrb.mxu0 %v1620_v21 }
 0x7a4   : > { %v1400_v22 = vpop.f32.mrf.mxu0 }
 0x7a5   : > { %2597 = vmatmul.msk.f32.vlgmr.msra.gmra.mxu1 %vm1067_vm6, %v1400_v22  ;;  %v1619_v22 = vld [vmem:[%s3800_s19 + $0x48] sm:$0xff] }
 0x7a6   : > { %1636 = vmatpush.msrb.mxu0 %v1619_v22 }
 0x7ac   : > { %v1403_v23 = vpop.f32.mrf.mxu0 }
 0x7ad   : > { %2598 = vmatmul.msk.f32.gmra.mxu1 %vm1067_vm6, %v1403_v23  ;;  %v1618_v23 = vld [vmem:[%s3800_s19 + $0x40] sm:$0xff] }
 0x7ae   : > { %1637 = vmatpush.msrb.mxu0 %v1618_v23  ;;  %v2610_v23 = vld [vmem:[%s3852_s2 + $0x58] sm:$0xff] }
 0x7af   : > { %1741 = vmatpush.msrb.mxu1 %v2610_v23 }
 0x822   : > { %v1432_v25 = vpop.f32.mrf.mxu1 }
 0x823   : > { %v1462_v27 = vadd.f32 %v1461_v24, %v1432_v25  ;;  %v1617_v24 = vld [vmem:[%s3800_s19 + $0x38] sm:$0xff]  ;;  %v1616_v25 = vld [vmem:[%s3800_s19 + $0x30] sm:$0xff] }
 0x824   : > { %1638 = vmatpush.msrb.mxu0 %v1617_v24  ;;  %v2617_v24 = vld [vmem:[%s3854_s8 + $0x58] sm:$0xff] }
 0x825   : > { %v1467_v29 = vadd.f32 %v1462_v27, %v3191_v20  ;;  %v1615_v27 = vld [vmem:[%s3800_s19 + $0x28] sm:$0xff]  ;;  %1774 = vmatpush.msra.mxu3 %v2617_v24 }
 0x826   : > { %1639 = vmatpush.msrb.mxu0 %v1616_v25  ;;  %v2624_v25 = vld [vmem:[%s3855_s9 + $0x58] sm:$0xff] }
 0x827   : > { %v3367_v30 = vadd.f32 %v2760_v28, %v1467_v29  ;;  %v1613_v29 = vld [vmem:[%s3800_s19 + $0x18] sm:$0xff]  ;;  %1807 = vmatpush.msra.mxu2 %v2624_v25 }
 0x828   : > { %1640 = vmatpush.msrb.mxu0 %v1615_v27  ;;  %v2647_v27 = vld [vmem:[%s3854_s8 + $0x78] sm:$0xff] }
 0x829   : > { %v1477_v31 = vsel %vm849_vm4, %v3367_v30, 0.0 }
 0x82a   : > { %1478 = vadd.xlane.f32.xlu1 %v1477_v31  ;;  %v1435_v33 = vpop.f32.mrf.mxu1  ;;  %v2763_v31 = vld [vmem:[%s3799_s18] ss:$0 sm:$0xff] }
 0x82b   : > { %v1465_v34 = vadd.f32 %v1464_v32, %v1435_v33  ;;  %v1612_v32 = vld [vmem:[%s3800_s19 + $0x10] sm:$0xff] }
 0x82d   : > { %v1468_v35 = vadd.f32 %v1465_v34, %v3195_v26  ;;  %v1611_v34 = vld [vmem:[%s3800_s19 + $0x8] sm:$0xff] }
 0x82f   : > { %v3372_v36 = vadd.f32 %v2760_v28, %v1468_v35  ;;  %v1614_v28 = vld [vmem:[%s3800_s19 + $0x20] sm:$0xff] }
 0x830   : > { %1641 = vmatpush.msrb.mxu0 %v1614_v28  ;;  %v2609_v28 = vld [vmem:[%s3852_s2 + $0x50] sm:$0xff] }
 0x831   : > { %v1480_v37 = vsel %vm853_vm5, %v3372_v36, 0.0  ;;  %1742 = vmatpush.msrb.mxu1 %v2609_v28 }
 0x832   : > { %1481 = vadd.xlane.f32.xlu2 %v1480_v37  ;;  %1642 = vmatpush.msrb.mxu0 %v1613_v29  ;;  %v1610_v37 = vld [vmem:[%s3800_s19] sm:$0xff]  ;;  %v2616_v29 = vld [vmem:[%s3854_s8 + $0x50] sm:$0xff] }
 0x833   : > { %1775 = vmatpush.msra.mxu3 %v2616_v29  ;;  %v2653_v29 = vld [vmem:[%s3855_s9 + $0x70] sm:$0xff] }
 0x834   : > { %1643 = vmatpush.msrb.mxu0 %v1612_v32  ;;  %v2646_v32 = vld [vmem:[%s3854_s8 + $0x70] sm:$0xff] }
 0x836   : > { %1644 = vmatpush.msrb.mxu0 %v1611_v34  ;;  %v2615_v34 = vld [vmem:[%s3854_s8 + $0x48] sm:$0xff] }
 0x837   : > { %1776 = vmatpush.msra.mxu3 %v2615_v34 }
 0x838   : > { %1645 = vmatpush.msrb.mxu0 %v1610_v37  ;;  %v2645_v37 = vld [vmem:[%s3854_s8 + $0x68] sm:$0xff] }
 0x83a   : > { %1993 = vmatpush.msra.mxu0 %v2647_v27  ;;  %v2654_v27 = vld [vmem:[%s3855_s9 + $0x78] sm:$0xff] }
 0x83c   : > { %1994 = vmatpush.msra.mxu0 %v2646_v32  ;;  %v2652_v32 = vld [vmem:[%s3855_s9 + $0x68] sm:$0xff] }
 0x83e   : > { %1995 = vmatpush.msra.mxu0 %v2645_v37 }
 0x89d   : > { %v1479_v38 = vpop.xlane.xlu1 %1478 }
 0x89e   : > { %v1483_v20 = vmul.f32 %v1479_v38, %v3177_v51 }
 0x8a0   : > { %v1485_v39 = vsub.f32 %v3367_v30, %v1483_v20 }
 0x8a2   : > { %v1487_v40 = vmul.f32 %v1485_v39, %v1485_v39 }
 0x8a4   : > { %v1489_v41 = vsel %vm849_vm4, %v1487_v40, 0.0 }
 0x8a5   : > { %v1482_v42 = vpop.xlane.xlu2 %1481  ;;  %1490 = vadd.xlane.f32.xlu0 %v1489_v41 }
 0x8a6   : > { %v1484_v43 = vmul.f32 %v1482_v42, %v3177_v51 }
 0x8a8   : > { %v1486_v26 = vsub.f32 %v3372_v36, %v1484_v43 }
 0x8aa   : > { %v1488_v44 = vmul.f32 %v1486_v26, %v1486_v26 }
 0x8ac   : > { %v1492_v45 = vsel %vm853_vm5, %v1488_v44, 0.0 }
 0x8ad   : > { %1493 = vadd.xlane.f32.xlu1 %v1492_v45 }
 0x918   : > { %v1491_v50 = vpop.xlane.xlu0 %1490 }
 0x919   : > { %v1495_v52 = vmul.f32 %v1491_v50, %v3177_v51 }
 0x91b   : > { %v1497_v53 = vadd.f32 1e-05, %v1495_v52 }
 0x91d   : > { %2804 = vrsqrt.f32 %v1497_v53  ;;  %vm1505_vm0 = vweird.f32 %v1497_v53 }
 0x920   : > { %v1494_v54 = vpop.xlane.xlu1 %1493 }
 0x921   : > { %v1496_v55 = vmul.f32 %v1494_v54, %v3177_v51 }
 0x923   : > { %v2805_v56 = vpop.eup %2804  ;;  %v1498_v57 = vadd.f32 1e-05, %v1496_v55 }
 0x924   : > { %v1500_v58 = vmul.f32 %v2805_v56, %v1497_v53  ;;  %vm1506_vm15 = vweird.f32 %v2805_v56 }
 0x925   : > { %2806 = vrsqrt.f32 %v1498_v57  ;;  %vm1507_vm1 = vmor %vm1505_vm0, %vm1506_vm15  ;;  %vm1515_vm9 = vweird.f32 %v1498_v57 }
 0x926   : > { %v1501_v59 = vmul.f32 %v2805_v56, %v1500_v58 }
 0x928   : > { %v1502_v60 = vmul.f32 0.5, %v1501_v59 }
 0x92a   : > { %v1503_v61 = vsub.f32 1.5, %v1502_v60 }
 0x92b   : > { %v2807_v62 = vpop.eup %2806 }
 0x92c   : > { %v1504_v63 = vmul.f32 %v2805_v56, %v1503_v61  ;;  %v1510_v0 = vmul.f32 %v2807_v62, %v1498_v57  ;;  %vm1516_vm2 = vweird.f32 %v2807_v62 }
 0x92d   : > { %vm1517_vm10 = vmor %vm1515_vm9, %vm1516_vm2 }
 0x92e   : > { %v1508_v2 = vsel %vm1507_vm1, %v2805_v56, %v1504_v63  ;;  %v1511_v3 = vmul.f32 %v2807_v62, %v1510_v0 }
 0x92f   : > { %v1519_v4 = vmul.f32 %v1508_v2, %v1485_v39 }
 0x930   : > { %v1512_v6 = vmul.f32 0.5, %v1511_v3 }
 0x931   : > { %v1524_v7 = vmul.f32 %v2761_v1, %v1519_v4 }
 0x932   : > { %v1513_v8 = vsub.f32 1.5, %v1512_v6 }
 0x933   : > { %v1529_v9 = vadd.f32 %v2762_v5, %v1524_v7 }
 0x934   : > { %v1514_v10 = vmul.f32 %v2807_v62, %v1513_v8 }
 0x935   : > { %2601 = vmatmul.msk.f32.vlgmr.msrb.gmra.mxu2 %vm849_vm4, %v1529_v9 }
 0x936   : > { %v1518_v11 = vsel %vm1517_vm10, %v2807_v62, %v1514_v10 }
 0x937   : > { %v1520_v12 = vmul.f32 %v1518_v11, %v1486_v26 }
 0x939   : > { %v1525_v13 = vmul.f32 %v2761_v1, %v1520_v12 }
 0x93b   : > { %v1530_v14 = vadd.f32 %v2762_v5, %v1525_v13  ;;  %v2764_v5 = vld [vmem:[%s3801_s20] ss:$0 sm:$0xff] }
 0x93d   : > { %2602 = vmatmul.msk.f32.gmra.mxu2 %vm849_vm4, %v1530_v14 }
 0x9b8   : > { %v1562_v33 = vpop.f32.mrf.mxu2 }
 0x9b9   : > { %v1563_v35 = vadd.f32 %v2763_v31, %v1562_v33  ;;  %v2608_v33 = vld [vmem:[%s3852_s2 + $0x48] sm:$0xff] }
 0x9ba   : > { %1743 = vmatpush.msrb.mxu1 %v2608_v33  ;;  %v2651_v33 = vld [vmem:[%s3855_s9 + $0x60] sm:$0xff] }
 0x9bb   : > { %v2603_v38 = vmul.f32 -1.702, %v1563_v35 }
 0x9bd   : > { %v1572_v20 = vmul.f32 1.442695, %v2603_v38  ;;  %v2607_v38 = vld [vmem:[%s3852_s2 + $0x40] sm:$0xff] }
 0x9be   : > { %1744 = vmatpush.msrb.mxu1 %v2607_v38 }
 0x9bf   : > { %2808 = vpow2.f32 %v1572_v20  ;;  %v2614_v20 = vld [vmem:[%s3854_s8 + $0x40] sm:$0xff] }
 0x9c0   : > { %v1565_v39 = vpop.f32.mrf.mxu2  ;;  %1777 = vmatpush.msra.mxu3 %v2614_v20 }
 0x9c1   : > { %v1566_v40 = vadd.f32 %v2763_v31, %v1565_v39  ;;  %v2623_v31 = vld [vmem:[%s3855_s9 + $0x50] sm:$0xff]  ;;  %v2621_v39 = vld [vmem:[%s3855_s9 + $0x40] sm:$0xff] }
 0x9c2   : > { %1808 = vmatpush.msra.mxu2 %v2623_v31 }
 0x9c3   : > { %v2604_v41 = vmul.f32 -1.702, %v1566_v40 }
 0x9c5   : > { %v2809_v42 = vpop.eup %2808  ;;  %v1574_v43 = vmul.f32 1.442695, %v2604_v41 }
 0x9c6   : > { %v1576_v26 = vadd.f32 1.0, %v2809_v42 }
 0x9c7   : > { %2810 = vpow2.f32 %v1574_v43 }
 0x9c8   : > { %2812 = vrcp.f32 %v1576_v26  ;;  %v1589_v49 = vand.u32 2147483648, %v1576_v26  ;;  %v1587_v52 = vand.u32 2147483647, %v1576_v26  ;;  %vm1583_vm12 = vweird.f32 %v1576_v26 }
 0x9ca   : > { %v1590_v55 = vor.u32 1.1754944e-38, %v1589_v49  ;;  %vm1588_vm14 = vcmp.eq.f32.partialorder %v1587_v52, 8.507059e+37 }
 0x9cd   : > { %v2811_v44 = vpop.eup %2810 }
 0x9ce   : > { %v2813_v45 = vpop.eup %2812  ;;  %v1577_v46 = vadd.f32 1.0, %v2811_v44  ;;  %v2639_v44 = vld [vmem:[%s3852_s2 + $0x70] sm:$0xff] }
 0x9cf   : > { %v1579_v47 = vmul.f32 %v2813_v45, %v1576_v26  ;;  %vm1584_vm11 = vweird.f32 %v2813_v45  ;;  %v2640_v26 = vld [vmem:[%s3852_s2 + $0x78] sm:$0xff] }
 0x9d0   : > { %2814 = vrcp.f32 %v1577_v46  ;;  %vm1585_vm13 = vmor %vm1583_vm12, %vm1584_vm11  ;;  %v1604_v61 = vand.u32 2147483648, %v1577_v46  ;;  %v1602_v63 = vand.u32 2147483647, %v1577_v46  ;;  %vm1598_vm0 = vweird.f32 %v1577_v46 }
 0x9d1   : > { %v1580_v48 = vsub.f32 1.0, %v1579_v47 }
 0x9d2   : > { %v1605_v1 = vor.u32 1.1754944e-38, %v1604_v61  ;;  %vm1603_vm2 = vcmp.eq.f32.partialorder %v1602_v63, 8.507059e+37 }
 0x9d3   : > { %v1581_v50 = vmul.f32 %v2813_v45, %v1580_v48  ;;  %v2637_v48 = vld [vmem:[%s3852_s2 + $0x60] sm:$0xff] }
 0x9d5   : > { %v1582_v53 = vadd.f32 %v2813_v45, %v1581_v50 }
 0x9d6   : > { %v2815_v54 = vpop.eup %2814 }
 0x9d7   : > { %v1586_v56 = vsel %vm1585_vm13, %v2813_v45, %v1582_v53  ;;  %v1594_v57 = vmul.f32 %v2815_v54, %v1577_v46  ;;  %vm1599_vm15 = vweird.f32 %v2815_v54  ;;  %v2638_v46 = vld [vmem:[%s3852_s2 + $0x68] sm:$0xff]  ;;  %s2866_s2 = sshra.s32 %s2491_s25, 4  ;;  %s2867_s2 = int_to_ptr.hbm [resolvable:$true] %s2866_s2 }
 0x9d8   : > { %v1591_v58 = vsel %vm1588_vm14, %v1590_v55, %v1586_v56  ;;  %vm1600_vm1 = vmor %vm1598_vm0, %vm1599_vm15  ;;  %s2868_s27 = scalar_lea.hbm %s2867_s2, 1  ;;  %p2873_p0 = scmp.lt.s32.totalorder %s2867_s2, %s3859_s24 }
 0x9d9   : > { %v1608_v59 = vmul.f32 %v1591_v58, %v1563_v35  ;;  %v1595_v60 = vsub.f32 1.0, %v1594_v57  ;;  %v2622_v35 = vld [vmem:[%s3855_s9 + $0x48] sm:$0xff]  ;;  %p2869_p11 = scmp.ne.s32.totalorder %s2867_s2, %s2868_s27 }
 0x9da   : > { %1809 = vmatpush.msra.mxu2 %v2622_v35 }
 0x9db   : > { %1646 = vmatmul.f32.vlgmr.msrb.gmra.mxu0 %v1608_v59  ;;  %v1596_v62 = vmul.f32 %v2815_v54, %v1595_v60  ;;  %v2765_v59 = vld [vmem:[%s3856_s7 + $0x1] ss:$0 sm:$0xff]  ;;  %p2870_p12 = pnand %p2869_p11, %p3081_p5  ;;  %s2872_s7 = scalar_lea.hbm %s3859_s24, 2 }
 0x9dc   : > { %1810 = vmatpush.msra.mxu2 %v2621_v39  ;;  %p2874_p1 = scmp.lt.s32.totalorder %s2872_s7, %s2868_s27 }
 0x9dd   : > { %v1597_v0 = vadd.f32 %v2815_v54, %v1596_v62  ;;  %v2766_v62 = vld [vmem:[%s3857_s30 + $0x1] ss:$0 sm:$0xff]  ;;  %p2871_p13 = pneg %p2870_p12 }
 0x9de   : > { %1960 = vmatpush.msrb.mxu2 %v2640_v26  ;;  %p2875_p2 = por %p2874_p1, %p2873_p0 }
 0x9df   : > { %v1601_v2 = vsel %vm1600_vm1, %v2815_v54, %v1597_v0 }
 0x9e0   : > { %v1606_v3 = vsel %vm1603_vm2, %v1605_v1, %v1601_v2  ;;  %1961 = vmatpush.msrb.mxu2 %v2639_v44  ;;  %p2876_p3 = pnand %p2875_p2, %p2871_p13 }
 0x9e1   : > { %v1609_v4 = vmul.f32 %v1606_v3, %v1566_v40  ;;  %v2644_v40 = vld [vmem:[%s3854_s8 + $0x60] sm:$0xff] }
 0x9e2   : > { %1996 = vmatpush.msra.mxu0 %v2644_v40  ;;  %1962 = vmatpush.msrb.mxu2 %v2638_v46 }
 0x9e3   : > { %1649 = vmatmul.f32.gmra.mxu0 %v1609_v4 }
 0x9e4   : > { %1963 = vmatpush.msrb.mxu2 %v2637_v48 }
 0xa58   : > { %v1647_v6 = vpop.f32.mrf.mxu0 }
 0xa59   : > { %v1648_v7 = vadd.f32 %v2764_v5, %v1647_v6 }
 0xa5b   : > { %v3459_v8 = vadd.f32 %v1648_v7, %v3367_v30 }
 0xa5d   : > { %v1659_v9 = vsel %vm849_vm4, %v3459_v8, 0.0 }
 0xa5e   : > { %1660 = vadd.xlane.f32.xlu2 %v1659_v9 }
 0xa60   : > { %v1650_v10 = vpop.f32.mrf.mxu0 }
 0xa61   : > { %v1651_v11 = vadd.f32 %v2764_v5, %v1650_v10 }
 0xa63   : > { %v3464_v12 = vadd.f32 %v1651_v11, %v3372_v36 }
 0xa65   : > { %v1662_v13 = vsel %vm853_vm5, %v3464_v12, 0.0 }
 0xa66   : > { %1663 = vadd.xlane.f32.xlu0 %v1662_v13 }
 0xad1   : > { %v1661_v14 = vpop.xlane.xlu2 %1660 }
 0xad2   : > { %v1665_v15 = vmul.f32 %v1661_v14, %v3177_v51  ;;  %v2769_v14 = vld [vmem:[%s3792_s11 + $0x2] ss:$0 sm:$0xff] }
 0xad4   : > { %v3470_v16 = vsub.f32 %v3459_v8, %v1665_v15  ;;  %v2770_v15 = vld [vmem:[%s3793_s12 + $0x2] ss:$0 sm:$0xff] }
 0xad6   : > { %v1669_v30 = vmul.f32 %v3470_v16, %v3470_v16 }
 0xad8   : > { %v1671_v17 = vsel %vm849_vm4, %v1669_v30, 0.0 }
 0xad9   : > { %1672 = vadd.xlane.f32.xlu1 %v1671_v17  ;;  %v1664_v18 = vpop.xlane.xlu0 %1663 }
 0xada   : > { %v1666_v36 = vmul.f32 %v1664_v18, %v3177_v51 }
 0xadc   : > { %v3477_v19 = vsub.f32 %v3464_v12, %v1666_v36 }
 0xade   : > { %v1670_v21 = vmul.f32 %v3477_v19, %v3477_v19 }
 0xae0   : > { %v1674_v22 = vsel %vm853_vm5, %v1670_v21, 0.0  ;;  %v2768_v21 = vld [vmem:[%s3792_s11 + $0x3] ss:$0 sm:$0xff] }
 0xae1   : > { %1675 = vadd.xlane.f32.xlu2 %v1674_v22  ;;  %v2767_v22 = vld [vmem:[%s3858_s10 + $0x2] ss:$0 sm:$0xff] }
 0xb4c   : > { %v1673_v41 = vpop.xlane.xlu1 %1672 }
 0xb4d   : > { %v1677_v42 = vmul.f32 %v1673_v41, %v3177_v51 }
 0xb4f   : > { %v1679_v43 = vadd.f32 1e-05, %v1677_v42 }
 0xb51   : > { %2816 = vrsqrt.f32 %v1679_v43  ;;  %vm1687_vm10 = vweird.f32 %v1679_v43 }
 0xb54   : > { %v1676_v45 = vpop.xlane.xlu2 %1675 }
 0xb55   : > { %v1678_v47 = vmul.f32 %v1676_v45, %v3177_v51 }
 0xb57   : > { %v2817_v49 = vpop.eup %2816  ;;  %v1680_v50 = vadd.f32 1e-05, %v1678_v47 }
 0xb58   : > { %v1682_v52 = vmul.f32 %v2817_v49, %v1679_v43  ;;  %vm1688_vm9 = vweird.f32 %v2817_v49  ;;  %v2772_v43 = vld [vmem:[%s3793_s12 + $0x3] ss:$0 sm:$0xff] }
 0xb59   : > { %2818 = vrsqrt.f32 %v1680_v50  ;;  %vm1689_vm11 = vmor %vm1687_vm10, %vm1688_vm9  ;;  %vm1697_vm13 = vweird.f32 %v1680_v50 }
 0xb5a   : > { %v1683_v53 = vmul.f32 %v2817_v49, %v1682_v52 }
 0xb5c   : > { %v1684_v54 = vmul.f32 0.5, %v1683_v53 }
 0xb5e   : > { %v1685_v55 = vsub.f32 1.5, %v1684_v54 }
 0xb5f   : > { %v2819_v56 = vpop.eup %2818 }
 0xb60   : > { %v1686_v57 = vmul.f32 %v2817_v49, %v1685_v55  ;;  %v1692_v58 = vmul.f32 %v2819_v56, %v1680_v50  ;;  %vm1698_vm12 = vweird.f32 %v2819_v56 }
 0xb61   : > { %vm1699_vm14 = vmor %vm1697_vm13, %vm1698_vm12 }
 0xb62   : > { %v1690_v60 = vsel %vm1689_vm11, %v2817_v49, %v1686_v57  ;;  %v1693_v61 = vmul.f32 %v2819_v56, %v1692_v58 }
 0xb63   : > { %v1701_v63 = vmul.f32 %v1690_v60, %v3470_v16 }
 0xb64   : > { %v1694_v0 = vmul.f32 0.5, %v1693_v61 }
 0xb65   : > { %v1706_v1 = vmul.f32 %v2765_v59, %v1701_v63 }
 0xb66   : > { %v1695_v2 = vsub.f32 1.5, %v1694_v0 }
 0xb67   : > { %v1711_v3 = vadd.f32 %v2766_v62, %v1706_v1  ;;  %v2636_v1 = vld [vmem:[%s3794_s13 + $0x28] sm:$0xff] }
 0xb68   : > { %v1696_v4 = vmul.f32 %v2819_v56, %v1695_v2 }
 0xb69   : > { %2612 = vmatmul.msk.f32.vlgmr.msrb.gmra.mxu1 %vm849_vm4, %v1711_v3  ;;  %2619 = vmatmul.msk.f32.vlgmr.msra.gmra.mxu3 %vm849_vm4, %v1711_v3 }
 0xb6a   : > { %v1700_v5 = vsel %vm1699_vm14, %v2819_v56, %v1696_v4  ;;  %2626 = vmatmul.msk.f32.vlgmr.msra.gmra.mxu2 %vm849_vm4, %v1711_v3  ;;  %2649 = vmatmul.msk.f32.vlgmr.msra.gmra.mxu0 %vm849_vm4, %v1711_v3 }
 0xb6b   : > { %v1702_v6 = vmul.f32 %v1700_v5, %v3477_v19 }
 0xb6d   : > { %v1707_v7 = vmul.f32 %v2765_v59, %v1702_v6 }
 0xb6f   : > { %v1712_v9 = vadd.f32 %v2766_v62, %v1707_v7 }
 0xb71   : > { %2613 = vmatmul.msk.f32.gmra.mxu1 %vm849_vm4, %v1712_v9  ;;  %2620 = vmatmul.msk.f32.gmra.mxu3 %vm849_vm4, %v1712_v9 }
 0xb72   : > { %2627 = vmatmul.msk.f32.gmra.mxu2 %vm849_vm4, %v1712_v9  ;;  %2650 = vmatmul.msk.f32.gmra.mxu0 %vm849_vm4, %v1712_v9 }
 0xb7a   : > { %2642 = vmatmul.msk.f32.vlgmr.msrb.gmra.mxu2 %vm849_vm4, %v1711_v3 }
 0xb82   : > { %2643 = vmatmul.msk.f32.gmra.mxu2 %vm849_vm4, %v1712_v9 }
 0xbe6   : > { %v1746_v19 = vpop.f32.mrf.mxu1 }
 0xbe7   : > { %v1998_v10 = vpop.f32.mrf.mxu0  ;;  %v1747_v28 = vadd.f32 %v2767_v22, %v1746_v19  ;;  %v2771_v19 = vld [vmem:[%s3858_s10 + $0x3] ss:$0 sm:$0xff] }
 0xbe8   : > { %v1999_v31 = vadd.f32 %v2768_v21, %v1998_v10 }
 0xbec   : > { %v1779_v11 = vpop.f32.mrf.mxu3 }
 0xbed   : > { %v1812_v13 = vpop.f32.mrf.mxu2  ;;  %v1780_v24 = vadd.f32 %v2769_v14, %v1779_v11 }
 0xbee   : > { %v1813_v23 = vadd.f32 %v2770_v15, %v1812_v13  ;;  %v1749_v34 = vpop.f32.mrf.mxu1 }
 0xbef   : > { %v2001_v18 = vpop.f32.mrf.mxu0  ;;  %v1750_v35 = vadd.f32 %v2767_v22, %v1749_v34 }
 0xbf0   : > { %v2002_v25 = vadd.f32 %v2768_v21, %v2001_v18 }
 0xbf4   : > { %v1782_v16 = vpop.f32.mrf.mxu3 }
 0xbf5   : > { %v1783_v30 = vadd.f32 %v2769_v14, %v1782_v16  ;;  %v1815_v17 = vpop.f32.mrf.mxu2 }
 0xbf6   : > { %v1816_v36 = vadd.f32 %v2770_v15, %v1815_v17 }
 0xbf7   : > { %2628 = vmatpush.xpose.msk.msra.mxu1 %vm1067_vm6, %v1783_v30 }
 0xbf8   : > { %2632 = vmatpush.msk.msrb.mxu3 %vm1161_vm3, %v1816_v36 }
 0xbfa   : > { %1927 = vmatpush.msrb.mxu3 %v1813_v23 }
 0xbfb   : > { %2629 = vmatpush.xpose.msk.msra.mxu1 %vm1067_vm6, %v1780_v24  ;;  %v2635_v24 = vld [vmem:[%s3794_s13 + $0x20] sm:$0xff] }
 0xbfc   : > { %2658 = vmatpush.xpose.msk.msra.mxu3 %vm1067_vm6, %v2002_v25 }
 0xbfd   : > { %v1965_v36 = vpop.f32.mrf.mxu2 }
 0xbfe   : > { %2630 = vmatmul.msk.f32.vlgmr.msra.gmra.mxu1 %vm1067_vm6, %v1747_v28  ;;  %v1966_v21 = vadd.f32 %v2771_v19, %v1965_v36 }
 0xbff   : > { %2026 = vmatpush.msrb.mxu1 %v2654_v27 }
 0xc00   : > { %2659 = vmatpush.xpose.msk.msra.mxu3 %vm1067_vm6, %v1999_v31 }
 0xc01   : > { %2027 = vmatpush.msrb.mxu1 %v2653_v29 }
 0xc03   : > { %2028 = vmatpush.msrb.mxu1 %v2652_v32 }
 0xc05   : > { %2029 = vmatpush.msrb.mxu1 %v2651_v33  ;;  %v1968_v22 = vpop.f32.mrf.mxu2 }
 0xc06   : > { %2631 = vmatmul.msk.f32.gmra.mxu1 %vm1067_vm6, %v1750_v35  ;;  %v1969_v23 = vadd.f32 %v2771_v19, %v1968_v22 }
 0xc07   : > { %2206 = vmatpush.msra.mxu1 %v2636_v1 }
 0xc09   : > { %2207 = vmatpush.msra.mxu1 %v2635_v24 }
 0xc0e   : > { %2656 = vmatmul.msk.f32.vlgmr.msrb.gmra.mxu1 %vm849_vm4, %v1711_v3 }
 0xc16   : > { %2657 = vmatmul.msk.f32.gmra.mxu1 %vm849_vm4, %v1712_v9 }
 0xc7b   : > { %v1847_v37 = vpop.f32.mrf.mxu1 }
 0xc7c   : > { %v1853_v38 = vmul.f32 0.25, %v1847_v37 }
 0xc7e   : > { %v1855_v20 = vsel %vm1105_vm7, %v1853_v38, -inf }
 0xc7f   : > { %1856 = vmax.xlane.f32.xlu0 %v1855_v20 }
 0xc83   : > { %v1850_v39 = vpop.f32.mrf.mxu1 }
 0xc84   : > { %v1854_v40 = vmul.f32 0.25, %v1850_v39 }
 0xc86   : > { %v1858_v41 = vsel %vm1109_vm8, %v1854_v40, -inf }
 0xc87   : > { %1859 = vmax.xlane.f32.xlu1 %v1858_v41 }
 0xc8b   : > { %v2031_v42 = vpop.f32.mrf.mxu1 }
 0xc8c   : > { %v2032_v45 = vadd.f32 %v2772_v43, %v2031_v42 }
 0xc93   : > { %v2034_v26 = vpop.f32.mrf.mxu1 }
 0xc94   : > { %v2035_v44 = vadd.f32 %v2772_v43, %v2034_v26 }
 0xc96   : > { %2662 = vmatpush.msk.msra.mxu2 %vm1161_vm3, %v2035_v44  ;;  %v2666_v44 = vld [vmem:[%s3794_s13 + $0x38] sm:$0xff] }
 0xc97   : > { %2177 = vmatpush.msrb.mxu0 %v2666_v44 }
 0xc98   : > { %2146 = vmatpush.msra.mxu2 %v2032_v45 }
 0xcf2   : > { %v1857_v46 = vpop.xlane.xlu0 %1856 }
 0xcf3   : > { %v1861_v47 = vsub.f32 %v1853_v38, %v1857_v46 }
 0xcf5   : > { %v1863_v48 = vmul.f32 1.442695, %v1861_v47 }
 0xcf7   : > { %2820 = vpow2.f32 %v1863_v48 }
 0xcfa   : > { %v1860_v49 = vpop.xlane.xlu1 %1859 }
 0xcfb   : > { %v1862_v50 = vsub.f32 %v1854_v40, %v1860_v49 }
 0xcfd   : > { %v2821_v52 = vpop.eup %2820  ;;  %v1865_v53 = vmul.f32 1.442695, %v1862_v50 }
 0xcfe   : > { %v1867_v54 = vsel %vm1105_vm7, %v2821_v52, 0.0 }
 0xcff   : > { %2822 = vpow2.f32 %v1865_v53  ;;  %1868 = vadd.xlane.f32.xlu2 %v1867_v54 }
 0xd05   : > { %v2823_v55 = vpop.eup %2822 }
 0xd06   : > { %v1870_v56 = vsel %vm1109_vm8, %v2823_v55, 0.0 }
 0xd07   : > { %1871 = vadd.xlane.f32.xlu0 %v1870_v56 }
 0xd72   : > { %v1869_v57 = vpop.xlane.xlu2 %1868 }
 0xd73   : > { %2824 = vrcp.f32 %v1869_v57  ;;  %v1884_v62 = vand.u32 2147483648, %v1869_v57  ;;  %v1882_v0 = vand.u32 2147483647, %v1869_v57  ;;  %vm1878_vm15 = vweird.f32 %v1869_v57 }
 0xd75   : > { %v1885_v4 = vor.u32 1.1754944e-38, %v1884_v62  ;;  %vm1883_vm1 = vcmp.eq.f32.partialorder %v1882_v0, 8.507059e+37 }
 0xd79   : > { %v2825_v58 = vpop.eup %2824 }
 0xd7a   : > { %v1874_v59 = vmul.f32 %v2825_v58, %v1869_v57  ;;  %v1872_v60 = vpop.xlane.xlu0 %1871  ;;  %vm1879_vm3 = vweird.f32 %v2825_v58 }
 0xd7b   : > { %2826 = vrcp.f32 %v1872_v60  ;;  %vm1880_vm0 = vmor %vm1878_vm15, %vm1879_vm3  ;;  %v1899_v11 = vand.u32 2147483648, %v1872_v60  ;;  %v1897_v14 = vand.u32 2147483647, %v1872_v60  ;;  %vm1893_vm9 = vweird.f32 %v1872_v60 }
 0xd7c   : > { %v1875_v61 = vsub.f32 1.0, %v1874_v59 }
 0xd7d   : > { %v1900_v16 = vor.u32 1.1754944e-38, %v1899_v11  ;;  %vm1898_vm11 = vcmp.eq.f32.partialorder %v1897_v14, 8.507059e+37  ;;  %v2773_v14 = vld [vmem:[%s3795_s14 + $0x1] ss:$0 sm:$0xff] }
 0xd7e   : > { %v1876_v63 = vmul.f32 %v2825_v58, %v1875_v61 }
 0xd80   : > { %v1877_v2 = vadd.f32 %v2825_v58, %v1876_v63 }
 0xd81   : > { %v2827_v3 = vpop.eup %2826 }
 0xd82   : > { %v1881_v5 = vsel %vm1880_vm0, %v2825_v58, %v1877_v2  ;;  %v1889_v6 = vmul.f32 %v2827_v3, %v1872_v60  ;;  %vm1894_vm2 = vweird.f32 %v2827_v3 }
 0xd83   : > { %v1886_v7 = vsel %vm1883_vm1, %v1885_v4, %v1881_v5  ;;  %vm1895_vm10 = vmor %vm1893_vm9, %vm1894_vm2 }
 0xd84   : > { %v1890_v9 = vsub.f32 1.0, %v1889_v6  ;;  %v1887_v10 = vmul.f32 %v2821_v52, %v1886_v7  ;;  %v2665_v6 = vld [vmem:[%s3794_s13 + $0x30] sm:$0xff] }
 0xd85   : > { %2178 = vmatpush.msrb.mxu0 %v2665_v6  ;;  %v2693_v6 = vld [vmem:[%s3800_s19 + $0xd0] sm:$0xff] }
 0xd86   : > { %v1891_v13 = vmul.f32 %v2827_v3, %v1890_v9  ;;  %2633 = vmatmul.msk.f32.vlgmr.msrb.gmra.mxu3 %vm1105_vm7, %v1887_v10 }
 0xd88   : > { %v1892_v15 = vadd.f32 %v2827_v3, %v1891_v13 }
 0xd8a   : > { %v1896_v30 = vsel %vm1895_vm10, %v2827_v3, %v1892_v15 }
 0xd8b   : > { %v1901_v17 = vsel %vm1898_vm11, %v1900_v16, %v1896_v30 }
 0xd8c   : > { %v1902_v18 = vmul.f32 %v2823_v55, %v1901_v17 }
 0xd8e   : > { %2634 = vmatmul.msk.f32.gmra.mxu3 %vm1105_vm7, %v1902_v18 }
 0xd96   : > { %2660 = vmatmul.msk.f32.vlgmr.msra.gmra.mxu3 %vm1067_vm6, %v1966_v21 }
 0xd9e   : > { %2661 = vmatmul.msk.f32.gmra.mxu3 %vm1067_vm6, %v1969_v23 }
 0xe09   : > { %v1929_v25 = vpop.f32.mrf.mxu3 }
 0xe0a   : > { %2669 = vmatmul.msk.f32.vlgmr.msra.gmra.mxu1 %vm1067_vm6, %v1929_v25 }
 0xe11   : > { %v1932_v27 = vpop.f32.mrf.mxu3 }
 0xe12   : > { %2670 = vmatmul.msk.f32.gmra.mxu1 %vm1067_vm6, %v1932_v27 }
 0xe19   : > { %v2066_v28 = vpop.f32.mrf.mxu3 }
 0xe1a   : > { %v2072_v29 = vmul.f32 0.25, %v2066_v28 }
 0xe1c   : > { %v2074_v31 = vsel %vm1105_vm7, %v2072_v29, -inf }
 0xe1d   : > { %2075 = vmax.xlane.f32.xlu1 %v2074_v31 }
 0xe21   : > { %v2069_v32 = vpop.f32.mrf.mxu3 }
 0xe22   : > { %v2073_v33 = vmul.f32 0.25, %v2069_v32 }
 0xe24   : > { %v2077_v34 = vsel %vm1109_vm8, %v2073_v33, -inf }
 0xe25   : > { %2078 = vmax.xlane.f32.xlu0 %v2077_v34  ;;  %v2676_v34 = vld [vmem:[%s3798_s17 + $0x30] sm:$0xff] }
 0xe87   : > { %v2209_v10 = vpop.f32.mrf.mxu1 }
 0xe8f   : > { %v2212_v17 = vpop.f32.mrf.mxu1 }
 0xe90   : > { %v2076_v35 = vpop.xlane.xlu1 %2075 }
 0xe91   : > { %v2080_v37 = vsub.f32 %v2072_v29, %v2076_v35  ;;  %v2675_v35 = vld [vmem:[%s3798_s17 + $0x28] sm:$0xff] }
 0xe93   : > { %v2082_v38 = vmul.f32 1.442695, %v2080_v37  ;;  %v2674_v37 = vld [vmem:[%s3798_s17 + $0x20] sm:$0xff] }
 0xe95   : > { %2828 = vpow2.f32 %v2082_v38 }
 0xe98   : > { %v2079_v20 = vpop.xlane.xlu0 %2078 }
 0xe99   : > { %v2081_v39 = vsub.f32 %v2073_v33, %v2079_v20  ;;  %v2677_v33 = vld [vmem:[%s3798_s17 + $0x38] sm:$0xff] }
 0xe9a   : > { %2310 = vmatpush.msrb.mxu3 %v2677_v33 }
 0xe9b   : > { %v2829_v40 = vpop.eup %2828  ;;  %v2084_v41 = vmul.f32 1.442695, %v2081_v39 }
 0xe9c   : > { %v2086_v42 = vsel %vm1105_vm7, %v2829_v40, 0.0  ;;  %2311 = vmatpush.msrb.mxu3 %v2676_v34 }
 0xe9d   : > { %2830 = vpow2.f32 %v2084_v41  ;;  %2087 = vadd.xlane.f32.xlu2 %v2086_v42 }
 0xe9e   : > { %2312 = vmatpush.msrb.mxu3 %v2675_v35 }
 0xea0   : > { %2313 = vmatpush.msrb.mxu3 %v2674_v37 }
 0xea3   : > { %v2831_v43 = vpop.eup %2830 }
 0xea4   : > { %v2089_v26 = vsel %vm1109_vm8, %v2831_v43, 0.0 }
 0xea5   : > { %2090 = vadd.xlane.f32.xlu1 %v2089_v26 }
 0xf10   : > { %v2088_v45 = vpop.xlane.xlu2 %2087 }
 0xf11   : > { %2832 = vrcp.f32 %v2088_v45  ;;  %v2103_v50 = vand.u32 2147483648, %v2088_v45  ;;  %v2101_v53 = vand.u32 2147483647, %v2088_v45  ;;  %vm2097_vm13 = vweird.f32 %v2088_v45 }
 0xf13   : > { %v2104_v56 = vor.u32 1.1754944e-38, %v2103_v50  ;;  %vm2102_vm14 = vcmp.eq.f32.partialorder %v2101_v53, 8.507059e+37  ;;  %v2774_v50 = vld [vmem:[%s3796_s15 + $0x1] ss:$0 sm:$0xff] }
 0xf17   : > { %v2833_v46 = vpop.eup %2832 }
 0xf18   : > { %v2093_v47 = vmul.f32 %v2833_v46, %v2088_v45  ;;  %v2091_v48 = vpop.xlane.xlu1 %2090  ;;  %vm2098_vm12 = vweird.f32 %v2833_v46 }
 0xf19   : > { %2834 = vrcp.f32 %v2091_v48  ;;  %vm2099_vm8 = vmor %vm2097_vm13, %vm2098_vm12  ;;  %v2118_v62 = vand.u32 2147483648, %v2091_v48  ;;  %v2116_v0 = vand.u32 2147483647, %v2091_v48  ;;  %vm2112_vm15 = vweird.f32 %v2091_v48 }
 0xf1a   : > { %v2094_v49 = vsub.f32 1.0, %v2093_v47 }
 0xf1b   : > { %v2119_v2 = vor.u32 1.1754944e-38, %v2118_v62  ;;  %vm2117_vm1 = vcmp.eq.f32.partialorder %v2116_v0, 8.507059e+37 }
 0xf1c   : > { %v2095_v52 = vmul.f32 %v2833_v46, %v2094_v49 }
 0xf1e   : > { %v2096_v54 = vadd.f32 %v2833_v46, %v2095_v52 }
 0xf1f   : > { %v2835_v55 = vpop.eup %2834 }
 0xf20   : > { %v2100_v57 = vsel %vm2099_vm8, %v2833_v46, %v2096_v54  ;;  %v2108_v58 = vmul.f32 %v2835_v55, %v2091_v48  ;;  %vm2113_vm3 = vweird.f32 %v2835_v55 }
 0xf21   : > { %v2105_v59 = vsel %vm2102_vm14, %v2104_v56, %v2100_v57  ;;  %vm2114_vm0 = vmor %vm2112_vm15, %vm2113_vm3 }
 0xf22   : > { %v2109_v60 = vsub.f32 1.0, %v2108_v58  ;;  %v2106_v61 = vmul.f32 %v2829_v40, %v2105_v59 }
 0xf24   : > { %v2110_v63 = vmul.f32 %v2835_v55, %v2109_v60  ;;  %2663 = vmatmul.msk.f32.vlgmr.msra.gmra.mxu2 %vm1105_vm7, %v2106_v61 }
 0xf26   : > { %v2111_v1 = vadd.f32 %v2835_v55, %v2110_v63 }
 0xf28   : > { %v2115_v3 = vsel %vm2114_vm0, %v2835_v55, %v2111_v1  ;;  %v2775_v55 = vld [vmem:[%s3797_s16 + $0x1] ss:$0 sm:$0xff]  ;;  %v2698_v1 = vld [vmem:[%s3800_s19 + $0xf8] sm:$0xff] }
 0xf29   : > { %v2120_v4 = vsel %vm2117_vm1, %v2119_v2, %v2115_v3  ;;  %2385 = vmatpush.msrb.mxu2 %v2698_v1  ;;  %v2697_v2 = vld [vmem:[%s3800_s19 + $0xf0] sm:$0xff]  ;;  %v2696_v3 = vld [vmem:[%s3800_s19 + $0xe8] sm:$0xff]  ;;  %v2437_v1 = vld [vmem:[%s3804_s23 + $0x18] sm:$0xff] }
 0xf2a   : > { %v2121_v5 = vmul.f32 %v2831_v43, %v2120_v4  ;;  %v2695_v4 = vld [vmem:[%s3800_s19 + $0xe0] sm:$0xff]  ;;  %2453 = vmatpush.msra.mxu0 %v2437_v1 }
 0xf2b   : > { %2386 = vmatpush.msrb.mxu2 %v2697_v2  ;;  %v2435_v2 = vld [vmem:[%s3804_s23 + $0x8] sm:$0xff] }
 0xf2c   : > { %2664 = vmatmul.msk.f32.gmra.mxu2 %vm1105_vm7, %v2121_v5  ;;  %v2694_v5 = vld [vmem:[%s3800_s19 + $0xd8] sm:$0xff] }
 0xf2d   : > { %2387 = vmatpush.msrb.mxu2 %v2696_v3  ;;  %v2434_v3 = vld [vmem:[%s3804_s23] sm:$0xff] }
 0xf2f   : > { %2388 = vmatpush.msrb.mxu2 %v2695_v4 }
 0xf31   : > { %2389 = vmatpush.msrb.mxu2 %v2694_v5 }
 0xf33   : > { %2390 = vmatpush.msrb.mxu2 %v2693_v6 }
 0xfa7   : > { %v2148_v7 = vpop.f32.mrf.mxu2 }
 0xfa8   : > { %2667 = vmatmul.msk.f32.vlgmr.msrb.gmra.mxu0 %vm1067_vm6, %v2148_v7  ;;  %v2692_v7 = vld [vmem:[%s3800_s19 + $0xc8] sm:$0xff] }
 0xfa9   : > { %2391 = vmatpush.msrb.mxu2 %v2692_v7 }
 0xfaf   : > { %v2151_v9 = vpop.f32.mrf.mxu2 }
 0xfb0   : > { %2668 = vmatmul.msk.f32.gmra.mxu0 %vm1067_vm6, %v2151_v9  ;;  %v2691_v9 = vld [vmem:[%s3800_s19 + $0xc0] sm:$0xff] }
 0xfb1   : > { %2392 = vmatpush.msrb.mxu2 %v2691_v9 }
0x1025   : > { %v2180_v11 = vpop.f32.mrf.mxu0 }
0x1026   : > { %v2210_v13 = vadd.f32 %v2209_v10, %v2180_v11  ;;  %v2690_v10 = vld [vmem:[%s3800_s19 + $0xb8] sm:$0xff]  ;;  %v2689_v11 = vld [vmem:[%s3800_s19 + $0xb0] sm:$0xff] }
0x1027   : > { %2393 = vmatpush.msrb.mxu2 %v2690_v10 }
0x1028   : > { %v2215_v15 = vadd.f32 %v2210_v13, %v3459_v8  ;;  %v2688_v13 = vld [vmem:[%s3800_s19 + $0xa8] sm:$0xff] }
0x1029   : > { %2394 = vmatpush.msrb.mxu2 %v2689_v11 }
0x102a   : > { %v3636_v16 = vadd.f32 %v2773_v14, %v2215_v15  ;;  %v2686_v15 = vld [vmem:[%s3800_s19 + $0x98] sm:$0xff] }
0x102b   : > { %2395 = vmatpush.msrb.mxu2 %v2688_v13 }
0x102c   : > { %v2228_v30 = vsel %vm849_vm4, %v3636_v16, 0.0 }
0x102d   : > { %2229 = vadd.xlane.f32.xlu2 %v2228_v30  ;;  %v2183_v18 = vpop.f32.mrf.mxu0  ;;  %v2776_v30 = vld [vmem:[%s3799_s18 + $0x1] ss:$0 sm:$0xff] }
0x102e   : > { %v2213_v36 = vadd.f32 %v2212_v17, %v2183_v18  ;;  %v2685_v17 = vld [vmem:[%s3800_s19 + $0x90] sm:$0xff] }
0x1030   : > { %v2216_v19 = vadd.f32 %v2213_v36, %v3464_v12  ;;  %v2684_v36 = vld [vmem:[%s3800_s19 + $0x88] sm:$0xff] }
0x1032   : > { %v2223_v21 = vadd.f32 %v2773_v14, %v2216_v19  ;;  %v2687_v14 = vld [vmem:[%s3800_s19 + $0xa0] sm:$0xff] }
0x1033   : > { %2396 = vmatpush.msrb.mxu2 %v2687_v14 }
0x1034   : > { %v2231_v22 = vsel %vm853_vm5, %v2223_v21, 0.0 }
0x1035   : > { %2232 = vadd.xlane.f32.xlu1 %v2231_v22  ;;  %2397 = vmatpush.msrb.mxu2 %v2686_v15  ;;  %v2408_v15 = vld [vmem:[%s3802_s21] sm:$0x1] }
0x1037   : > { %2398 = vmatpush.msrb.mxu2 %v2685_v17 }
0x1039   : > { %2399 = vmatpush.msrb.mxu2 %v2684_v36 }
0x10a0   : > { %v2230_v23 = vpop.xlane.xlu2 %2229 }
0x10a1   : > { %v2234_v24 = vmul.f32 %v2230_v23, %v3177_v51 }
0x10a3   : > { %v2236_v8 = vsub.f32 %v3636_v16, %v2234_v24 }
0x10a5   : > { %v2238_v25 = vmul.f32 %v2236_v8, %v2236_v8 }
0x10a7   : > { %v2240_v27 = vsel %vm849_vm4, %v2238_v25, 0.0 }
0x10a8   : > { %2241 = vadd.xlane.f32.xlu0 %v2240_v27  ;;  %v2233_v28 = vpop.xlane.xlu1 %2232 }
0x10a9   : > { %v2235_v29 = vmul.f32 %v2233_v28, %v3177_v51 }
0x10ab   : > { %v2237_v31 = vsub.f32 %v2223_v21, %v2235_v29  ;;  %v2683_v21 = vld [vmem:[%s3800_s19 + $0x80] sm:$0xff] }
0x10ac   : > { %2400 = vmatpush.msrb.mxu2 %v2683_v21 }
0x10ad   : > { %v2239_v32 = vmul.f32 %v2237_v31, %v2237_v31 }
0x10af   : > { %v2243_v12 = vsel %vm853_vm5, %v2239_v32, 0.0 }
0x10b0   : > { %2244 = vadd.xlane.f32.xlu2 %v2243_v12 }
0x111b   : > { %v2242_v38 = vpop.xlane.xlu0 %2241 }
0x111c   : > { %v2246_v20 = vmul.f32 %v2242_v38, %v3177_v51 }
0x111e   : > { %v2248_v39 = vadd.f32 1e-05, %v2246_v20 }
0x1120   : > { %2836 = vrsqrt.f32 %v2248_v39  ;;  %vm2256_vm7 = vweird.f32 %v2248_v39 }
0x1123   : > { %v2245_v40 = vpop.xlane.xlu2 %2244 }
0x1124   : > { %v2247_v41 = vmul.f32 %v2245_v40, %v3177_v51 }
0x1126   : > { %v2837_v42 = vpop.eup %2836  ;;  %v2249_v43 = vadd.f32 1e-05, %v2247_v41 }
0x1127   : > { %v2251_v26 = vmul.f32 %v2837_v42, %v2248_v39  ;;  %vm2257_vm6 = vweird.f32 %v2837_v42 }
0x1128   : > { %2838 = vrsqrt.f32 %v2249_v43  ;;  %vm2258_vm2 = vmor %vm2256_vm7, %vm2257_vm6  ;;  %vm2266_vm10 = vweird.f32 %v2249_v43 }
0x1129   : > { %v2252_v44 = vmul.f32 %v2837_v42, %v2251_v26 }
0x112b   : > { %v2253_v45 = vmul.f32 0.5, %v2252_v44 }
0x112d   : > { %v2254_v46 = vsub.f32 1.5, %v2253_v45 }
0x112e   : > { %v2839_v47 = vpop.eup %2838 }
0x112f   : > { %v2255_v48 = vmul.f32 %v2837_v42, %v2254_v46  ;;  %v2261_v49 = vmul.f32 %v2839_v47, %v2249_v43  ;;  %vm2267_vm9 = vweird.f32 %v2839_v47 }
0x1130   : > { %vm2268_vm11 = vmor %vm2266_vm10, %vm2267_vm9 }
0x1131   : > { %v2259_v52 = vsel %vm2258_vm2, %v2837_v42, %v2255_v48  ;;  %v2262_v53 = vmul.f32 %v2839_v47, %v2261_v49 }
0x1132   : > { %v2270_v54 = vmul.f32 %v2259_v52, %v2236_v8 }
0x1133   : > { %v2263_v56 = vmul.f32 0.5, %v2262_v53 }
0x1134   : > { %v2275_v57 = vmul.f32 %v2774_v50, %v2270_v54  ;;  %v2777_v54 = vld [vmem:[%s3801_s20 + $0x1] ss:$0 sm:$0xff] }
0x1135   : > { %v2264_v58 = vsub.f32 1.5, %v2263_v56 }
0x1136   : > { %v2280_v59 = vadd.f32 %v2775_v55, %v2275_v57 }
0x1137   : > { %v2265_v60 = vmul.f32 %v2839_v47, %v2264_v58 }
0x1138   : > { %2679 = vmatmul.msk.f32.vlgmr.msrb.gmra.mxu3 %vm849_vm4, %v2280_v59 }
0x1139   : > { %v2269_v61 = vsel %vm2268_vm11, %v2839_v47, %v2265_v60 }
0x113a   : > { %v2271_v62 = vmul.f32 %v2269_v61, %v2237_v31 }
0x113c   : > { %v2276_v63 = vmul.f32 %v2774_v50, %v2271_v62 }
0x113e   : > { %v2281_v0 = vadd.f32 %v2775_v55, %v2276_v63 }
0x1140   : > { %2680 = vmatmul.msk.f32.gmra.mxu3 %vm849_vm4, %v2281_v0 }
0x11bb   : > { %v2315_v18 = vpop.f32.mrf.mxu3 }
0x11bc   : > { %v2316_v19 = vadd.f32 %v2776_v30, %v2315_v18 }
0x11be   : > { %v2681_v22 = vmul.f32 -1.702, %v2316_v19 }
0x11c0   : > { %v2325_v23 = vmul.f32 1.442695, %v2681_v22 }
0x11c2   : > { %2840 = vpow2.f32 %v2325_v23 }
0x11c3   : > { %v2318_v24 = vpop.f32.mrf.mxu3 }
0x11c4   : > { %v2319_v8 = vadd.f32 %v2776_v30, %v2318_v24 }
0x11c6   : > { %v2682_v25 = vmul.f32 -1.702, %v2319_v8 }
0x11c8   : > { %v2841_v27 = vpop.eup %2840  ;;  %v2327_v28 = vmul.f32 1.442695, %v2682_v25 }
0x11c9   : > { %v2329_v29 = vadd.f32 1.0, %v2841_v27 }
0x11ca   : > { %2842 = vpow2.f32 %v2327_v28 }
0x11cb   : > { %2844 = vrcp.f32 %v2329_v29  ;;  %v2342_v35 = vand.u32 2147483648, %v2329_v29  ;;  %v2340_v38 = vand.u32 2147483647, %v2329_v29  ;;  %vm2336_vm13 = vweird.f32 %v2329_v29 }
0x11cd   : > { %v2343_v40 = vor.u32 1.1754944e-38, %v2342_v35  ;;  %vm2341_vm14 = vcmp.eq.f32.partialorder %v2340_v38, 8.507059e+37 }
0x11d0   : > { %v2843_v31 = vpop.eup %2842 }
0x11d1   : > { %v2845_v32 = vpop.eup %2844  ;;  %v2330_v12 = vadd.f32 1.0, %v2843_v31 }
0x11d2   : > { %v2332_v33 = vmul.f32 %v2845_v32, %v2329_v29  ;;  %vm2337_vm12 = vweird.f32 %v2845_v32 }
0x11d3   : > { %2846 = vrcp.f32 %v2330_v12  ;;  %vm2338_vm8 = vmor %vm2336_vm13, %vm2337_vm12  ;;  %v2357_v45 = vand.u32 2147483648, %v2330_v12  ;;  %v2355_v47 = vand.u32 2147483647, %v2330_v12  ;;  %vm2351_vm15 = vweird.f32 %v2330_v12 }
0x11d4   : > { %v2333_v34 = vsub.f32 1.0, %v2332_v33 }
0x11d5   : > { %v2358_v49 = vor.u32 1.1754944e-38, %v2357_v45  ;;  %vm2356_vm1 = vcmp.eq.f32.partialorder %v2355_v47, 8.507059e+37 }
0x11d6   : > { %v2334_v37 = vmul.f32 %v2845_v32, %v2333_v34 }
0x11d8   : > { %v2335_v20 = vadd.f32 %v2845_v32, %v2334_v37 }
0x11d9   : > { %v2847_v39 = vpop.eup %2846 }
0x11da   : > { %v2339_v41 = vsel %vm2338_vm8, %v2845_v32, %v2335_v20  ;;  %v2347_v42 = vmul.f32 %v2847_v39, %v2330_v12  ;;  %vm2352_vm3 = vweird.f32 %v2847_v39 }
0x11db   : > { %v2344_v43 = vsel %vm2341_vm14, %v2343_v40, %v2339_v41  ;;  %vm2353_vm0 = vmor %vm2351_vm15, %vm2352_vm3 }
0x11dc   : > { %v2361_v26 = vmul.f32 %v2344_v43, %v2316_v19  ;;  %v2348_v44 = vsub.f32 1.0, %v2347_v42 }
0x11de   : > { %2401 = vmatmul.f32.vlgmr.msrb.gmra.mxu2 %v2361_v26  ;;  %v2349_v46 = vmul.f32 %v2847_v39, %v2348_v44 }
0x11e0   : > { %v2350_v48 = vadd.f32 %v2847_v39, %v2349_v46 }
0x11e2   : > { %v2354_v50 = vsel %vm2353_vm0, %v2847_v39, %v2350_v48 }
0x11e3   : > { %v2359_v52 = vsel %vm2356_vm1, %v2358_v49, %v2354_v50 }
0x11e4   : > { %v2362_v53 = vmul.f32 %v2359_v52, %v2319_v8 }
0x11e6   : > { %2404 = vmatmul.f32.gmra.mxu2 %v2362_v53 }
0x1261   : > { %v2402_v55 = vpop.f32.mrf.mxu2 }
0x1262   : > { %v2403_v56 = vadd.f32 %v2777_v54, %v2402_v55 }
0x1264   : > { %v2407_v57 = vadd.f32 %v2403_v56, %v3636_v16  ;;  %v2436_v16 = vld [vmem:[%s3804_s23 + $0x10] sm:$0xff] }
0x1265   : > { %2454 = vmatpush.msra.mxu0 %v2436_v16 }
0x1266   : > { %v2410_v58 = vsel %vm853_vm5, %v2407_v57, 0.0 }
0x1267   : > { %2411 = vadd.xlane.f32.xlu0 %v2410_v58  ;;  %2455 = vmatpush.msra.mxu0 %v2435_v2 }
0x1269   : > { %v2405_v59 = vpop.f32.mrf.mxu2  ;;  %2456 = vmatpush.msra.mxu0 %v2434_v3 }
0x12da   : > { %v2412_v60 = vpop.xlane.xlu0 %2411 }
0x12db   : > { %v2413_v61 = vmul.f32 %v2412_v60, %v3177_v51 }
0x12dd   : > { %v2414_v62 = vsub.f32 %v2407_v57, %v2413_v61 }
0x12df   : > { %v2415_v63 = vmul.f32 %v2414_v62, %v2414_v62 }
0x12e1   : > { %v2416_v0 = vsel %vm853_vm5, %v2415_v63, 0.0 }
0x12e2   : > { %2417 = vadd.xlane.f32.xlu1 %v2416_v0 }
0x1355   : > { %v2418_v4 = vpop.xlane.xlu1 %2417 }
0x1356   : > { %v2419_v5 = vmul.f32 %v2418_v4, %v3177_v51  ;;  %v2409_v51 = vld [vmem:[%s3803_s22] sm:$0x1] }
0x1358   : > { %v2420_v6 = vadd.f32 1e-05, %v2419_v5 }
0x135a   : > { %2848 = vrsqrt.f32 %v2420_v6  ;;  %vm2427_vm7 = vweird.f32 %v2420_v6 }
0x1360   : > { %v2849_v7 = vpop.eup %2848 }
0x1361   : > { %v2422_v9 = vmul.f32 %v2849_v7, %v2420_v6  ;;  %vm2428_vm6 = vweird.f32 %v2849_v7 }
0x1362   : > { %vm2429_vm2 = vmor %vm2427_vm7, %vm2428_vm6 }
0x1363   : > { %v2423_v10 = vmul.f32 %v2849_v7, %v2422_v9 }
0x1365   : > { %v2424_v11 = vmul.f32 0.5, %v2423_v10 }
0x1367   : > { %v2425_v13 = vsub.f32 1.5, %v2424_v11 }
0x1369   : > { %v2426_v14 = vmul.f32 %v2849_v7, %v2425_v13 }
0x136b   : > { %v2430_v30 = vsel %vm2429_vm2, %v2849_v7, %v2426_v14 }
0x136c   : > { %v2431_v17 = vmul.f32 %v2430_v30, %v2414_v62 }
0x136e   : > { %v2432_v18 = vmul.f32 %v2431_v17, %v2408_v15 }
0x1370   : > { %v2433_v36 = vadd.f32 %v2432_v18, %v2409_v51 }
0x1372   : > { %2700 = vmatmul.msk.f32.vlgmr.msra.gmra.mxu0 %vm849_vm4, %v2433_v36 }
0x13ef   : > { %v2458_v19 = vpop.f32.mrf.mxu0 }
0x13f0   : > { %v2461_v21 = vmul.f32 %v2458_v19, %v2458_v19 }
0x13f2   : > { %v2462_v22 = vsel %vm853_vm5, %v2461_v21, 0.0 }
0x13f3   : > { %2463 = vadd.xlane.f32.xlu2 %v2462_v22 }
0x1466   : > { %v2464_v23 = vpop.xlane.xlu2 %2463 }
0x1467   : > { %2850 = vrsqrt.f32 %v2464_v23  ;;  %vm2471_vm4 = vweird.f32 %v2464_v23 }
0x146d   : > { %v2851_v24 = vpop.eup %2850 }
0x146e   : > { %v2466_v8 = vmul.f32 %v2851_v24, %v2464_v23  ;;  %vm2472_vm9 = vweird.f32 %v2851_v24 }
0x146f   : > { %vm2473_vm10 = vmor %vm2471_vm4, %vm2472_vm9 }
0x1470   : > { %v2467_v25 = vmul.f32 %v2851_v24, %v2466_v8 }
0x1472   : > { %v2468_v27 = vmul.f32 0.5, %v2467_v25 }
0x1474   : > { %v2469_v28 = vsub.f32 1.5, %v2468_v27 }
0x1476   : > { %v2470_v29 = vmul.f32 %v2851_v24, %v2469_v28 }
0x1478   : > { %v2474_v31 = vsel %vm2473_vm10, %v2851_v24, %v2470_v29 }
0x1479   : > { %v2475_v32 = vmul.f32 %v2474_v31, %v2458_v19 }
0x147b   : > { %2476 = vst.msk [vmem:[%s729_s28] sm:$0x1] %vm853_vm5, %v2475_v32 }
0x147c   : > { %2879 = shalt.err (!%p2876_p3)
}
0x147d   : > { %2709 = dma.vmem_to_hbm [thread:$0]  (%p3081_p5), %s2489_s0, 16, %s2491_s25, %s2478_s1  }
0x147e PF: > { %s3861_s3 = sld [smem:[#allocation7_spill]] }
0x147f   : > { %s3862_s28 = sld [smem:[#allocation5_spill]] }
0x1484   : > { %p2715_p4 = scmp.ge.s32.totalorder %s3861_s3, 2 }
0x1485   : > { %s2502_s10 = sand.u32 1, %s3862_s28  }
0x1486   : > { %p2712_p7 = pnand %p2715_p4, %p3085_p6  ;;  %s2503_s6 = scalar_lea.sflag [#allocation3], %s2502_s10 }
0x1488   : > { %p2713_p8 = pneg %p2712_p7 }
0x148a   : > { %2897 = dma.done.wait (%p2713_p8), %s2503_s6, 16  }
0x148b   : > { %2899 = vsyncadd (%p2713_p8), %s2503_s6, 4294967280  ;;  %s3864_s28 = sld [smem:[#allocation8_spill]]  ;;  %s3867_s5 = smov %s2906_s26 }
0x148c   : > { %s3865_s2 = sld [smem:[#allocation6_spill]] }
0x148d   : > { %s3866_s27 = sld [smem:[#allocation9_spill]] }
0x1491   : > { %p34_p9 = scmp.ge.s32.totalorder %s3864_s28, 4  }
0x1492   : > { %s3868_s26 = smov %s3865_s2 }
0x1493   :  { %36 = sbr.rel (!%p34_p9) target bundleno = 16 (0x10), region = 181 }
0x1498   :  { %2508 = vsyncpa [#allocation3], 1 }
0x1499   :  { %2510 = vsyncpa [#allocation3 + $0x1], 1 }

</bundles_post_ra>
